<compile_context>
chip_gen: v6e
topology: v6e:2x2x1
jax: 0.10.0
libtpu: 0.0.40
codegen_flags: <defaults>
</compile_context>

<pallas_src>
from functools import partial

import jax
import jax.numpy as jnp
from jax.experimental import pallas as pl
from jax.experimental.pallas import tpu as pltpu

BN_EPS = 1e-5


# ----------------------------- in-kernel helpers -----------------------------

def _bn_relu(y, gamma, beta):
    # BatchNorm1d (training mode: batch mean, biased variance) -> affine -> ReLU
    mean = jnp.mean(y, axis=0, keepdims=True)
    var = jnp.mean(jnp.square(y - mean), axis=0, keepdims=True)
    y = (y - mean) * jax.lax.rsqrt(var + BN_EPS)
    return jnp.maximum(y * gamma + beta, 0.0)


def _pair_selectors(n):
    # One-hot selection matrices of shape (n*n, n), built with 2-D iota and
    # compares only (no vector int div/mod). For pair row k = a*n + b:
    #   s_rep [k, j] = 1 iff j == a   (repeat_interleave row pattern)
    #   s_tile[k, j] = 1 iff j == b   (tile row pattern)
    rows = jax.lax.broadcasted_iota(jnp.int32, (n * n, n), 0)
    cols = jax.lax.broadcasted_iota(jnp.int32, (n * n, n), 1)
    lo = cols * n
    s_rep = jnp.logical_and(rows >= lo, rows < lo + n).astype(jnp.float32)
    # recover a = k // n as a column via a tiny matmul with [0..n-1]
    idx = jax.lax.broadcasted_iota(jnp.int32, (n, 1), 0).astype(jnp.float32)
    a_col = jnp.dot(s_rep, idx, preferred_element_type=jnp.float32)   # (n*n, 1)
    b_mat = rows.astype(jnp.float32) - float(n) * a_col               # k % n
    s_tile = (cols.astype(jnp.float32) == b_mat).astype(jnp.float32)
    return s_tile, s_rep


# ----------------------------- fused decoder kernel -----------------------------

def _decoder_kernel(*refs, seq_start_end, h_dim):
    (last_pos0, last_pos_rel0, h0, c0,
     lstm_wih, lstm_whh, lstm_b,
     dsp_w, dsp_b,
     h2p_w, h2p_b,
     d1_wh, d1_wp, d1_b, d1_g, d1_bt,
     d2_w, d2_b, d2_g, d2_bt,
     ps_w, ps_b,
     p1_we, p1_wh, p1_b, p1_g, p1_bt,
     p2_w, p2_b, p2_g, p2_bt,
     pred_ref, finalh_ref,
     h_s, c_s, din_s, lpos_s, pool_s) = refs

    H = h_dim
    t = pl.program_id(0)

    def dot(a, b):
        return jnp.dot(a, b, preferred_element_type=jnp.float32)

    # ---- step 0: load recurrent state into resident VMEM scratch ----
    @pl.when(t == 0)
    def _init():
        h_s[...] = h0[...]
        c_s[...] = c0[...]
        lpos_s[...] = last_pos0[...]
        din_s[...] = dot(last_pos_rel0[...], dsp_w[...]) + dsp_b[...]

    # ---- LSTM cell (PyTorch gate order [i, f, g, o]) ----
    h_prev = h_s[...]
    gates = (dot(din_s[...], lstm_wih[...]) + dot(h_prev, lstm_whh[...])
             + lstm_b[...])                                    # (batch, 4H)
    sig = jax.nn.sigmoid(gates)                                # whole 4H slab (EUP)
    i_g = sig[:, 0 * H:1 * H]
    f_g = sig[:, 1 * H:2 * H]
    o_g = sig[:, 3 * H:4 * H]
    g_g = jnp.tanh(gates[:, 2 * H:3 * H])
    c_new = f_g * c_s[...] + i_g * g_g
    h_lstm = o_g * jnp.tanh(c_new)
    c_s[...] = c_new

    # ---- hidden2pos ----
    rel_pos = dot(h_lstm, h2p_w[...]) + h2p_b[...]             # (batch, 2)
    curr_pos = rel_pos + lpos_s[...]

    # ---- AttenPoolNet pooling (attention weights == constant 0.05) ----
    sel_cache = {}
    for (start, end) in seq_start_end:
        n = end - start
        if n not in sel_cache:
            sel_cache[n] = _pair_selectors(n)
        s_tile, s_rep = sel_cache[n]
        pos_g = curr_pos[start:end, :]                         # (n, 2)
        h_g = h_lstm[start:end, :]                             # (n, H)
        rel_pairs = dot(s_tile, pos_g) - dot(s_rep, pos_g)     # (n*n, 2)
        rel_emb = dot(rel_pairs, ps_w[...]) + ps_b[...]        # (n*n, E)
        hid_rep = dot(s_tile, h_g)                             # (n*n, H)
        # mlp_pre_pool layer 1: concat([rel_emb, hid_rep]) folded into split
        # matmuls, scaled by the constant 0.05 attention weight.
        m1 = _bn_relu(
            0.05 * (dot(rel_emb, p1_we[...]) + dot(hid_rep, p1_wh[...]))
            + p1_b[...],
            p1_g[...], p1_bt[...])                             # (n*n, 512)
        m2 = _bn_relu(dot(m1, p2_w[...]) + p2_b[...],
                      p2_g[...], p2_bt[...])                   # (n*n, bottleneck)
        # max over each consecutive group of n rows -> pool rows [start, end),
        # assembled and stored with a single vector store per group.
        group_pool = jnp.concatenate(
            [jnp.max(m2[a * n:(a + 1) * n, :], axis=0, keepdims=True)
             for a in range(n)], axis=0)                       # (n, bottleneck)
        pool_s[start:end, :] = group_pool

    pool_h = pool_s[...]                                       # (batch, bottleneck)

    # ---- decoder mlp: [h_dim + bottleneck, mlp_dim, h_dim] (concat folded) ----
    d1 = _bn_relu(dot(h_lstm, d1_wh[...]) + dot(pool_h, d1_wp[...]) + d1_b[...],
                  d1_g[...], d1_bt[...])
    h_new = _bn_relu(dot(d1, d2_w[...]) + d2_b[...], d2_g[...], d2_bt[...])

    # ---- carry state & emit outputs ----
    h_s[...] = h_new
    lpos_s[...] = curr_pos
    din_s[...] = dot(rel_pos, dsp_w[...]) + dsp_b[...]
    pred_ref[t] = rel_pos          # resident output block: one HBM writeback
    finalh_ref[...] = h_new


# ----------------------------- parameters -----------------------------

def _init_linear(key, din, dout, scale=0.1):
    kw, kb = jax.random.split(key)
    return (scale * jax.random.normal(kw, (din, dout), jnp.float32),
            scale * jax.random.normal(kb, (1, dout), jnp.float32))


def init_decoder_params(key, embedding_dim, h_dim, mlp_dim, bottleneck_dim):
    E, H = embedding_dim, h_dim
    ks = jax.random.split(key, 12)
    p = {}
    # nn.LSTM(embedding_dim, h_dim, 1); combined bias = b_ih + b_hh
    p["lstm_wih"] = 0.1 * jax.random.normal(ks[0], (E, 4 * H), jnp.float32)
    p["lstm_whh"] = 0.1 * jax.random.normal(ks[1], (H, 4 * H), jnp.float32)
    p["lstm_b"] = 0.1 * jax.random.normal(ks[2], (1, 4 * H), jnp.float32)
    # Decoder.spatial_embedding / hidden2pos
    p["dec_spatial_w"], p["dec_spatial_b"] = _init_linear(ks[3], 2, E)
    p["hidden2pos_w"], p["hidden2pos_b"] = _init_linear(ks[4], H, 2)
    # Decoder.mlp : [h_dim + bottleneck, mlp_dim, h_dim]; first-layer weight is
    # stored split row-wise (h rows / pool rows) so the concat never materializes.
    p["mlp1_wh"], _ = _init_linear(ks[5], H, mlp_dim)
    p["mlp1_wp"], p["mlp1_b"] = _init_linear(ks[6], bottleneck_dim, mlp_dim)
    p["mlp1_gamma"] = jnp.ones((1, mlp_dim), jnp.float32)
    p["mlp1_beta"] = jnp.zeros((1, mlp_dim), jnp.float32)
    p["mlp2_w"], p["mlp2_b"] = _init_linear(ks[7], mlp_dim, H)
    p["mlp2_gamma"] = jnp.ones((1, H), jnp.float32)
    p["mlp2_beta"] = jnp.zeros((1, H), jnp.float32)
    # AttenPoolNet.spatial_embedding
    p["pool_spatial_w"], p["pool_spatial_b"] = _init_linear(ks[8], 2, E)
    # mlp_pre_pool : [E + H, 512, bottleneck] (512 hardcoded as in the reference);
    # first-layer weight split row-wise (rel_emb rows / hidden rows).
    p["pre1_we"], _ = _init_linear(ks[9], E, 512)
    p["pre1_wh"], p["pre1_b"] = _init_linear(ks[10], H, 512)
    p["pre1_gamma"] = jnp.ones((1, 512), jnp.float32)
    p["pre1_beta"] = jnp.zeros((1, 512), jnp.float32)
    p["pre2_w"], p["pre2_b"] = _init_linear(ks[11], 512, bottleneck_dim)
    p["pre2_gamma"] = jnp.ones((1, bottleneck_dim), jnp.float32)
    p["pre2_beta"] = jnp.zeros((1, bottleneck_dim), jnp.float32)
    # AttenPoolNet.velocity_embedding / attention_mlp exist in the reference but
    # cannot affect the output: softmax over an (n*n, 1) row is identically 1,
    # so attention weights are the constant 0.05. They are intentionally not
    # materialized / passed to the kernel.
    return p


# ----------------------------- forward (single fused pallas_call) -----------------------------

def _full_spec(arr):
    nd = arr.ndim
    return pl.BlockSpec(arr.shape, lambda t, _nd=nd: (0,) * _nd)


@partial(jax.jit, static_argnums=(1, 5))
def decoder_forward(params, seq_len, last_pos, last_pos_rel, state_tuple,
                    seq_start_end, vx, vy):
    """Decoder.forward. Returns (pred_traj_fake_rel (T, batch, 2), h (1, batch, H)).

    vx / vy only feed the attention branch, whose softmax over a singleton axis
    is identically 1 — they cannot change the output and are unused.
    """
    del vx, vy
    h0, c0 = state_tuple                                   # (1, batch, H) each
    batch = last_pos.shape[0]
    H = h0.shape[-1]
    h0 = h0.reshape(batch, H)
    c0 = c0.reshape(batch, H)

    seq_start_end = tuple((int(s), int(e)) for s, e in seq_start_end)
    assert seq_start_end[0][0] == 0 and seq_start_end[-1][1] == batch

    p = params
    E = p["lstm_wih"].shape[0]
    bottleneck = p["mlp1_wp"].shape[0]

    inputs = (
        last_pos, last_pos_rel, h0, c0,
        p["lstm_wih"], p["lstm_whh"], p["lstm_b"],
        p["dec_spatial_w"], p["dec_spatial_b"],
        p["hidden2pos_w"], p["hidden2pos_b"],
        p["mlp1_wh"], p["mlp1_wp"], p["mlp1_b"], p["mlp1_gamma"], p["mlp1_beta"],
        p["mlp2_w"], p["mlp2_b"], p["mlp2_gamma"], p["mlp2_beta"],
        p["pool_spatial_w"], p["pool_spatial_b"],
        p["pre1_we"], p["pre1_wh"], p["pre1_b"], p["pre1_gamma"], p["pre1_beta"],
        p["pre2_w"], p["pre2_b"], p["pre2_gamma"], p["pre2_beta"],
    )

    kernel = partial(_decoder_kernel, seq_start_end=seq_start_end, h_dim=H)

    grid_spec = pltpu.PrefetchScalarGridSpec(
        num_scalar_prefetch=0,
        grid=(seq_len,),
        in_specs=[_full_spec(x) for x in inputs],
        out_specs=(
            # both outputs are VMEM-resident across the whole grid (constant
            # block index) -> exactly one HBM writeback each at the end.
            pl.BlockSpec((seq_len, batch, 2), lambda t: (0, 0, 0)),
            pl.BlockSpec((batch, H), lambda t: (0, 0)),
        ),
        scratch_shapes=[
            pltpu.VMEM((batch, H), jnp.float32),            # h carry
            pltpu.VMEM((batch, H), jnp.float32),            # c carry
            pltpu.VMEM((batch, E), jnp.float32),            # decoder_input carry
            pltpu.VMEM((batch, 2), jnp.float32),            # last_pos carry
            pltpu.VMEM((batch, bottleneck), jnp.float32),   # pool_h assembly
        ],
    )

    pred, final_h = pl.pallas_call(
        kernel,
        out_shape=(jax.ShapeDtypeStruct((seq_len, batch, 2), jnp.float32),
                   jax.ShapeDtypeStruct((batch, H), jnp.float32)),
        grid_spec=grid_spec,
        compiler_params=pltpu.CompilerParams(
            dimension_semantics=("arbitrary",)),
    )(*inputs)

    return pred, final_h[None, :, :]


# ----------------------------- main -----------------------------

if __name__ == "__main__":
    seq_len = 4
    embedding_dim = 16
    h_dim = 32
    mlp_dim = 64
    bottleneck_dim = 64
    batch = 6
    seq_start_end = ((0, 3), (3, 6))   # two groups of 3 pedestrians

    key = jax.random.PRNGKey(0)
    kp, k1, k2, k3, k4, k5, k6 = jax.random.split(key, 7)
    params = init_decoder_params(kp, embedding_dim, h_dim, mlp_dim, bottleneck_dim)

    last_pos = jax.random.normal(k1, (batch, 2), jnp.float32)
    last_pos_rel = jax.random.normal(k2, (batch, 2), jnp.float32)
    hh = 0.1 * jax.random.normal(k3, (1, batch, h_dim), jnp.float32)
    ch = 0.1 * jax.random.normal(k4, (1, batch, h_dim), jnp.float32)
    vx = jax.random.normal(k5, (4, batch), jnp.float32)
    vy = jax.random.normal(k6, (4, batch), jnp.float32)

    pred, final_h = decoder_forward(params, seq_len, last_pos, last_pos_rel,
                                    (hh, ch), seq_start_end, vx, vy)
    jax.block_until_ready((pred, final_h))
    assert pred.shape == (seq_len, batch, 2)
    assert final_h.shape == (1, batch, h_dim)
    assert bool(jnp.all(jnp.isfinite(pred))) and bool(jnp.all(jnp.isfinite(final_h)))
    print("KERNEL_OK")
</pallas_src>

<mosaic_0001>
module attributes {stable_mosaic.version = 11 : i64} {
  func.func @_decoder_kernel(%arg0: i32, %arg1: memref<6x2xf32, #tpu.memory_space<vmem>>, %arg2: memref<6x2xf32, #tpu.memory_space<vmem>>, %arg3: memref<6x32xf32, #tpu.memory_space<vmem>>, %arg4: memref<6x32xf32, #tpu.memory_space<vmem>>, %arg5: memref<16x128xf32, #tpu.memory_space<vmem>>, %arg6: memref<32x128xf32, #tpu.memory_space<vmem>>, %arg7: memref<1x128xf32, #tpu.memory_space<vmem>>, %arg8: memref<2x16xf32, #tpu.memory_space<vmem>>, %arg9: memref<1x16xf32, #tpu.memory_space<vmem>>, %arg10: memref<32x2xf32, #tpu.memory_space<vmem>>, %arg11: memref<1x2xf32, #tpu.memory_space<vmem>>, %arg12: memref<32x64xf32, #tpu.memory_space<vmem>>, %arg13: memref<64x64xf32, #tpu.memory_space<vmem>>, %arg14: memref<1x64xf32, #tpu.memory_space<vmem>>, %arg15: memref<1x64xf32, #tpu.memory_space<vmem>>, %arg16: memref<1x64xf32, #tpu.memory_space<vmem>>, %arg17: memref<64x32xf32, #tpu.memory_space<vmem>>, %arg18: memref<1x32xf32, #tpu.memory_space<vmem>>, %arg19: memref<1x32xf32, #tpu.memory_space<vmem>>, %arg20: memref<1x32xf32, #tpu.memory_space<vmem>>, %arg21: memref<2x16xf32, #tpu.memory_space<vmem>>, %arg22: memref<1x16xf32, #tpu.memory_space<vmem>>, %arg23: memref<16x512xf32, #tpu.memory_space<vmem>>, %arg24: memref<32x512xf32, #tpu.memory_space<vmem>>, %arg25: memref<1x512xf32, #tpu.memory_space<vmem>>, %arg26: memref<1x512xf32, #tpu.memory_space<vmem>>, %arg27: memref<1x512xf32, #tpu.memory_space<vmem>>, %arg28: memref<512x64xf32, #tpu.memory_space<vmem>>, %arg29: memref<1x64xf32, #tpu.memory_space<vmem>>, %arg30: memref<1x64xf32, #tpu.memory_space<vmem>>, %arg31: memref<1x64xf32, #tpu.memory_space<vmem>>, %arg32: memref<4x6x2xf32, #tpu.memory_space<vmem>>, %arg33: memref<6x32xf32, #tpu.memory_space<vmem>>, %arg34: memref<6x32xf32, #tpu.memory_space<vmem>>, %arg35: memref<6x32xf32, #tpu.memory_space<vmem>>, %arg36: memref<6x16xf32, #tpu.memory_space<vmem>>, %arg37: memref<6x2xf32, #tpu.memory_space<vmem>>, %arg38: memref<6x64xf32, #tpu.memory_space<vmem>>) attributes {dimension_semantics = [#tpu.dimension_semantics<arbitrary>], iteration_bounds = array<i64: 4>, scalar_prefetch = 0 : i64, scratch_operands = 5 : i64, tpu.core_type = #tpu.core_type<tc>, window_params = [{pipeline_mode = #tpu.pipeline_mode<synchronous>, transform_indices = @transform_0, window_bounds = array<i64: 6, 2>}, {pipeline_mode = #tpu.pipeline_mode<synchronous>, transform_indices = @transform_1, window_bounds = array<i64: 6, 2>}, {pipeline_mode = #tpu.pipeline_mode<synchronous>, transform_indices = @transform_2, window_bounds = array<i64: 6, 32>}, {pipeline_mode = #tpu.pipeline_mode<synchronous>, transform_indices = @transform_3, window_bounds = array<i64: 6, 32>}, {pipeline_mode = #tpu.pipeline_mode<synchronous>, transform_indices = @transform_4, window_bounds = array<i64: 16, 128>}, {pipeline_mode = #tpu.pipeline_mode<synchronous>, transform_indices = @transform_5, window_bounds = array<i64: 32, 128>}, {pipeline_mode = #tpu.pipeline_mode<synchronous>, transform_indices = @transform_6, window_bounds = array<i64: 1, 128>}, {pipeline_mode = #tpu.pipeline_mode<synchronous>, transform_indices = @transform_7, window_bounds = array<i64: 2, 16>}, {pipeline_mode = #tpu.pipeline_mode<synchronous>, transform_indices = @transform_8, window_bounds = array<i64: 1, 16>}, {pipeline_mode = #tpu.pipeline_mode<synchronous>, transform_indices = @transform_9, window_bounds = array<i64: 32, 2>}, {pipeline_mode = #tpu.pipeline_mode<synchronous>, transform_indices = @transform_10, window_bounds = array<i64: 1, 2>}, {pipeline_mode = #tpu.pipeline_mode<synchronous>, transform_indices = @transform_11, window_bounds = array<i64: 32, 64>}, {pipeline_mode = #tpu.pipeline_mode<synchronous>, transform_indices = @transform_12, window_bounds = array<i64: 64, 64>}, {pipeline_mode = #tpu.pipeline_mode<synchronous>, transform_indices = @transform_13, window_bounds = array<i64: 1, 64>}, {pipeline_mode = #tpu.pipeline_mode<synchronous>, transform_indices = @transform_14, window_bounds = array<i64: 1, 64>}, {pipeline_mode = #tpu.pipeline_mode<synchronous>, transform_indices = @transform_15, window_bounds = array<i64: 1, 64>}, {pipeline_mode = #tpu.pipeline_mode<synchronous>, transform_indices = @transform_16, window_bounds = array<i64: 64, 32>}, {pipeline_mode = #tpu.pipeline_mode<synchronous>, transform_indices = @transform_17, window_bounds = array<i64: 1, 32>}, {pipeline_mode = #tpu.pipeline_mode<synchronous>, transform_indices = @transform_18, window_bounds = array<i64: 1, 32>}, {pipeline_mode = #tpu.pipeline_mode<synchronous>, transform_indices = @transform_19, window_bounds = array<i64: 1, 32>}, {pipeline_mode = #tpu.pipeline_mode<synchronous>, transform_indices = @transform_20, window_bounds = array<i64: 2, 16>}, {pipeline_mode = #tpu.pipeline_mode<synchronous>, transform_indices = @transform_21, window_bounds = array<i64: 1, 16>}, {pipeline_mode = #tpu.pipeline_mode<synchronous>, transform_indices = @transform_22, window_bounds = array<i64: 16, 512>}, {pipeline_mode = #tpu.pipeline_mode<synchronous>, transform_indices = @transform_23, window_bounds = array<i64: 32, 512>}, {pipeline_mode = #tpu.pipeline_mode<synchronous>, transform_indices = @transform_24, window_bounds = array<i64: 1, 512>}, {pipeline_mode = #tpu.pipeline_mode<synchronous>, transform_indices = @transform_25, window_bounds = array<i64: 1, 512>}, {pipeline_mode = #tpu.pipeline_mode<synchronous>, transform_indices = @transform_26, window_bounds = array<i64: 1, 512>}, {pipeline_mode = #tpu.pipeline_mode<synchronous>, transform_indices = @transform_27, window_bounds = array<i64: 512, 64>}, {pipeline_mode = #tpu.pipeline_mode<synchronous>, transform_indices = @transform_28, window_bounds = array<i64: 1, 64>}, {pipeline_mode = #tpu.pipeline_mode<synchronous>, transform_indices = @transform_29, window_bounds = array<i64: 1, 64>}, {pipeline_mode = #tpu.pipeline_mode<synchronous>, transform_indices = @transform_30, window_bounds = array<i64: 1, 64>}, {pipeline_mode = #tpu.pipeline_mode<synchronous>, transform_indices = @transform_31, window_bounds = array<i64: 4, 6, 2>}, {pipeline_mode = #tpu.pipeline_mode<synchronous>, transform_indices = @transform_32, window_bounds = array<i64: 6, 32>}]} {
    %c0_i32 = arith.constant 0 : i32
    %0 = arith.cmpi eq, %arg0, %c0_i32 : i32
    %1 = arith.extui %0 : i1 to i32
    %c0_i32_0 = arith.constant 0 : i32
    %2 = arith.cmpi ne, %1, %c0_i32_0 : i32
    scf.if %2 {
      %c0_169 = arith.constant 0 : index
      %c0_170 = arith.constant 0 : index
      %317 = vector.load %arg3[%c0_169, %c0_170] : memref<6x32xf32, #tpu.memory_space<vmem>>, vector<6x32xf32>
      %c0_171 = arith.constant 0 : index
      %c0_172 = arith.constant 0 : index
      %318 = vector.load %arg34[%c0_171, %c0_172] : memref<6x32xf32, #tpu.memory_space<vmem>>, vector<6x32xf32>
      tpu.vector_store %arg34[%c0_171, %c0_172], %317 {strides = array<i32>} : memref<6x32xf32, #tpu.memory_space<vmem>>, vector<6x32xf32>,
      %c0_173 = arith.constant 0 : index
      %c0_174 = arith.constant 0 : index
      %319 = vector.load %arg4[%c0_173, %c0_174] : memref<6x32xf32, #tpu.memory_space<vmem>>, vector<6x32xf32>
      %c0_175 = arith.constant 0 : index
      %c0_176 = arith.constant 0 : index
      %320 = vector.load %arg35[%c0_175, %c0_176] : memref<6x32xf32, #tpu.memory_space<vmem>>, vector<6x32xf32>
      tpu.vector_store %arg35[%c0_175, %c0_176], %319 {strides = array<i32>} : memref<6x32xf32, #tpu.memory_space<vmem>>, vector<6x32xf32>,
      %c0_177 = arith.constant 0 : index
      %c0_178 = arith.constant 0 : index
      %321 = vector.load %arg1[%c0_177, %c0_178] : memref<6x2xf32, #tpu.memory_space<vmem>>, vector<6x2xf32>
      %c0_179 = arith.constant 0 : index
      %c0_180 = arith.constant 0 : index
      %322 = vector.load %arg37[%c0_179, %c0_180] : memref<6x2xf32, #tpu.memory_space<vmem>>, vector<6x2xf32>
      tpu.vector_store %arg37[%c0_179, %c0_180], %321 {strides = array<i32>} : memref<6x2xf32, #tpu.memory_space<vmem>>, vector<6x2xf32>,
      %c0_181 = arith.constant 0 : index
      %c0_182 = arith.constant 0 : index
      %323 = vector.load %arg2[%c0_181, %c0_182] : memref<6x2xf32, #tpu.memory_space<vmem>>, vector<6x2xf32>
      %c0_183 = arith.constant 0 : index
      %c0_184 = arith.constant 0 : index
      %324 = vector.load %arg8[%c0_183, %c0_184] : memref<2x16xf32, #tpu.memory_space<vmem>>, vector<2x16xf32>
      %cst_185 = arith.constant dense<0.000000e+00> : vector<6x16xf32>
      %325 = tpu.matmul %323, %324, %cst_185 {dimension_numbers = #tpu.dot_dimension_numbers<[1], [0], [0], [1], [0, 0, 1, 1], [], []>} : vector<6x2xf32>, vector<2x16xf32>, vector<6x16xf32> -> vector<6x16xf32>
      %c0_186 = arith.constant 0 : index
      %c0_187 = arith.constant 0 : index
      %326 = vector.load %arg9[%c0_186, %c0_187] : memref<1x16xf32, #tpu.memory_space<vmem>>, vector<1x16xf32>
      %327 = vector.broadcast %326 : vector<1x16xf32> to vector<6x16xf32>
      %328 = arith.addf %325, %327 : vector<6x16xf32>
      %c0_188 = arith.constant 0 : index
      %c0_189 = arith.constant 0 : index
      %329 = vector.load %arg36[%c0_188, %c0_189] : memref<6x16xf32, #tpu.memory_space<vmem>>, vector<6x16xf32>
      tpu.vector_store %arg36[%c0_188, %c0_189], %328 {strides = array<i32>} : memref<6x16xf32, #tpu.memory_space<vmem>>, vector<6x16xf32>,
    } else {
    }
    %c0 = arith.constant 0 : index
    %c0_1 = arith.constant 0 : index
    %3 = vector.load %arg34[%c0, %c0_1] : memref<6x32xf32, #tpu.memory_space<vmem>>, vector<6x32xf32>
    %c0_2 = arith.constant 0 : index
    %c0_3 = arith.constant 0 : index
    %4 = vector.load %arg36[%c0_2, %c0_3] : memref<6x16xf32, #tpu.memory_space<vmem>>, vector<6x16xf32>
    %c0_4 = arith.constant 0 : index
    %c0_5 = arith.constant 0 : index
    %5 = vector.load %arg5[%c0_4, %c0_5] : memref<16x128xf32, #tpu.memory_space<vmem>>, vector<16x128xf32>
    %cst = arith.constant dense<0.000000e+00> : vector<6x128xf32>
    %6 = tpu.matmul %4, %5, %cst {dimension_numbers = #tpu.dot_dimension_numbers<[1], [0], [0], [1], [0, 0, 1, 1], [], []>} : vector<6x16xf32>, vector<16x128xf32>, vector<6x128xf32> -> vector<6x128xf32>
    %c0_6 = arith.constant 0 : index
    %c0_7 = arith.constant 0 : index
    %7 = vector.load %arg6[%c0_6, %c0_7] : memref<32x128xf32, #tpu.memory_space<vmem>>, vector<32x128xf32>
    %cst_8 = arith.constant dense<0.000000e+00> : vector<6x128xf32>
    %8 = tpu.matmul %3, %7, %cst_8 {dimension_numbers = #tpu.dot_dimension_numbers<[1], [0], [0], [1], [0, 0, 1, 1], [], []>} : vector<6x32xf32>, vector<32x128xf32>, vector<6x128xf32> -> vector<6x128xf32>
    %9 = arith.addf %6, %8 : vector<6x128xf32>
    %c0_9 = arith.constant 0 : index
    %c0_10 = arith.constant 0 : index
    %10 = vector.load %arg7[%c0_9, %c0_10] : memref<1x128xf32, #tpu.memory_space<vmem>>, vector<1x128xf32>
    %11 = vector.broadcast %10 : vector<1x128xf32> to vector<6x128xf32>
    %12 = arith.addf %9, %11 : vector<6x128xf32>
    %13 = arith.negf %12 : vector<6x128xf32>
    %14 = math.exp %13 : vector<6x128xf32>
    %cst_11 = arith.constant 1.000000e+00 : f32
    %15 = vector.broadcast %cst_11 : f32 to vector<6x128xf32>
    %16 = arith.addf %15, %14 : vector<6x128xf32>
    %17 = arith.divf %15, %16 : vector<6x128xf32>
    %18 = vector.extract_strided_slice %17 {offsets = [0, 0], sizes = [6, 32], strides = [1, 1]} : vector<6x128xf32> to vector<6x32xf32>
    %19 = vector.extract_strided_slice %17 {offsets = [0, 32], sizes = [6, 32], strides = [1, 1]} : vector<6x128xf32> to vector<6x32xf32>
    %20 = vector.extract_strided_slice %17 {offsets = [0, 96], sizes = [6, 32], strides = [1, 1]} : vector<6x128xf32> to vector<6x32xf32>
    %21 = vector.extract_strided_slice %12 {offsets = [0, 64], sizes = [6, 32], strides = [1, 1]} : vector<6x128xf32> to vector<6x32xf32>
    %22 = math.tanh %21 : vector<6x32xf32>
    %c0_12 = arith.constant 0 : index
    %c0_13 = arith.constant 0 : index
    %23 = vector.load %arg35[%c0_12, %c0_13] : memref<6x32xf32, #tpu.memory_space<vmem>>, vector<6x32xf32>
    %24 = arith.mulf %19, %23 : vector<6x32xf32>
    %25 = arith.mulf %18, %22 : vector<6x32xf32>
    %26 = arith.addf %24, %25 : vector<6x32xf32>
    %27 = math.tanh %26 : vector<6x32xf32>
    %28 = arith.mulf %20, %27 : vector<6x32xf32>
    %c0_14 = arith.constant 0 : index
    %c0_15 = arith.constant 0 : index
    %29 = vector.load %arg35[%c0_14, %c0_15] : memref<6x32xf32, #tpu.memory_space<vmem>>, vector<6x32xf32>
    tpu.vector_store %arg35[%c0_14, %c0_15], %26 {strides = array<i32>} : memref<6x32xf32, #tpu.memory_space<vmem>>, vector<6x32xf32>,
    %c0_16 = arith.constant 0 : index
    %c0_17 = arith.constant 0 : index
    %30 = vector.load %arg10[%c0_16, %c0_17] : memref<32x2xf32, #tpu.memory_space<vmem>>, vector<32x2xf32>
    %cst_18 = arith.constant dense<0.000000e+00> : vector<6x2xf32>
    %31 = tpu.matmul %28, %30, %cst_18 {dimension_numbers = #tpu.dot_dimension_numbers<[1], [0], [0], [1], [0, 0, 1, 1], [], []>} : vector<6x32xf32>, vector<32x2xf32>, vector<6x2xf32> -> vector<6x2xf32>
    %c0_19 = arith.constant 0 : index
    %c0_20 = arith.constant 0 : index
    %32 = vector.load %arg11[%c0_19, %c0_20] : memref<1x2xf32, #tpu.memory_space<vmem>>, vector<1x2xf32>
    %33 = vector.broadcast %32 : vector<1x2xf32> to vector<6x2xf32>
    %34 = arith.addf %31, %33 : vector<6x2xf32>
    %c0_21 = arith.constant 0 : index
    %c0_22 = arith.constant 0 : index
    %35 = vector.load %arg37[%c0_21, %c0_22] : memref<6x2xf32, #tpu.memory_space<vmem>>, vector<6x2xf32>
    %36 = arith.addf %34, %35 : vector<6x2xf32>
    %37 = tpu.iota {dimensions = array<i32: 0>} : vector<9x3xi32>
    %38 = tpu.iota {dimensions = array<i32: 1>} : vector<9x3xi32>
    %c3_i32 = arith.constant 3 : i32
    %39 = vector.broadcast %c3_i32 : i32 to vector<9x3xi32>
    %40 = arith.muli %38, %39 : vector<9x3xi32>
    %41 = arith.cmpi sge, %37, %40 : vector<9x3xi32>
    %c3_i32_23 = arith.constant 3 : i32
    %42 = vector.broadcast %c3_i32_23 : i32 to vector<9x3xi32>
    %43 = arith.addi %40, %42 : vector<9x3xi32>
    %44 = arith.cmpi slt, %37, %43 : vector<9x3xi32>
    %45 = arith.andi %41, %44 : vector<9x3xi1>
    %46 = arith.extui %45 : vector<9x3xi1> to vector<9x3xi32>
    %47 = arith.sitofp %46 : vector<9x3xi32> to vector<9x3xf32>
    %48 = tpu.iota {dimensions = array<i32: 0>} : vector<3x1xi32>
    %49 = arith.sitofp %48 : vector<3x1xi32> to vector<3x1xf32>
    %cst_24 = arith.constant dense<0.000000e+00> : vector<9x1xf32>
    %50 = tpu.matmul %47, %49, %cst_24 {dimension_numbers = #tpu.dot_dimension_numbers<[1], [0], [0], [1], [0, 0, 1, 1], [], []>} : vector<9x3xf32>, vector<3x1xf32>, vector<9x1xf32> -> vector<9x1xf32>
    %51 = arith.sitofp %37 : vector<9x3xi32> to vector<9x3xf32>
    %cst_25 = arith.constant 3.000000e+00 : f32
    %52 = vector.broadcast %cst_25 : f32 to vector<9x1xf32>
    %53 = arith.mulf %52, %50 : vector<9x1xf32>
    %54 = vector.broadcast %53 : vector<9x1xf32> to vector<9x3xf32>
    %55 = arith.subf %51, %54 : vector<9x3xf32>
    %56 = arith.sitofp %38 : vector<9x3xi32> to vector<9x3xf32>
    %57 = arith.cmpf oeq, %56, %55 : vector<9x3xf32>
    %58 = arith.extui %57 : vector<9x3xi1> to vector<9x3xi32>
    %59 = arith.sitofp %58 : vector<9x3xi32> to vector<9x3xf32>
    %60 = vector.extract_strided_slice %36 {offsets = [0, 0], sizes = [3, 2], strides = [1, 1]} : vector<6x2xf32> to vector<3x2xf32>
    %61 = vector.extract_strided_slice %28 {offsets = [0, 0], sizes = [3, 32], strides = [1, 1]} : vector<6x32xf32> to vector<3x32xf32>
    %cst_26 = arith.constant dense<0.000000e+00> : vector<9x2xf32>
    %62 = tpu.matmul %59, %60, %cst_26 {dimension_numbers = #tpu.dot_dimension_numbers<[1], [0], [0], [1], [0, 0, 1, 1], [], []>} : vector<9x3xf32>, vector<3x2xf32>, vector<9x2xf32> -> vector<9x2xf32>
    %cst_27 = arith.constant dense<0.000000e+00> : vector<9x2xf32>
    %63 = tpu.matmul %47, %60, %cst_27 {dimension_numbers = #tpu.dot_dimension_numbers<[1], [0], [0], [1], [0, 0, 1, 1], [], []>} : vector<9x3xf32>, vector<3x2xf32>, vector<9x2xf32> -> vector<9x2xf32>
    %64 = arith.subf %62, %63 : vector<9x2xf32>
    %c0_28 = arith.constant 0 : index
    %c0_29 = arith.constant 0 : index
    %65 = vector.load %arg21[%c0_28, %c0_29] : memref<2x16xf32, #tpu.memory_space<vmem>>, vector<2x16xf32>
    %cst_30 = arith.constant dense<0.000000e+00> : vector<9x16xf32>
    %66 = tpu.matmul %64, %65, %cst_30 {dimension_numbers = #tpu.dot_dimension_numbers<[1], [0], [0], [1], [0, 0, 1, 1], [], []>} : vector<9x2xf32>, vector<2x16xf32>, vector<9x16xf32> -> vector<9x16xf32>
    %c0_31 = arith.constant 0 : index
    %c0_32 = arith.constant 0 : index
    %67 = vector.load %arg22[%c0_31, %c0_32] : memref<1x16xf32, #tpu.memory_space<vmem>>, vector<1x16xf32>
    %68 = vector.broadcast %67 : vector<1x16xf32> to vector<9x16xf32>
    %69 = arith.addf %66, %68 : vector<9x16xf32>
    %cst_33 = arith.constant dense<0.000000e+00> : vector<9x32xf32>
    %70 = tpu.matmul %59, %61, %cst_33 {dimension_numbers = #tpu.dot_dimension_numbers<[1], [0], [0], [1], [0, 0, 1, 1], [], []>} : vector<9x3xf32>, vector<3x32xf32>, vector<9x32xf32> -> vector<9x32xf32>
    %c0_34 = arith.constant 0 : index
    %c0_35 = arith.constant 0 : index
    %71 = vector.load %arg23[%c0_34, %c0_35] : memref<16x512xf32, #tpu.memory_space<vmem>>, vector<16x512xf32>
    %cst_36 = arith.constant dense<0.000000e+00> : vector<9x512xf32>
    %72 = tpu.matmul %69, %71, %cst_36 {dimension_numbers = #tpu.dot_dimension_numbers<[1], [0], [0], [1], [0, 0, 1, 1], [], []>} : vector<9x16xf32>, vector<16x512xf32>, vector<9x512xf32> -> vector<9x512xf32>
    %c0_37 = arith.constant 0 : index
    %c0_38 = arith.constant 0 : index
    %73 = vector.load %arg24[%c0_37, %c0_38] : memref<32x512xf32, #tpu.memory_space<vmem>>, vector<32x512xf32>
    %cst_39 = arith.constant dense<0.000000e+00> : vector<9x512xf32>
    %74 = tpu.matmul %70, %73, %cst_39 {dimension_numbers = #tpu.dot_dimension_numbers<[1], [0], [0], [1], [0, 0, 1, 1], [], []>} : vector<9x32xf32>, vector<32x512xf32>, vector<9x512xf32> -> vector<9x512xf32>
    %75 = arith.addf %72, %74 : vector<9x512xf32>
    %cst_40 = arith.constant 5.000000e-02 : f32
    %76 = vector.broadcast %cst_40 : f32 to vector<9x512xf32>
    %77 = arith.mulf %76, %75 : vector<9x512xf32>
    %c0_41 = arith.constant 0 : index
    %c0_42 = arith.constant 0 : index
    %78 = vector.load %arg25[%c0_41, %c0_42] : memref<1x512xf32, #tpu.memory_space<vmem>>, vector<1x512xf32>
    %79 = vector.broadcast %78 : vector<1x512xf32> to vector<9x512xf32>
    %80 = arith.addf %77, %79 : vector<9x512xf32>
    %c0_43 = arith.constant 0 : index
    %c0_44 = arith.constant 0 : index
    %81 = vector.load %arg26[%c0_43, %c0_44] : memref<1x512xf32, #tpu.memory_space<vmem>>, vector<1x512xf32>
    %c0_45 = arith.constant 0 : index
    %c0_46 = arith.constant 0 : index
    %82 = vector.load %arg27[%c0_45, %c0_46] : memref<1x512xf32, #tpu.memory_space<vmem>>, vector<1x512xf32>
    %cst_47 = arith.constant dense<0.000000e+00> : vector<512xf32>
    %83 = vector.multi_reduction <add>, %80, %cst_47 [0] : vector<9x512xf32> to vector<512xf32>
    %84 = vector.shape_cast %83 : vector<512xf32> to vector<1x512xf32>
    %cst_48 = arith.constant 9.000000e+00 : f32
    %85 = vector.broadcast %cst_48 : f32 to vector<1x512xf32>
    %86 = arith.divf %84, %85 : vector<1x512xf32>
    %87 = vector.broadcast %86 : vector<1x512xf32> to vector<9x512xf32>
    %88 = arith.subf %80, %87 : vector<9x512xf32>
    %89 = arith.mulf %88, %88 : vector<9x512xf32>
    %cst_49 = arith.constant dense<0.000000e+00> : vector<512xf32>
    %90 = vector.multi_reduction <add>, %89, %cst_49 [0] : vector<9x512xf32> to vector<512xf32>
    %91 = vector.shape_cast %90 : vector<512xf32> to vector<1x512xf32>
    %cst_50 = arith.constant 9.000000e+00 : f32
    %92 = vector.broadcast %cst_50 : f32 to vector<1x512xf32>
    %93 = arith.divf %91, %92 : vector<1x512xf32>
    %94 = vector.broadcast %86 : vector<1x512xf32> to vector<9x512xf32>
    %95 = arith.subf %80, %94 : vector<9x512xf32>
    %cst_51 = arith.constant 9.99999974E-6 : f32
    %96 = vector.broadcast %cst_51 : f32 to vector<1x512xf32>
    %97 = arith.addf %93, %96 : vector<1x512xf32>
    %98 = math.rsqrt %97 : vector<1x512xf32>
    %99 = vector.broadcast %98 : vector<1x512xf32> to vector<9x512xf32>
    %100 = arith.mulf %95, %99 : vector<9x512xf32>
    %101 = vector.broadcast %81 : vector<1x512xf32> to vector<9x512xf32>
    %102 = arith.mulf %100, %101 : vector<9x512xf32>
    %103 = vector.broadcast %82 : vector<1x512xf32> to vector<9x512xf32>
    %104 = arith.addf %102, %103 : vector<9x512xf32>
    %cst_52 = arith.constant 0.000000e+00 : f32
    %105 = vector.broadcast %cst_52 : f32 to vector<9x512xf32>
    %106 = arith.maximumf %104, %105 : vector<9x512xf32>
    %c0_53 = arith.constant 0 : index
    %c0_54 = arith.constant 0 : index
    %107 = vector.load %arg28[%c0_53, %c0_54] : memref<512x64xf32, #tpu.memory_space<vmem>>, vector<512x64xf32>
    %cst_55 = arith.constant dense<0.000000e+00> : vector<9x64xf32>
    %108 = tpu.matmul %106, %107, %cst_55 {dimension_numbers = #tpu.dot_dimension_numbers<[1], [0], [0], [1], [0, 0, 1, 1], [], []>} : vector<9x512xf32>, vector<512x64xf32>, vector<9x64xf32> -> vector<9x64xf32>
    %c0_56 = arith.constant 0 : index
    %c0_57 = arith.constant 0 : index
    %109 = vector.load %arg29[%c0_56, %c0_57] : memref<1x64xf32, #tpu.memory_space<vmem>>, vector<1x64xf32>
    %110 = vector.broadcast %109 : vector<1x64xf32> to vector<9x64xf32>
    %111 = arith.addf %108, %110 : vector<9x64xf32>
    %c0_58 = arith.constant 0 : index
    %c0_59 = arith.constant 0 : index
    %112 = vector.load %arg30[%c0_58, %c0_59] : memref<1x64xf32, #tpu.memory_space<vmem>>, vector<1x64xf32>
    %c0_60 = arith.constant 0 : index
    %c0_61 = arith.constant 0 : index
    %113 = vector.load %arg31[%c0_60, %c0_61] : memref<1x64xf32, #tpu.memory_space<vmem>>, vector<1x64xf32>
    %cst_62 = arith.constant dense<0.000000e+00> : vector<64xf32>
    %114 = vector.multi_reduction <add>, %111, %cst_62 [0] : vector<9x64xf32> to vector<64xf32>
    %115 = vector.shape_cast %114 : vector<64xf32> to vector<1x64xf32>
    %cst_63 = arith.constant 9.000000e+00 : f32
    %116 = vector.broadcast %cst_63 : f32 to vector<1x64xf32>
    %117 = arith.divf %115, %116 : vector<1x64xf32>
    %118 = vector.broadcast %117 : vector<1x64xf32> to vector<9x64xf32>
    %119 = arith.subf %111, %118 : vector<9x64xf32>
    %120 = arith.mulf %119, %119 : vector<9x64xf32>
    %cst_64 = arith.constant dense<0.000000e+00> : vector<64xf32>
    %121 = vector.multi_reduction <add>, %120, %cst_64 [0] : vector<9x64xf32> to vector<64xf32>
    %122 = vector.shape_cast %121 : vector<64xf32> to vector<1x64xf32>
    %cst_65 = arith.constant 9.000000e+00 : f32
    %123 = vector.broadcast %cst_65 : f32 to vector<1x64xf32>
    %124 = arith.divf %122, %123 : vector<1x64xf32>
    %125 = vector.broadcast %117 : vector<1x64xf32> to vector<9x64xf32>
    %126 = arith.subf %111, %125 : vector<9x64xf32>
    %cst_66 = arith.constant 9.99999974E-6 : f32
    %127 = vector.broadcast %cst_66 : f32 to vector<1x64xf32>
    %128 = arith.addf %124, %127 : vector<1x64xf32>
    %129 = math.rsqrt %128 : vector<1x64xf32>
    %130 = vector.broadcast %129 : vector<1x64xf32> to vector<9x64xf32>
    %131 = arith.mulf %126, %130 : vector<9x64xf32>
    %132 = vector.broadcast %112 : vector<1x64xf32> to vector<9x64xf32>
    %133 = arith.mulf %131, %132 : vector<9x64xf32>
    %134 = vector.broadcast %113 : vector<1x64xf32> to vector<9x64xf32>
    %135 = arith.addf %133, %134 : vector<9x64xf32>
    %cst_67 = arith.constant 0.000000e+00 : f32
    %136 = vector.broadcast %cst_67 : f32 to vector<9x64xf32>
    %137 = arith.maximumf %135, %136 : vector<9x64xf32>
    %138 = vector.extract_strided_slice %137 {offsets = [0, 0], sizes = [3, 64], strides = [1, 1]} : vector<9x64xf32> to vector<3x64xf32>
    %cst_68 = arith.constant dense<0xFF800000> : vector<64xf32>
    %139 = vector.multi_reduction <maximumf>, %138, %cst_68 [0] : vector<3x64xf32> to vector<64xf32>
    %140 = vector.shape_cast %139 : vector<64xf32> to vector<1x64xf32>
    %141 = vector.extract_strided_slice %137 {offsets = [3, 0], sizes = [3, 64], strides = [1, 1]} : vector<9x64xf32> to vector<3x64xf32>
    %cst_69 = arith.constant dense<0xFF800000> : vector<64xf32>
    %142 = vector.multi_reduction <maximumf>, %141, %cst_69 [0] : vector<3x64xf32> to vector<64xf32>
    %143 = vector.shape_cast %142 : vector<64xf32> to vector<1x64xf32>
    %144 = vector.extract_strided_slice %137 {offsets = [6, 0], sizes = [3, 64], strides = [1, 1]} : vector<9x64xf32> to vector<3x64xf32>
    %cst_70 = arith.constant dense<0xFF800000> : vector<64xf32>
    %145 = vector.multi_reduction <maximumf>, %144, %cst_70 [0] : vector<3x64xf32> to vector<64xf32>
    %146 = vector.shape_cast %145 : vector<64xf32> to vector<1x64xf32>
    %147 = tpu.concatenate %140, %143, %146 in 0 : vector<1x64xf32>, vector<1x64xf32>, vector<1x64xf32> -> vector<3x64xf32>
    %c0_71 = arith.constant 0 : index
    %c0_72 = arith.constant 0 : index
    %148 = vector.load %arg38[%c0_71, %c0_72] : memref<6x64xf32, #tpu.memory_space<vmem>>, vector<3x64xf32>
    tpu.vector_store %arg38[%c0_71, %c0_72], %147 {strides = array<i32>} : memref<6x64xf32, #tpu.memory_space<vmem>>, vector<3x64xf32>,
    %149 = vector.extract_strided_slice %36 {offsets = [3, 0], sizes = [3, 2], strides = [1, 1]} : vector<6x2xf32> to vector<3x2xf32>
    %150 = vector.extract_strided_slice %28 {offsets = [3, 0], sizes = [3, 32], strides = [1, 1]} : vector<6x32xf32> to vector<3x32xf32>
    %cst_73 = arith.constant dense<0.000000e+00> : vector<9x2xf32>
    %151 = tpu.matmul %59, %149, %cst_73 {dimension_numbers = #tpu.dot_dimension_numbers<[1], [0], [0], [1], [0, 0, 1, 1], [], []>} : vector<9x3xf32>, vector<3x2xf32>, vector<9x2xf32> -> vector<9x2xf32>
    %cst_74 = arith.constant dense<0.000000e+00> : vector<9x2xf32>
    %152 = tpu.matmul %47, %149, %cst_74 {dimension_numbers = #tpu.dot_dimension_numbers<[1], [0], [0], [1], [0, 0, 1, 1], [], []>} : vector<9x3xf32>, vector<3x2xf32>, vector<9x2xf32> -> vector<9x2xf32>
    %153 = arith.subf %151, %152 : vector<9x2xf32>
    %c0_75 = arith.constant 0 : index
    %c0_76 = arith.constant 0 : index
    %154 = vector.load %arg21[%c0_75, %c0_76] : memref<2x16xf32, #tpu.memory_space<vmem>>, vector<2x16xf32>
    %cst_77 = arith.constant dense<0.000000e+00> : vector<9x16xf32>
    %155 = tpu.matmul %153, %154, %cst_77 {dimension_numbers = #tpu.dot_dimension_numbers<[1], [0], [0], [1], [0, 0, 1, 1], [], []>} : vector<9x2xf32>, vector<2x16xf32>, vector<9x16xf32> -> vector<9x16xf32>
    %c0_78 = arith.constant 0 : index
    %c0_79 = arith.constant 0 : index
    %156 = vector.load %arg22[%c0_78, %c0_79] : memref<1x16xf32, #tpu.memory_space<vmem>>, vector<1x16xf32>
    %157 = vector.broadcast %156 : vector<1x16xf32> to vector<9x16xf32>
    %158 = arith.addf %155, %157 : vector<9x16xf32>
    %cst_80 = arith.constant dense<0.000000e+00> : vector<9x32xf32>
    %159 = tpu.matmul %59, %150, %cst_80 {dimension_numbers = #tpu.dot_dimension_numbers<[1], [0], [0], [1], [0, 0, 1, 1], [], []>} : vector<9x3xf32>, vector<3x32xf32>, vector<9x32xf32> -> vector<9x32xf32>
    %c0_81 = arith.constant 0 : index
    %c0_82 = arith.constant 0 : index
    %160 = vector.load %arg23[%c0_81, %c0_82] : memref<16x512xf32, #tpu.memory_space<vmem>>, vector<16x512xf32>
    %cst_83 = arith.constant dense<0.000000e+00> : vector<9x512xf32>
    %161 = tpu.matmul %158, %160, %cst_83 {dimension_numbers = #tpu.dot_dimension_numbers<[1], [0], [0], [1], [0, 0, 1, 1], [], []>} : vector<9x16xf32>, vector<16x512xf32>, vector<9x512xf32> -> vector<9x512xf32>
    %c0_84 = arith.constant 0 : index
    %c0_85 = arith.constant 0 : index
    %162 = vector.load %arg24[%c0_84, %c0_85] : memref<32x512xf32, #tpu.memory_space<vmem>>, vector<32x512xf32>
    %cst_86 = arith.constant dense<0.000000e+00> : vector<9x512xf32>
    %163 = tpu.matmul %159, %162, %cst_86 {dimension_numbers = #tpu.dot_dimension_numbers<[1], [0], [0], [1], [0, 0, 1, 1], [], []>} : vector<9x32xf32>, vector<32x512xf32>, vector<9x512xf32> -> vector<9x512xf32>
    %164 = arith.addf %161, %163 : vector<9x512xf32>
    %cst_87 = arith.constant 5.000000e-02 : f32
    %165 = vector.broadcast %cst_87 : f32 to vector<9x512xf32>
    %166 = arith.mulf %165, %164 : vector<9x512xf32>
    %c0_88 = arith.constant 0 : index
    %c0_89 = arith.constant 0 : index
    %167 = vector.load %arg25[%c0_88, %c0_89] : memref<1x512xf32, #tpu.memory_space<vmem>>, vector<1x512xf32>
    %168 = vector.broadcast %167 : vector<1x512xf32> to vector<9x512xf32>
    %169 = arith.addf %166, %168 : vector<9x512xf32>
    %c0_90 = arith.constant 0 : index
    %c0_91 = arith.constant 0 : index
    %170 = vector.load %arg26[%c0_90, %c0_91] : memref<1x512xf32, #tpu.memory_space<vmem>>, vector<1x512xf32>
    %c0_92 = arith.constant 0 : index
    %c0_93 = arith.constant 0 : index
    %171 = vector.load %arg27[%c0_92, %c0_93] : memref<1x512xf32, #tpu.memory_space<vmem>>, vector<1x512xf32>
    %cst_94 = arith.constant dense<0.000000e+00> : vector<512xf32>
    %172 = vector.multi_reduction <add>, %169, %cst_94 [0] : vector<9x512xf32> to vector<512xf32>
    %173 = vector.shape_cast %172 : vector<512xf32> to vector<1x512xf32>
    %cst_95 = arith.constant 9.000000e+00 : f32
    %174 = vector.broadcast %cst_95 : f32 to vector<1x512xf32>
    %175 = arith.divf %173, %174 : vector<1x512xf32>
    %176 = vector.broadcast %175 : vector<1x512xf32> to vector<9x512xf32>
    %177 = arith.subf %169, %176 : vector<9x512xf32>
    %178 = arith.mulf %177, %177 : vector<9x512xf32>
    %cst_96 = arith.constant dense<0.000000e+00> : vector<512xf32>
    %179 = vector.multi_reduction <add>, %178, %cst_96 [0] : vector<9x512xf32> to vector<512xf32>
    %180 = vector.shape_cast %179 : vector<512xf32> to vector<1x512xf32>
    %cst_97 = arith.constant 9.000000e+00 : f32
    %181 = vector.broadcast %cst_97 : f32 to vector<1x512xf32>
    %182 = arith.divf %180, %181 : vector<1x512xf32>
    %183 = vector.broadcast %175 : vector<1x512xf32> to vector<9x512xf32>
    %184 = arith.subf %169, %183 : vector<9x512xf32>
    %cst_98 = arith.constant 9.99999974E-6 : f32
    %185 = vector.broadcast %cst_98 : f32 to vector<1x512xf32>
    %186 = arith.addf %182, %185 : vector<1x512xf32>
    %187 = math.rsqrt %186 : vector<1x512xf32>
    %188 = vector.broadcast %187 : vector<1x512xf32> to vector<9x512xf32>
    %189 = arith.mulf %184, %188 : vector<9x512xf32>
    %190 = vector.broadcast %170 : vector<1x512xf32> to vector<9x512xf32>
    %191 = arith.mulf %189, %190 : vector<9x512xf32>
    %192 = vector.broadcast %171 : vector<1x512xf32> to vector<9x512xf32>
    %193 = arith.addf %191, %192 : vector<9x512xf32>
    %cst_99 = arith.constant 0.000000e+00 : f32
    %194 = vector.broadcast %cst_99 : f32 to vector<9x512xf32>
    %195 = arith.maximumf %193, %194 : vector<9x512xf32>
    %c0_100 = arith.constant 0 : index
    %c0_101 = arith.constant 0 : index
    %196 = vector.load %arg28[%c0_100, %c0_101] : memref<512x64xf32, #tpu.memory_space<vmem>>, vector<512x64xf32>
    %cst_102 = arith.constant dense<0.000000e+00> : vector<9x64xf32>
    %197 = tpu.matmul %195, %196, %cst_102 {dimension_numbers = #tpu.dot_dimension_numbers<[1], [0], [0], [1], [0, 0, 1, 1], [], []>} : vector<9x512xf32>, vector<512x64xf32>, vector<9x64xf32> -> vector<9x64xf32>
    %c0_103 = arith.constant 0 : index
    %c0_104 = arith.constant 0 : index
    %198 = vector.load %arg29[%c0_103, %c0_104] : memref<1x64xf32, #tpu.memory_space<vmem>>, vector<1x64xf32>
    %199 = vector.broadcast %198 : vector<1x64xf32> to vector<9x64xf32>
    %200 = arith.addf %197, %199 : vector<9x64xf32>
    %c0_105 = arith.constant 0 : index
    %c0_106 = arith.constant 0 : index
    %201 = vector.load %arg30[%c0_105, %c0_106] : memref<1x64xf32, #tpu.memory_space<vmem>>, vector<1x64xf32>
    %c0_107 = arith.constant 0 : index
    %c0_108 = arith.constant 0 : index
    %202 = vector.load %arg31[%c0_107, %c0_108] : memref<1x64xf32, #tpu.memory_space<vmem>>, vector<1x64xf32>
    %cst_109 = arith.constant dense<0.000000e+00> : vector<64xf32>
    %203 = vector.multi_reduction <add>, %200, %cst_109 [0] : vector<9x64xf32> to vector<64xf32>
    %204 = vector.shape_cast %203 : vector<64xf32> to vector<1x64xf32>
    %cst_110 = arith.constant 9.000000e+00 : f32
    %205 = vector.broadcast %cst_110 : f32 to vector<1x64xf32>
    %206 = arith.divf %204, %205 : vector<1x64xf32>
    %207 = vector.broadcast %206 : vector<1x64xf32> to vector<9x64xf32>
    %208 = arith.subf %200, %207 : vector<9x64xf32>
    %209 = arith.mulf %208, %208 : vector<9x64xf32>
    %cst_111 = arith.constant dense<0.000000e+00> : vector<64xf32>
    %210 = vector.multi_reduction <add>, %209, %cst_111 [0] : vector<9x64xf32> to vector<64xf32>
    %211 = vector.shape_cast %210 : vector<64xf32> to vector<1x64xf32>
    %cst_112 = arith.constant 9.000000e+00 : f32
    %212 = vector.broadcast %cst_112 : f32 to vector<1x64xf32>
    %213 = arith.divf %211, %212 : vector<1x64xf32>
    %214 = vector.broadcast %206 : vector<1x64xf32> to vector<9x64xf32>
    %215 = arith.subf %200, %214 : vector<9x64xf32>
    %cst_113 = arith.constant 9.99999974E-6 : f32
    %216 = vector.broadcast %cst_113 : f32 to vector<1x64xf32>
    %217 = arith.addf %213, %216 : vector<1x64xf32>
    %218 = math.rsqrt %217 : vector<1x64xf32>
    %219 = vector.broadcast %218 : vector<1x64xf32> to vector<9x64xf32>
    %220 = arith.mulf %215, %219 : vector<9x64xf32>
    %221 = vector.broadcast %201 : vector<1x64xf32> to vector<9x64xf32>
    %222 = arith.mulf %220, %221 : vector<9x64xf32>
    %223 = vector.broadcast %202 : vector<1x64xf32> to vector<9x64xf32>
    %224 = arith.addf %222, %223 : vector<9x64xf32>
    %cst_114 = arith.constant 0.000000e+00 : f32
    %225 = vector.broadcast %cst_114 : f32 to vector<9x64xf32>
    %226 = arith.maximumf %224, %225 : vector<9x64xf32>
    %227 = vector.extract_strided_slice %226 {offsets = [0, 0], sizes = [3, 64], strides = [1, 1]} : vector<9x64xf32> to vector<3x64xf32>
    %cst_115 = arith.constant dense<0xFF800000> : vector<64xf32>
    %228 = vector.multi_reduction <maximumf>, %227, %cst_115 [0] : vector<3x64xf32> to vector<64xf32>
    %229 = vector.shape_cast %228 : vector<64xf32> to vector<1x64xf32>
    %230 = vector.extract_strided_slice %226 {offsets = [3, 0], sizes = [3, 64], strides = [1, 1]} : vector<9x64xf32> to vector<3x64xf32>
    %cst_116 = arith.constant dense<0xFF800000> : vector<64xf32>
    %231 = vector.multi_reduction <maximumf>, %230, %cst_116 [0] : vector<3x64xf32> to vector<64xf32>
    %232 = vector.shape_cast %231 : vector<64xf32> to vector<1x64xf32>
    %233 = vector.extract_strided_slice %226 {offsets = [6, 0], sizes = [3, 64], strides = [1, 1]} : vector<9x64xf32> to vector<3x64xf32>
    %cst_117 = arith.constant dense<0xFF800000> : vector<64xf32>
    %234 = vector.multi_reduction <maximumf>, %233, %cst_117 [0] : vector<3x64xf32> to vector<64xf32>
    %235 = vector.shape_cast %234 : vector<64xf32> to vector<1x64xf32>
    %236 = tpu.concatenate %229, %232, %235 in 0 : vector<1x64xf32>, vector<1x64xf32>, vector<1x64xf32> -> vector<3x64xf32>
    %c3 = arith.constant 3 : index
    %c0_118 = arith.constant 0 : index
    %237 = vector.load %arg38[%c3, %c0_118] : memref<6x64xf32, #tpu.memory_space<vmem>>, vector<3x64xf32>
    tpu.vector_store %arg38[%c3, %c0_118], %236 {strides = array<i32>} : memref<6x64xf32, #tpu.memory_space<vmem>>, vector<3x64xf32>,
    %c0_119 = arith.constant 0 : index
    %c0_120 = arith.constant 0 : index
    %238 = vector.load %arg38[%c0_119, %c0_120] : memref<6x64xf32, #tpu.memory_space<vmem>>, vector<6x64xf32>
    %c0_121 = arith.constant 0 : index
    %c0_122 = arith.constant 0 : index
    %239 = vector.load %arg12[%c0_121, %c0_122] : memref<32x64xf32, #tpu.memory_space<vmem>>, vector<32x64xf32>
    %cst_123 = arith.constant dense<0.000000e+00> : vector<6x64xf32>
    %240 = tpu.matmul %28, %239, %cst_123 {dimension_numbers = #tpu.dot_dimension_numbers<[1], [0], [0], [1], [0, 0, 1, 1], [], []>} : vector<6x32xf32>, vector<32x64xf32>, vector<6x64xf32> -> vector<6x64xf32>
    %c0_124 = arith.constant 0 : index
    %c0_125 = arith.constant 0 : index
    %241 = vector.load %arg13[%c0_124, %c0_125] : memref<64x64xf32, #tpu.memory_space<vmem>>, vector<64x64xf32>
    %cst_126 = arith.constant dense<0.000000e+00> : vector<6x64xf32>
    %242 = tpu.matmul %238, %241, %cst_126 {dimension_numbers = #tpu.dot_dimension_numbers<[1], [0], [0], [1], [0, 0, 1, 1], [], []>} : vector<6x64xf32>, vector<64x64xf32>, vector<6x64xf32> -> vector<6x64xf32>
    %243 = arith.addf %240, %242 : vector<6x64xf32>
    %c0_127 = arith.constant 0 : index
    %c0_128 = arith.constant 0 : index
    %244 = vector.load %arg14[%c0_127, %c0_128] : memref<1x64xf32, #tpu.memory_space<vmem>>, vector<1x64xf32>
    %245 = vector.broadcast %244 : vector<1x64xf32> to vector<6x64xf32>
    %246 = arith.addf %243, %245 : vector<6x64xf32>
    %c0_129 = arith.constant 0 : index
    %c0_130 = arith.constant 0 : index
    %247 = vector.load %arg15[%c0_129, %c0_130] : memref<1x64xf32, #tpu.memory_space<vmem>>, vector<1x64xf32>
    %c0_131 = arith.constant 0 : index
    %c0_132 = arith.constant 0 : index
    %248 = vector.load %arg16[%c0_131, %c0_132] : memref<1x64xf32, #tpu.memory_space<vmem>>, vector<1x64xf32>
    %cst_133 = arith.constant dense<0.000000e+00> : vector<64xf32>
    %249 = vector.multi_reduction <add>, %246, %cst_133 [0] : vector<6x64xf32> to vector<64xf32>
    %250 = vector.shape_cast %249 : vector<64xf32> to vector<1x64xf32>
    %cst_134 = arith.constant 6.000000e+00 : f32
    %251 = vector.broadcast %cst_134 : f32 to vector<1x64xf32>
    %252 = arith.divf %250, %251 : vector<1x64xf32>
    %253 = vector.broadcast %252 : vector<1x64xf32> to vector<6x64xf32>
    %254 = arith.subf %246, %253 : vector<6x64xf32>
    %255 = arith.mulf %254, %254 : vector<6x64xf32>
    %cst_135 = arith.constant dense<0.000000e+00> : vector<64xf32>
    %256 = vector.multi_reduction <add>, %255, %cst_135 [0] : vector<6x64xf32> to vector<64xf32>
    %257 = vector.shape_cast %256 : vector<64xf32> to vector<1x64xf32>
    %cst_136 = arith.constant 6.000000e+00 : f32
    %258 = vector.broadcast %cst_136 : f32 to vector<1x64xf32>
    %259 = arith.divf %257, %258 : vector<1x64xf32>
    %260 = vector.broadcast %252 : vector<1x64xf32> to vector<6x64xf32>
    %261 = arith.subf %246, %260 : vector<6x64xf32>
    %cst_137 = arith.constant 9.99999974E-6 : f32
    %262 = vector.broadcast %cst_137 : f32 to vector<1x64xf32>
    %263 = arith.addf %259, %262 : vector<1x64xf32>
    %264 = math.rsqrt %263 : vector<1x64xf32>
    %265 = vector.broadcast %264 : vector<1x64xf32> to vector<6x64xf32>
    %266 = arith.mulf %261, %265 : vector<6x64xf32>
    %267 = vector.broadcast %247 : vector<1x64xf32> to vector<6x64xf32>
    %268 = arith.mulf %266, %267 : vector<6x64xf32>
    %269 = vector.broadcast %248 : vector<1x64xf32> to vector<6x64xf32>
    %270 = arith.addf %268, %269 : vector<6x64xf32>
    %cst_138 = arith.constant 0.000000e+00 : f32
    %271 = vector.broadcast %cst_138 : f32 to vector<6x64xf32>
    %272 = arith.maximumf %270, %271 : vector<6x64xf32>
    %c0_139 = arith.constant 0 : index
    %c0_140 = arith.constant 0 : index
    %273 = vector.load %arg17[%c0_139, %c0_140] : memref<64x32xf32, #tpu.memory_space<vmem>>, vector<64x32xf32>
    %cst_141 = arith.constant dense<0.000000e+00> : vector<6x32xf32>
    %274 = tpu.matmul %272, %273, %cst_141 {dimension_numbers = #tpu.dot_dimension_numbers<[1], [0], [0], [1], [0, 0, 1, 1], [], []>} : vector<6x64xf32>, vector<64x32xf32>, vector<6x32xf32> -> vector<6x32xf32>
    %c0_142 = arith.constant 0 : index
    %c0_143 = arith.constant 0 : index
    %275 = vector.load %arg18[%c0_142, %c0_143] : memref<1x32xf32, #tpu.memory_space<vmem>>, vector<1x32xf32>
    %276 = vector.broadcast %275 : vector<1x32xf32> to vector<6x32xf32>
    %277 = arith.addf %274, %276 : vector<6x32xf32>
    %c0_144 = arith.constant 0 : index
    %c0_145 = arith.constant 0 : index
    %278 = vector.load %arg19[%c0_144, %c0_145] : memref<1x32xf32, #tpu.memory_space<vmem>>, vector<1x32xf32>
    %c0_146 = arith.constant 0 : index
    %c0_147 = arith.constant 0 : index
    %279 = vector.load %arg20[%c0_146, %c0_147] : memref<1x32xf32, #tpu.memory_space<vmem>>, vector<1x32xf32>
    %cst_148 = arith.constant dense<0.000000e+00> : vector<32xf32>
    %280 = vector.multi_reduction <add>, %277, %cst_148 [0] : vector<6x32xf32> to vector<32xf32>
    %281 = vector.shape_cast %280 : vector<32xf32> to vector<1x32xf32>
    %cst_149 = arith.constant 6.000000e+00 : f32
    %282 = vector.broadcast %cst_149 : f32 to vector<1x32xf32>
    %283 = arith.divf %281, %282 : vector<1x32xf32>
    %284 = vector.broadcast %283 : vector<1x32xf32> to vector<6x32xf32>
    %285 = arith.subf %277, %284 : vector<6x32xf32>
    %286 = arith.mulf %285, %285 : vector<6x32xf32>
    %cst_150 = arith.constant dense<0.000000e+00> : vector<32xf32>
    %287 = vector.multi_reduction <add>, %286, %cst_150 [0] : vector<6x32xf32> to vector<32xf32>
    %288 = vector.shape_cast %287 : vector<32xf32> to vector<1x32xf32>
    %cst_151 = arith.constant 6.000000e+00 : f32
    %289 = vector.broadcast %cst_151 : f32 to vector<1x32xf32>
    %290 = arith.divf %288, %289 : vector<1x32xf32>
    %291 = vector.broadcast %283 : vector<1x32xf32> to vector<6x32xf32>
    %292 = arith.subf %277, %291 : vector<6x32xf32>
    %cst_152 = arith.constant 9.99999974E-6 : f32
    %293 = vector.broadcast %cst_152 : f32 to vector<1x32xf32>
    %294 = arith.addf %290, %293 : vector<1x32xf32>
    %295 = math.rsqrt %294 : vector<1x32xf32>
    %296 = vector.broadcast %295 : vector<1x32xf32> to vector<6x32xf32>
    %297 = arith.mulf %292, %296 : vector<6x32xf32>
    %298 = vector.broadcast %278 : vector<1x32xf32> to vector<6x32xf32>
    %299 = arith.mulf %297, %298 : vector<6x32xf32>
    %300 = vector.broadcast %279 : vector<1x32xf32> to vector<6x32xf32>
    %301 = arith.addf %299, %300 : vector<6x32xf32>
    %cst_153 = arith.constant 0.000000e+00 : f32
    %302 = vector.broadcast %cst_153 : f32 to vector<6x32xf32>
    %303 = arith.maximumf %301, %302 : vector<6x32xf32>
    %c0_154 = arith.constant 0 : index
    %c0_155 = arith.constant 0 : index
    %304 = vector.load %arg34[%c0_154, %c0_155] : memref<6x32xf32, #tpu.memory_space<vmem>>, vector<6x32xf32>
    tpu.vector_store %arg34[%c0_154, %c0_155], %303 {strides = array<i32>} : memref<6x32xf32, #tpu.memory_space<vmem>>, vector<6x32xf32>,
    %c0_156 = arith.constant 0 : index
    %c0_157 = arith.constant 0 : index
    %305 = vector.load %arg37[%c0_156, %c0_157] : memref<6x2xf32, #tpu.memory_space<vmem>>, vector<6x2xf32>
    tpu.vector_store %arg37[%c0_156, %c0_157], %36 {strides = array<i32>} : memref<6x2xf32, #tpu.memory_space<vmem>>, vector<6x2xf32>,
    %c0_158 = arith.constant 0 : index
    %c0_159 = arith.constant 0 : index
    %306 = vector.load %arg8[%c0_158, %c0_159] : memref<2x16xf32, #tpu.memory_space<vmem>>, vector<2x16xf32>
    %cst_160 = arith.constant dense<0.000000e+00> : vector<6x16xf32>
    %307 = tpu.matmul %34, %306, %cst_160 {dimension_numbers = #tpu.dot_dimension_numbers<[1], [0], [0], [1], [0, 0, 1, 1], [], []>} : vector<6x2xf32>, vector<2x16xf32>, vector<6x16xf32> -> vector<6x16xf32>
    %c0_161 = arith.constant 0 : index
    %c0_162 = arith.constant 0 : index
    %308 = vector.load %arg9[%c0_161, %c0_162] : memref<1x16xf32, #tpu.memory_space<vmem>>, vector<1x16xf32>
    %309 = vector.broadcast %308 : vector<1x16xf32> to vector<6x16xf32>
    %310 = arith.addf %307, %309 : vector<6x16xf32>
    %c0_163 = arith.constant 0 : index
    %c0_164 = arith.constant 0 : index
    %311 = vector.load %arg36[%c0_163, %c0_164] : memref<6x16xf32, #tpu.memory_space<vmem>>, vector<6x16xf32>
    tpu.vector_store %arg36[%c0_163, %c0_164], %310 {strides = array<i32>} : memref<6x16xf32, #tpu.memory_space<vmem>>, vector<6x16xf32>,
    %312 = arith.index_cast %arg0 : i32 to index
    %c0_165 = arith.constant 0 : index
    %c0_166 = arith.constant 0 : index
    %313 = vector.load %arg32[%312, %c0_165, %c0_166] : memref<4x6x2xf32, #tpu.memory_space<vmem>>, vector<1x6x2xf32>
    %314 = vector.shape_cast %313 : vector<1x6x2xf32> to vector<6x2xf32>
    %315 = vector.shape_cast %34 : vector<6x2xf32> to vector<1x6x2xf32>
    tpu.vector_store %arg32[%312, %c0_165, %c0_166], %315 {strides = array<i32>} : memref<4x6x2xf32, #tpu.memory_space<vmem>>, vector<1x6x2xf32>,
    %c0_167 = arith.constant 0 : index
    %c0_168 = arith.constant 0 : index
    %316 = vector.load %arg33[%c0_167, %c0_168] : memref<6x32xf32, #tpu.memory_space<vmem>>, vector<6x32xf32>
    tpu.vector_store %arg33[%c0_167, %c0_168], %303 {strides = array<i32>} : memref<6x32xf32, #tpu.memory_space<vmem>>, vector<6x32xf32>,
    return
  }
  func.func @transform_0(%arg0: i32) -> (i32, i32) {
    %c0_i32 = arith.constant 0 : i32
    %c0_i32_0 = arith.constant 0 : i32
    %c0_i32_1 = arith.constant 0 : i32
    return %c0_i32, %c0_i32_0 : i32, i32
  }
  func.func @transform_1(%arg0: i32) -> (i32, i32) {
    %c0_i32 = arith.constant 0 : i32
    %c0_i32_0 = arith.constant 0 : i32
    %c0_i32_1 = arith.constant 0 : i32
    return %c0_i32, %c0_i32_0 : i32, i32
  }
  func.func @transform_2(%arg0: i32) -> (i32, i32) {
    %c0_i32 = arith.constant 0 : i32
    %c0_i32_0 = arith.constant 0 : i32
    %c0_i32_1 = arith.constant 0 : i32
    return %c0_i32, %c0_i32_0 : i32, i32
  }
  func.func @transform_3(%arg0: i32) -> (i32, i32) {
    %c0_i32 = arith.constant 0 : i32
    %c0_i32_0 = arith.constant 0 : i32
    %c0_i32_1 = arith.constant 0 : i32
    return %c0_i32, %c0_i32_0 : i32, i32
  }
  func.func @transform_4(%arg0: i32) -> (i32, i32) {
    %c0_i32 = arith.constant 0 : i32
    %c0_i32_0 = arith.constant 0 : i32
    %c0_i32_1 = arith.constant 0 : i32
    return %c0_i32, %c0_i32_0 : i32, i32
  }
  func.func @transform_5(%arg0: i32) -> (i32, i32) {
    %c0_i32 = arith.constant 0 : i32
    %c0_i32_0 = arith.constant 0 : i32
    %c0_i32_1 = arith.constant 0 : i32
    return %c0_i32, %c0_i32_0 : i32, i32
  }
  func.func @transform_6(%arg0: i32) -> (i32, i32) {
    %c0_i32 = arith.constant 0 : i32
    %c0_i32_0 = arith.constant 0 : i32
    %c0_i32_1 = arith.constant 0 : i32
    return %c0_i32, %c0_i32_0 : i32, i32
  }
  func.func @transform_7(%arg0: i32) -> (i32, i32) {
    %c0_i32 = arith.constant 0 : i32
    %c0_i32_0 = arith.constant 0 : i32
    %c0_i32_1 = arith.constant 0 : i32
    return %c0_i32, %c0_i32_0 : i32, i32
  }
  func.func @transform_8(%arg0: i32) -> (i32, i32) {
    %c0_i32 = arith.constant 0 : i32
    %c0_i32_0 = arith.constant 0 : i32
    %c0_i32_1 = arith.constant 0 : i32
    return %c0_i32, %c0_i32_0 : i32, i32
  }
  func.func @transform_9(%arg0: i32) -> (i32, i32) {
    %c0_i32 = arith.constant 0 : i32
    %c0_i32_0 = arith.constant 0 : i32
    %c0_i32_1 = arith.constant 0 : i32
    return %c0_i32, %c0_i32_0 : i32, i32
  }
  func.func @transform_10(%arg0: i32) -> (i32, i32) {
    %c0_i32 = arith.constant 0 : i32
    %c0_i32_0 = arith.constant 0 : i32
    %c0_i32_1 = arith.constant 0 : i32
    return %c0_i32, %c0_i32_0 : i32, i32
  }
  func.func @transform_11(%arg0: i32) -> (i32, i32) {
    %c0_i32 = arith.constant 0 : i32
    %c0_i32_0 = arith.constant 0 : i32
    %c0_i32_1 = arith.constant 0 : i32
    return %c0_i32, %c0_i32_0 : i32, i32
  }
  func.func @transform_12(%arg0: i32) -> (i32, i32) {
    %c0_i32 = arith.constant 0 : i32
    %c0_i32_0 = arith.constant 0 : i32
    %c0_i32_1 = arith.constant 0 : i32
    return %c0_i32, %c0_i32_0 : i32, i32
  }
  func.func @transform_13(%arg0: i32) -> (i32, i32) {
    %c0_i32 = arith.constant 0 : i32
    %c0_i32_0 = arith.constant 0 : i32
    %c0_i32_1 = arith.constant 0 : i32
    return %c0_i32, %c0_i32_0 : i32, i32
  }
  func.func @transform_14(%arg0: i32) -> (i32, i32) {
    %c0_i32 = arith.constant 0 : i32
    %c0_i32_0 = arith.constant 0 : i32
    %c0_i32_1 = arith.constant 0 : i32
    return %c0_i32, %c0_i32_0 : i32, i32
  }
  func.func @transform_15(%arg0: i32) -> (i32, i32) {
    %c0_i32 = arith.constant 0 : i32
    %c0_i32_0 = arith.constant 0 : i32
    %c0_i32_1 = arith.constant 0 : i32
    return %c0_i32, %c0_i32_0 : i32, i32
  }
  func.func @transform_16(%arg0: i32) -> (i32, i32) {
    %c0_i32 = arith.constant 0 : i32
    %c0_i32_0 = arith.constant 0 : i32
    %c0_i32_1 = arith.constant 0 : i32
    return %c0_i32, %c0_i32_0 : i32, i32
  }
  func.func @transform_17(%arg0: i32) -> (i32, i32) {
    %c0_i32 = arith.constant 0 : i32
    %c0_i32_0 = arith.constant 0 : i32
    %c0_i32_1 = arith.constant 0 : i32
    return %c0_i32, %c0_i32_0 : i32, i32
  }
  func.func @transform_18(%arg0: i32) -> (i32, i32) {
    %c0_i32 = arith.constant 0 : i32
    %c0_i32_0 = arith.constant 0 : i32
    %c0_i32_1 = arith.constant 0 : i32
    return %c0_i32, %c0_i32_0 : i32, i32
  }
  func.func @transform_19(%arg0: i32) -> (i32, i32) {
    %c0_i32 = arith.constant 0 : i32
    %c0_i32_0 = arith.constant 0 : i32
    %c0_i32_1 = arith.constant 0 : i32
    return %c0_i32, %c0_i32_0 : i32, i32
  }
  func.func @transform_20(%arg0: i32) -> (i32, i32) {
    %c0_i32 = arith.constant 0 : i32
    %c0_i32_0 = arith.constant 0 : i32
    %c0_i32_1 = arith.constant 0 : i32
    return %c0_i32, %c0_i32_0 : i32, i32
  }
  func.func @transform_21(%arg0: i32) -> (i32, i32) {
    %c0_i32 = arith.constant 0 : i32
    %c0_i32_0 = arith.constant 0 : i32
    %c0_i32_1 = arith.constant 0 : i32
    return %c0_i32, %c0_i32_0 : i32, i32
  }
  func.func @transform_22(%arg0: i32) -> (i32, i32) {
    %c0_i32 = arith.constant 0 : i32
    %c0_i32_0 = arith.constant 0 : i32
    %c0_i32_1 = arith.constant 0 : i32
    return %c0_i32, %c0_i32_0 : i32, i32
  }
  func.func @transform_23(%arg0: i32) -> (i32, i32) {
    %c0_i32 = arith.constant 0 : i32
    %c0_i32_0 = arith.constant 0 : i32
    %c0_i32_1 = arith.constant 0 : i32
    return %c0_i32, %c0_i32_0 : i32, i32
  }
  func.func @transform_24(%arg0: i32) -> (i32, i32) {
    %c0_i32 = arith.constant 0 : i32
    %c0_i32_0 = arith.constant 0 : i32
    %c0_i32_1 = arith.constant 0 : i32
    return %c0_i32, %c0_i32_0 : i32, i32
  }
  func.func @transform_25(%arg0: i32) -> (i32, i32) {
    %c0_i32 = arith.constant 0 : i32
    %c0_i32_0 = arith.constant 0 : i32
    %c0_i32_1 = arith.constant 0 : i32
    return %c0_i32, %c0_i32_0 : i32, i32
  }
  func.func @transform_26(%arg0: i32) -> (i32, i32) {
    %c0_i32 = arith.constant 0 : i32
    %c0_i32_0 = arith.constant 0 : i32
    %c0_i32_1 = arith.constant 0 : i32
    return %c0_i32, %c0_i32_0 : i32, i32
  }
  func.func @transform_27(%arg0: i32) -> (i32, i32) {
    %c0_i32 = arith.constant 0 : i32
    %c0_i32_0 = arith.constant 0 : i32
    %c0_i32_1 = arith.constant 0 : i32
    return %c0_i32, %c0_i32_0 : i32, i32
  }
  func.func @transform_28(%arg0: i32) -> (i32, i32) {
    %c0_i32 = arith.constant 0 : i32
    %c0_i32_0 = arith.constant 0 : i32
    %c0_i32_1 = arith.constant 0 : i32
    return %c0_i32, %c0_i32_0 : i32, i32
  }
  func.func @transform_29(%arg0: i32) -> (i32, i32) {
    %c0_i32 = arith.constant 0 : i32
    %c0_i32_0 = arith.constant 0 : i32
    %c0_i32_1 = arith.constant 0 : i32
    return %c0_i32, %c0_i32_0 : i32, i32
  }
  func.func @transform_30(%arg0: i32) -> (i32, i32) {
    %c0_i32 = arith.constant 0 : i32
    %c0_i32_0 = arith.constant 0 : i32
    %c0_i32_1 = arith.constant 0 : i32
    return %c0_i32, %c0_i32_0 : i32, i32
  }
  func.func @transform_31(%arg0: i32) -> (i32, i32, i32) {
    %c0_i32 = arith.constant 0 : i32
    %c0_i32_0 = arith.constant 0 : i32
    %c0_i32_1 = arith.constant 0 : i32
    %c0_i32_2 = arith.constant 0 : i32
    return %c0_i32, %c0_i32_0, %c0_i32_1 : i32, i32, i32
  }
  func.func @transform_32(%arg0: i32) -> (i32, i32) {
    %c0_i32 = arith.constant 0 : i32
    %c0_i32_0 = arith.constant 0 : i32
    %c0_i32_1 = arith.constant 0 : i32
    return %c0_i32, %c0_i32_0 : i32, i32
  }
}

</mosaic_0001>

<bundles_post_ra>
// kernel: decoder_forward.1
= control target key start
LH: loop header
LB: loop body
LE: loop exit
PB: predicated region body
PF: predicated region fallthrough
CT: control target
= control target key end

     0   :  { %s4832_s6 = smov 1   ;;  %s4833_s10 = smov 2   ;;  %s5755_s0 = inlined_call_operand.smem [shape: u32[33], index: -1, kind: input, shape index: {}] }
   0x1   :  { %s4880_s5 = sld [smem:[%s5755_s0]]   ;;  %s4834_s14 = smov 3  }
   0x2   :  { %s4885_s9 = sld [smem:[%s5755_s0 + %s4832_s6]]   ;;  %s4835_s18 = smov 4  }
   0x3   :  { %s4890_s13 = sld [smem:[%s5755_s0 + %s4833_s10]]   ;;  %s4836_s22 = smov 5  }
   0x4   :  { %s4895_s17 = sld [smem:[%s5755_s0 + %s4834_s14]]   ;;  %s4837_s26 = smov 6  }
   0x5   :  { %s4900_s21 = sld [smem:[%s5755_s0 + %s4835_s18]]   ;;  %s4838_s30 = smov 7  }
   0x6   :  { %s4905_s25 = sld [smem:[%s5755_s0 + %s4836_s22]]   ;;  %s4839_s4 = smov 8  }
   0x7   :  { %s4910_s29 = sld [smem:[%s5755_s0 + %s4837_s26]]   ;;  %s4840_s10 = smov 9  }
   0x8   :  { %s4915_s3 = sld [smem:[%s5755_s0 + %s4838_s30]]   ;;  %s4841_s15 = smov 10  }
   0x9   :  { %s4920_s8 = sld [smem:[%s5755_s0 + %s4839_s4]]   ;;  %s4842_s20 = smov 11  }
   0xa   :  { %s4925_s14 = sld [smem:[%s5755_s0 + %s4840_s10]]   ;;  %s4843_s26 = smov 12  }
   0xb   :  { %s4930_s19 = sld [smem:[%s5755_s0 + %s4841_s15]]   ;;  %s4844_s1 = smov 13  }
   0xc   :  { %s4935_s24 = sld [smem:[%s5755_s0 + %s4842_s20]]   ;;  %s4845_s7 = smov 14  }
   0xd   :  { %s4940_s30 = sld [smem:[%s5755_s0 + %s4843_s26]]   ;;  %s4846_s15 = smov 15  }
   0xe   :  { %s4945_s6 = sld [smem:[%s5755_s0 + %s4844_s1]]   ;;  %s4847_s22 = smov 16  }
   0xf   :  { %s4950_s12 = sld [smem:[%s5755_s0 + %s4845_s7]]   ;;  %s4848_s28 = smov 17  }
  0x10   :  { %s4955_s20 = sld [smem:[%s5755_s0 + %s4846_s15]]   ;;  %s4849_s7 = smov 18  }
  0x11   :  { %s4960_s27 = sld [smem:[%s5755_s0 + %s4847_s22]]   ;;  %s4850_s15 = smov 19  }
  0x12   :  { %5774 = sst [smem:[#allocation7_spill]] %s4935_s24  ;;  %s4851_s22 = smov 20  }
  0x13   :  { %5775 = sst [smem:[#allocation8_spill]] %s4940_s30 }
  0x14   :  { %5776 = sst [smem:[#allocation9_spill]] %s4945_s6 }
  0x15   :  { %5777 = sst [smem:[#allocation10_spill]] %s4950_s12 }
  0x16   :  { %5778 = sst [smem:[#allocation11_spill]] %s4955_s20 }
  0x17   :  { %5779 = sst [smem:[#allocation12_spill]] %s4960_s27 }
  0x18   :  { %s4965_s4 = sld [smem:[%s5755_s0 + %s4848_s28]]   ;;  %s4852_s28 = smov 21  }
  0x19   :  { %s4970_s12 = sld [smem:[%s5755_s0 + %s4849_s7]]   ;;  %s4853_s7 = smov 22  }
  0x1a   :  { %s4975_s20 = sld [smem:[%s5755_s0 + %s4850_s15]]   ;;  %s4854_s15 = smov 23  }
  0x1b   :  { %s4980_s6 = sld [smem:[%s5755_s0 + %s4851_s22]]   ;;  %s4855_s22 = smov 24  }
  0x1c   :  { %s5000_s27 = sld [smem:[%s5755_s0 + %s4855_s22]]   ;;  %s4859_s22 = smov 28  }
  0x1e   :  { %5780 = sst [smem:[#allocation13_spill]] %s4965_s4 }
  0x1f   :  { %5781 = sst [smem:[#allocation14_spill]] %s4970_s12 }
  0x20   :  { %5782 = sst [smem:[#allocation15_spill]] %s4975_s20 }
  0x21   :  { %s4985_s4 = sld [smem:[%s5755_s0 + %s4852_s28]]   ;;  %s4856_s28 = smov 25  }
  0x22   :  { %s4990_s12 = sld [smem:[%s5755_s0 + %s4853_s7]]   ;;  %s4857_s7 = smov 26  }
  0x23   :  { %s4995_s20 = sld [smem:[%s5755_s0 + %s4854_s15]]   ;;  %s4858_s15 = smov 27  }
  0x24   :  { %5784 = sst [smem:[#allocation17_spill]] %s5000_s27 }
  0x25   :  { %s5005_s30 = sld [smem:[%s5755_s0 + %s4856_s28]]   ;;  %s4860_s28 = smov 29  }
  0x26   :  { %s5010_s24 = sld [smem:[%s5755_s0 + %s4857_s7]]   ;;  %s4861_s7 = smov 30  }
  0x27   :  { %5783 = sst [smem:[#allocation16_spill]] %s4985_s4 }
  0x28   :  { %s5015_s4 = sld [smem:[%s5755_s0 + %s4858_s15]]   ;;  %s4862_s15 = smov 31  }
  0x29   :  { %s5020_s27 = sld [smem:[%s5755_s0 + %s4859_s22]]   ;;  %s4863_s22 = smov 32  }
  0x2b   :  { %5785 = sst [smem:[#allocation18_spill]] %s5005_s30 }
  0x2c   :  { %5786 = sst [smem:[#allocation19_spill]] %s5010_s24 }
  0x2d   :  { %s5025_s30 = sld [smem:[%s5755_s0 + %s4860_s28]]   ;;  %s5042_s28 = smov 0  }
  0x2e   :  { %5787 = sst [smem:[#allocation20_spill]] %s5015_s4 }
  0x2f   :  { %5788 = sst [smem:[#allocation21_spill]] %s5020_s27 }
  0x30   :  { %s5030_s24 = sld [smem:[%s5755_s0 + %s4861_s7]]  }
  0x31   :  { %s5035_s4 = sld [smem:[%s5755_s0 + %s4862_s15]]  }
  0x32   :  { %s5040_s27 = sld [smem:[%s5755_s0 + %s4863_s22]]  }
  0x33 LB: > { %s4307_s1 = sadd.s32 4294967295, %s4830_s28   ;;  %p4309_p0 = scmp.ge.s32.totalorder %s4830_s28, 1  ;;  %s4830_s28 = sphi %s5042_s28, %s76_s28  }
  0x34   : > { %p878_p1 = scmp.lt.s32.totalorder %s4830_s28, 5 }
  0x36   : > { %p879_p2 = pnand %p4309_p0, %p878_p1 }
  0x38   : > { %882 = sbr.rel (%p879_p2) target bundleno = 3307 (0xceb), region = 144 }
  0x3d   : > { %p4310_p3 = scmp.ne.s32.totalorder %s4307_s1, 0 }
  0x3f   : > { %953 = sbr.rel (%p4310_p3) target bundleno = 269 (0x10d), region = 148 }
  0x44   : > { %v954_v0 = vld [vmem:[%s4890_s13] sm:$0x3f]  ;;  %vm955_vm0 = vcmask 259072   ;;  %vm960_vm1 = vcmask 13312   ;;  %vm975_vm2 = vcmask 1041408   ;;  %v4864_v4 = vmov 0.0  }
  0x45   : > { %v957_v1 = vld [vmem:[%s4895_s17] sm:$0x3f]  ;;  %956 = vst.msk [vmem:[#allocation2] sm:$0x3f] %vm955_vm0, %v954_v0  ;;  %4609 = vmatprep.subr.mxu0 %v4864_v4  ;;  %vm971_vm3 = vcmask 15360   ;;  %vm4865_vm4 = vmmov 0  }
  0x46   : > { %958 = vst.msk [vmem:[#allocation3] sm:$0x3f] %vm955_vm0, %v957_v1  ;;  %v959_v2 = vld [vmem:[%s4880_s5] sm:$0x3f]  ;;  %4611 = vmatprep.mubr.msk.f32.mxu0 %vm4865_vm4, %v4864_v4  ;;  %vm1049_vm5 = vcmask 128000  }
  0x47   : > { %v963_v3 = vld [vmem:[%s4915_s3] sm:$0x3]  ;;  %961 = vst.msk [vmem:[#allocation5] sm:$0x3f] %vm960_vm1, %v959_v2 }
  0x48   : > { %v962_v5 = vld [vmem:[%s4885_s9] sm:$0x3f]  ;;  %4610 = vmatpush3.msk.msra.mxu0 %vm975_vm2, %v963_v3 }
  0x49   : > { %4612 = vmatmul.mubr.msk.f32.vlgmr.msra.gmra.mxu0 %vm971_vm3, %v962_v5  ;;  %v4311_v6 = vld [vmem:[%s4920_s8] ss:$0 sm:$0xff] }
 0x109   : > { %v1045_v7 = vpop.f32.mrf.mxu0 }
 0x10a   : > { %v1046_v8 = vadd.f32 %v4311_v6, %v1045_v7 }
 0x10b   : > { %v4613_v9 = vpop.f32.mrf.mxu0 }
 0x10c   : > { %1050 = vst.msk [vmem:[#allocation4] sm:$0x3f] %vm1049_vm5, %v1046_v8 }
 0x10d PF: > { %v1058_v10 = vld [vmem:[%s4905_s25 + $0x18] sm:$0xff]  ;;  %v1054_v11 = vld [vmem:[%s4900_s21 + $0x8] sm:$0xff]  ;;  %v5763_v12 = vmov 0.0   ;;  %v1057_v13 = vld [vmem:[%s4905_s25 + $0x10] sm:$0xff]  ;;  %vm1133_vm6 = vcmask 130048   ;;  %vm4867_vm7 = vmmov 0   ;;  %v1338_v26 = vlaneseq }
 0x10e   : > { %4614 = vmatprep.subr.mxu0 %v5763_v12  ;;  %4625 = vmatprep.subr.mxu1 %v5763_v12  ;;  %v1053_v14 = vld [vmem:[%s4900_s21] sm:$0xff]  ;;  %v1056_v15 = vld [vmem:[%s4905_s25 + $0x8] sm:$0xff]  ;;  %vm1059_vm8 = vcmask 261120   ;;  %vm1363_vm9 = vcmask 1042432   ;;  %vm1356_vm13 = vcmask 23552   ;;  %s4868_s0 = smov 64  }
 0x10f   : > { %4615 = vmatpush3.msra.mxu0 %v1058_v10  ;;  %4626 = vmatpush3.msra.mxu1 %v1054_v11  ;;  %v1055_v17 = vld [vmem:[%s4905_s25] sm:$0xff]  ;;  %v5080_v27 = vshrl.u32 %v1338_v26, 7  ;;  %v5082_v28 = vand.u32 127, %v1338_v26  ;;  %v1222_v34 = vld [vmem:[#allocation3] sm:$0x3f]  ;;  %s4869_s2 = smov 32  }
 0x110   : > { %4616 = vmatprep.subr.mxu0 %v5763_v12  ;;  %4627 = vmatprep.subr.mxu1 %v5763_v12  ;;  %v1051_v18 = vld [vmem:[#allocation2] sm:$0x3f]  ;;  %v4870_v43 = vmov 0   ;;  %v1253_v49 = vld [vmem:[%s4925_s14 + $0x18] sm:$0xff]  ;;  %v1252_v50 = vld [vmem:[%s4925_s14 + $0x10] sm:$0xff]  ;;  %s4871_s7 = smov 96  }
 0x111   : > { %4617 = vmatpush3.msra.mxu0 %v1057_v13  ;;  %4628 = vmatpush3.msra.mxu1 %v1053_v14  ;;  %v4316_v22 = vld [vmem:[%s4910_s29] ss:$0 sm:$0xff]  ;;  %v5085_v29 = vcvt.s32.f32 %v5080_v27  ;;  %v1343_v30 = vmul.u32 3, %v5082_v28  ;;  %v5089_v31 = vadd.s32 8, %v5080_v27  ;;  %v1251_v52 = vld [vmem:[%s4925_s14 + $0x8] sm:$0xff]  ;;  %vm1248_vm1 = vcmask 259072  }
 0x112   : > { %4618 = vmatprep.subr.mxu0 %v5763_v12  ;;  %4629 = vmatprep.mubr.msk.f32.mxu1 %vm4867_vm7, %v5763_v12  ;;  %v1250_v55 = vld [vmem:[%s4925_s14] sm:$0xff]  ;;  %v1457_v0 = vcvt.s32.f32 %v5082_v28  ;;  %s4387_s10 = sshll.u32 %s4307_s1, 3  ;;  %v1336_v8 = vld [vmem:[#allocation5] sm:$0x3f]  ;;  %vm4159_vm3 = vcmask 13312   ;;  %vm1640_vm5 = vcmask 1041408  }
 0x113   : > { %v1052_v16 = vld [vmem:[#allocation4] sm:$0x3f]  ;;  %4619 = vmatpush3.msra.mxu0 %v1056_v15  ;;  %4622 = vmatprep.mubr.msk.f32.mxu0 %vm4867_vm7, %v5763_v12  ;;  %vm1344_vm10 = vcmp.ge.s32.totalorder %v5080_v27, %v1343_v30  ;;  %v1346_v32 = vadd.s32 3, %v1343_v30  ;;  %vm1345_vm11 = vcmp.ge.s32.totalorder %v5089_v31, %v1343_v30  ;;  %v1442_v3 = vcvt.s32.f32 %v5089_v31  ;;  %v4318_v5 = vld [vmem:[%s4930_s19] ss:$0 sm:$0xff]  ;;  %s4248_s11 = scalar_lea.vmem %s5035_s4, %s4387_s10  ;;  %v5166_v14 = vld [vmem:[%s4995_s20 + $0x78] sm:$0xff] }
 0x114   : > { %4630 = vmatmul.mubr.msk.f32.vlgmr.msra.gmra.mxu1 %vm1133_vm6, %v1052_v16  ;;  %4620 = vmatprep.subr.mxu0 %v5763_v12  ;;  %v5179_v15 = vld [vmem:[%s4995_s20 + $0x70] sm:$0xff]  ;;  %v5183_v16 = vld [vmem:[%s4995_s20 + $0x58] sm:$0xff]  ;;  %s5792_s15 = sld [smem:[#allocation20_spill]] }
 0x115   : > { %4621 = vmatpush3.msra.mxu0 %v1055_v17  ;;  %4632 = vmatprep.subr.mxu1 %v5763_v12  ;;  %vm1347_vm12 = vcmp.lt.s32.totalorder %v5080_v27, %v1346_v32  ;;  %vm1348_vm14 = vcmp.lt.s32.totalorder %v5089_v31, %v1346_v32  ;;  %v5187_v17 = vld [vmem:[%s4995_s20 + $0x50] sm:$0xff]  ;;  %s5794_s16 = sld [smem:[#allocation16_spill]] }
 0x116   : > { %4623 = vmatmul.mubr.msk.f32.vlgmr.msra.gmra.mxu0 %vm1059_vm8, %v1051_v18  ;;  %4640 = vmatprep.mubr.msk.f32.mxu1 %vm4867_vm7, %v5763_v12  ;;  %vm1349_vm15 = vmand %vm1344_vm10, %vm1347_vm12  ;;  %v1625_v18 = vld [vmem:[%s4980_s6] sm:$0x3]  ;;  %vm1633_vm10 = vcmask 15360   ;;  %s5799_s18 = sld [smem:[#allocation17_spill]]  ;;  %vm2577_vm12 = vcmask 516096  }
 0x117   : > { %4643 = vmatprep.subr.msk.mxu0 %vm1363_vm9, %v5085_v29  ;;  %v5101_v35 = vsel %vm1349_vm15, 1.0, %v5763_v12  ;;  %vm1350_vm0 = vmand %vm1345_vm11, %vm1348_vm14  ;;  %4790 = vset.pattern.permute.xlu1 %v4870_v43  ;;  %vm2180_vm11 = vcmask 1040384   ;;  %s5800_s22 = sld [smem:[#allocation18_spill]]  ;;  %vm2631_vm14 = vcmask 521219   ;;  %vm2639_vm15 = vcmask 523270  }
 0x118   : > { %4644 = vmatpush3.msk.msra.mxu0 %vm1363_vm9, %v5085_v29  ;;  %4645 = vmatprep.mubr.msk.f32.mxu0 %vm1356_vm13, %v5101_v35  ;;  %v5106_v36 = vsel %vm1350_vm0, 1.0, %v5763_v12  ;;  %s5801_s23 = sld [smem:[#allocation19_spill]] }
 0x119   : > { %4791 = vset.pattern.permute.xlu0 %v4870_v43  ;;  %4633 = vmatpush3.msra.mxu1 %v1253_v49  ;;  %v5250_v43 = vld [vmem:[%s4990_s12 + $0x28] sm:$0xff]  ;;  %v5280_v49 = vld [vmem:[%s4990_s12 + $0x10] sm:$0xff]  ;;  %s5802_s26 = sld [smem:[#allocation21_spill]] }
 0x11a   : > { %4646 = vmatmul.mubr.msk.f32.vlgmr.msra.gmra.mxu0 %vm1356_vm13, %v5106_v36  ;;  %4634 = vmatprep.subr.mxu1 %v5763_v12  ;;  %5791 = vst [vmem:[#allocation24_spill] sm:$0xff] %v5250_v43  ;;  %5797 = vst [vmem:[#allocation28_spill] sm:$0xff] %v5280_v49  ;;  %s5810_s1 = sld [smem:[#allocation7_spill]] }
 0x11b   : > { %4635 = vmatpush3.msra.mxu1 %v1252_v50  ;;  %v2383_v50 = vld [vmem:[%s5792_s15 + $0xf8] sm:$0xff]  ;;  %s5816_s10 = sld [smem:[#allocation10_spill]] }
 0x11c   : > { %4636 = vmatprep.subr.mxu1 %v5763_v12 }
 0x11d   : > { %4637 = vmatpush3.msra.mxu1 %v1251_v52 }
 0x11e   : > { %4638 = vmatprep.subr.mxu1 %v5763_v12 }
 0x11f   : > { %4639 = vmatpush3.msra.mxu1 %v1250_v55 }
 0x1d4   : > { %v1203_v19 = vpop.f32.mrf.mxu1 }
 0x1d6   : > { %v4631_v20 = vpop.f32.mrf.mxu1  ;;  %v1129_v21 = vpop.f32.mrf.mxu0 }
 0x1d7   : > { %v1204_v23 = vadd.f32 %v1203_v19, %v1129_v21  ;;  %v5192_v19 = vld [vmem:[%s4995_s20 + $0x38] sm:$0xff]  ;;  %v5197_v20 = vld [vmem:[%s4995_s20 + $0x30] sm:$0xff]  ;;  %v5202_v21 = vld [vmem:[%s4995_s20 + $0x68] sm:$0xff] }
 0x1d8   : > { %v4624_v24 = vpop.f32.mrf.mxu0 }
 0x1d9   : > { %v1214_v25 = vadd.f32 %v4316_v22, %v1204_v23  ;;  %v5205_v22 = vld [vmem:[%s4995_s20 + $0x18] sm:$0xff]  ;;  %v5210_v23 = vld [vmem:[%s4995_s20 + $0x10] sm:$0xff] }
 0x1da   : > { %v4647_v48 = vpop.f32.mrf.mxu0  ;;  %v5214_v24 = vld [vmem:[%s4990_s12 + $0x38] sm:$0xff] }
 0x1db   : > { %4792 = vtanh.f32 %v1214_v25  ;;  %v4317_v37 = vmul.f32 -1.442695, %v1214_v25  ;;  %v1444_v58 = vmul.f32 3.0, %v4647_v48  ;;  %v5277_v48 = vld [vmem:[%s4990_s12] sm:$0xff] }
 0x1dc   : > { %v1433_v51 = vpop.f32.mrf.mxu0  ;;  %5796 = vst [vmem:[#allocation27_spill] sm:$0xff] %v5277_v48 }
 0x1dd   : > { %4794 = vpow2.f32 %v4317_v37  ;;  %v1443_v54 = vmul.f32 3.0, %v1433_v51  ;;  %v2415_v51 = vld [vmem:[%s5792_s15 + $0x1f8] sm:$0xff] }
 0x1e8   : > { %v4793_v33 = vpop.eup %4792 }
 0x1e9   : > { %1229 = vrot.lane.b32.xlu0 %v4793_v33, %s4868_s0  ;;  %v5218_v33 = vld [vmem:[%s4995_s20 + $0x60] sm:$0xff] }
 0x1ea   : > { %v4795_v38 = vpop.eup %4794 }
 0x1eb   : > { %v1218_v39 = vadd.f32 1.0, %v4795_v38  ;;  %v5226_v38 = vld [vmem:[%s4995_s20 + $0x40] sm:$0xff] }
 0x1ed   : > { %1224 = vrot.lane.b32.xlu0 %v1222_v34, %s4869_s2  ;;  %4796 = vrcp.f32 %v1218_v39  ;;  %v5222_v34 = vld [vmem:[%s4995_s20 + $0x48] sm:$0xff] }
 0x1ee   : > { %v5231_v39 = vld [vmem:[%s4995_s20 + $0x28] sm:$0xff] }
 0x1fa   : > { %v4797_v40 = vpop.eup %4796 }
 0x25b   : > { %v1230_v41 = vpop.permute.xlu0 %1229 }
 0x25c   : > { %v1232_v42 = vmul.f32 %v4797_v40, %v1230_v41  ;;  %v5240_v41 = vld [vmem:[%s4995_s20 + $0x8] sm:$0xff] }
 0x25e   : > { %1234 = vrot.lane.b32.xlu1 %v1232_v42, %s4869_s2  ;;  %v5245_v42 = vld [vmem:[%s4995_s20] sm:$0xff] }
 0x25f   : > { %v1225_v44 = vpop.permute.xlu0 %1224 }
 0x260   : > { %v1227_v45 = vmul.f32 %v4797_v40, %v1225_v44  ;;  %v5261_v44 = vld [vmem:[%s4990_s12 + $0x20] sm:$0xff] }
 0x261   : > { %5793 = vst [vmem:[#allocation25_spill] sm:$0xff] %v5261_v44 }
 0x2d0   : > { %v1235_v46 = vpop.permute.xlu1 %1234 }
 0x2d1   : > { %v1237_v47 = vadd.f32 %v1235_v46, %v1227_v45  ;;  %v5264_v45 = vld [vmem:[%s4990_s12 + $0x30] sm:$0xff]  ;;  %v5269_v46 = vld [vmem:[%s4990_s12 + $0x8] sm:$0xff] }
 0x2d2   : > { %5795 = vst [vmem:[#allocation26_spill] sm:$0xff] %v5269_v46 }
 0x2d3   : > { %4798 = vtanh.f32 %v1237_v47 }
 0x2e0   : > { %v4799_v53 = vpop.eup %4798 }
 0x2e1   : > { %1240 = vrot.lane.b32.xlu1 %v4799_v53, %s4868_s0  ;;  %v5287_v53 = vld [vmem:[%s5794_s16] ss:$0 sm:$0xff]  ;;  %s5811_s0 = sld [smem:[#allocation8_spill]] }
 0x2e2   : > { %5798 = vst [vmem:[#allocation29_spill] sm:$0xff] %v5287_v53  ;;  %s5818_s16 = sld [smem:[#allocation13_spill]] }
 0x2e5   : > { %1447 = vperm.xlu1 %4790, %v1443_v54  }
 0x353   : > { %v1241_v56 = vpop.permute.xlu1 %1240 }
 0x354   : > { %v1243_v57 = vmul.f32 %v4797_v40, %v1241_v56  ;;  %v5235_v40 = vld [vmem:[%s4995_s20 + $0x20] sm:$0xff]  ;;  %v2367_v56 = vld [vmem:[%s5792_s15 + $0x78] sm:$0xff] }
 0x356   : > { %v2899_v59 = vrot.slane %v1243_v57, 3  ;;  %1262 = vrot.lane.b32.xlu0 %v1243_v57, %s4869_s2  ;;  %v2399_v57 = vld [vmem:[%s5792_s15 + $0x178] sm:$0xff] }
 0x358   : > { %2900 = vrot.lane.b32.xlu1 %v2899_v59, %s4869_s2  ;;  %v2414_v59 = vld [vmem:[%s5792_s15 + $0x1f0] sm:$0xff]  ;;  %s5813_s2 = sld [smem:[#allocation12_spill]] }
 0x35a   : > { %1452 = vperm.xlu0 %4791, %v1444_v58   ;;  %v2382_v58 = vld [vmem:[%s5792_s15 + $0xf0] sm:$0xff] }
 0x35c   : > { %1245 = vrot.lane.b32.xlu1 %v1237_v47, %s4871_s7  ;;  %v5272_v47 = vld [vmem:[%s4990_s12 + $0x18] sm:$0xff]  ;;  %s5815_s7 = sld [smem:[#allocation9_spill]] }
 0x360   : > { %v1448_v60 = vpop.permute.xlu1 %1447 }
 0x361   : > { %v1455_v1 = vsub.f32 %v5085_v29, %v1448_v60  ;;  %v2366_v60 = vld [vmem:[%s5792_s15 + $0x70] sm:$0xff] }
 0x363   : > { %vm1458_vm2 = vcmp.eq.f32.partialorder %v1457_v0, %v1455_v1  ;;  %v2413_v1 = vld [vmem:[%s5792_s15 + $0x1e8] sm:$0xff] }
 0x364   : > { %v5134_v2 = vsel %vm1458_vm2, 1.0, %v5763_v12 }
 0x365   : > { %4650 = vmatprep.mubr.msk.f32.mxu0 %vm1356_vm13, %v5134_v2 }
 0x3c8   : > { %v5122_v61 = vpop.permute.xlu0 %1262 }
 0x3c9   : > { %5789 = vst [vmem:[#allocation22_spill] sm:$0xff] %v5122_v61  ;;  %4641 = vmatmul.mubr.msk.f32.vlgmr.msra.gmra.mxu1 %vm1059_vm8, %v5122_v61 }
 0x3ca   : > { %v5126_v62 = vpop.permute.xlu1 %2900  ;;  %4655 = vmatprep.mubr.msk.f32.mxu1 %vm1356_vm13, %v5101_v35 }
 0x3ce   : > { %v1246_v63 = vpop.permute.xlu1 %1245 }
 0x3cf   : > { %1249 = vst.msk [vmem:[#allocation3] sm:$0x3f] %vm1248_vm1, %v1246_v63  ;;  %v2398_v63 = vld [vmem:[%s5792_s15 + $0x170] sm:$0xff] }
 0x3d5   : > { %v1453_v4 = vpop.permute.xlu0 %1452 }
 0x3d6   : > { %v1456_v6 = vsub.f32 %v1442_v3, %v1453_v4  ;;  %v2365_v4 = vld [vmem:[%s5792_s15 + $0x68] sm:$0xff] }
 0x3d8   : > { %vm1459_vm4 = vcmp.eq.f32.partialorder %v1457_v0, %v1456_v6  ;;  %v2381_v0 = vld [vmem:[%s5792_s15 + $0xe8] sm:$0xff]  ;;  %v2380_v6 = vld [vmem:[%s5792_s15 + $0xe0] sm:$0xff] }
 0x3d9   : > { %v5155_v13 = vsel %vm1459_vm4, 1.0, %v5763_v12 }
 0x489   : > { %v1332_v7 = vpop.f32.mrf.mxu1 }
 0x48a   : > { %v5143_v9 = vadd.f32 %v4318_v5, %v1332_v7  ;;  %v2397_v5 = vld [vmem:[%s5792_s15 + $0x168] sm:$0xff]  ;;  %v2412_v7 = vld [vmem:[%s5792_s15 + $0x1e0] sm:$0xff] }
 0x48b   : > { %v4642_v10 = vpop.f32.mrf.mxu1 }
 0x48c   : > { %5790 = vst [vmem:[#allocation23_spill] sm:$0xff] %v5143_v9  ;;  %v5146_v11 = vadd.f32 %v1336_v8, %v5143_v9  ;;  %4249 = vst.msk [vmem:[%s4248_s11] sm:$0x3f] %vm4159_vm3, %v5143_v9  ;;  %v2364_v8 = vld [vmem:[%s5792_s15 + $0x60] sm:$0xff]  ;;  %s5817_s11 = sld [smem:[#allocation11_spill]] }
 0x48d   : > { %v2396_v10 = vld [vmem:[%s5792_s15 + $0x160] sm:$0xff] }
 0x48e   : > { %4160 = vst.msk [vmem:[#allocation5] sm:$0x3f] %vm4159_vm3, %v5146_v11  ;;  %4648 = vmatprep.subr.msk.mxu0 %vm1363_vm9, %v5146_v11  ;;  %4653 = vmatprep.subr.msk.mxu1 %vm1363_vm9, %v5146_v11 }
 0x48f   : > { %4649 = vmatpush3.msk.msra.mxu0 %vm1363_vm9, %v5146_v11  ;;  %4654 = vmatpush3.msk.msra.mxu1 %vm1363_vm9, %v5146_v11 }
 0x490   : > { %4651 = vmatmul.mubr.msk.f32.vlgmr.msra.gmra.mxu0 %vm1356_vm13, %v5155_v13  ;;  %4656 = vmatmul.mubr.msk.f32.vlgmr.msra.gmra.mxu1 %vm1356_vm13, %v5106_v36 }
 0x491   : > { %4663 = vmatprep.subr.msk.mxu1 %vm1363_vm9, %v5122_v61  ;;  %4665 = vmatprep.mubr.msk.f32.mxu1 %vm1356_vm13, %v5134_v2 }
 0x492   : > { %4664 = vmatpush3.msk.msra.mxu1 %vm1363_vm9, %v5122_v61  ;;  %4658 = vmatprep.subr.msk.mxu0 %vm1640_vm5, %v1625_v18 }
 0x493   : > { %1927 = vmatprep.subr.mxu1 %v5166_v14  ;;  %4659 = vmatpush3.msk.msra.mxu0 %vm1640_vm5, %v1625_v18  ;;  %v2379_v18 = vld [vmem:[%s5792_s15 + $0xd8] sm:$0xff] }
 0x494   : > { %4666 = vmatmul.mubr.msk.f32.vlgmr.msra.gmra.mxu1 %vm1356_vm13, %v5155_v13  ;;  %1850 = vmatprep.subr.mxu0 %v5202_v21 }
 0x495   : > { %1967 = vmatprep.mubr.f32.mxu1 %v5763_v12  ;;  %1928 = vmatpush1.msra.mxu1 %v5179_v15 }
 0x496   : > { %1929 = vmatprep.subr.mxu1 %v5183_v16 }
 0x497   : > { %1930 = vmatpush1.msra.mxu1 %v5187_v17 }
 0x498   : > { %1931 = vmatprep.subr.mxu1 %v5192_v19 }
 0x499   : > { %1932 = vmatpush1.msra.mxu1 %v5197_v20 }
 0x49a   : > { %1933 = vmatprep.subr.mxu1 %v5205_v22 }
 0x49b   : > { %1934 = vmatpush1.msra.mxu1 %v5210_v23 }
 0x49c   : > { %2091 = vmatprep.subr.mxu1 %v5214_v24 }
 0x550   : > { %v4652_v25 = vpop.f32.mrf.mxu0  ;;  %v4657_v26 = vpop.f32.mrf.mxu1 }
 0x551   : > { %v1624_v31 = vsub.f32 %v4652_v25, %v4657_v26  ;;  %v2411_v25 = vld [vmem:[%s5792_s15 + $0x1d8] sm:$0xff] }
 0x552   : > { %v1539_v28 = vpop.f32.mrf.mxu0  ;;  %v1614_v29 = vpop.f32.mrf.mxu1  ;;  %v2363_v26 = vld [vmem:[%s5792_s15 + $0x58] sm:$0xff] }
 0x553   : > { %v1623_v30 = vsub.f32 %v1539_v28, %v1614_v29  ;;  %v2395_v28 = vld [vmem:[%s5792_s15 + $0x158] sm:$0xff]  ;;  %v2378_v29 = vld [vmem:[%s5792_s15 + $0xd0] sm:$0xff] }
 0x554   : > { %v4667_v32 = vpop.f32.mrf.mxu1 }
 0x555   : > { %4660 = vmatprep.mubr.msk.f32.mxu0 %vm1633_vm10, %v1623_v30  ;;  %v2410_v30 = vld [vmem:[%s5792_s15 + $0x1d0] sm:$0xff] }
 0x556   : > { %4661 = vmatmul.mubr.msk.f32.vlgmr.msra.gmra.mxu0 %vm1633_vm10, %v1624_v31  ;;  %v1787_v37 = vpop.f32.mrf.mxu1  ;;  %v2362_v31 = vld [vmem:[%s5792_s15 + $0x50] sm:$0xff] }
 0x557   : > { %1851 = vmatpush1.msra.mxu0 %v5218_v33  ;;  %4342 = vmatmul.mubr.msk.f32.vlgmr.msra.gmra.mxu1 %vm1059_vm8, %v1787_v37 }
 0x558   : > { %1852 = vmatprep.subr.mxu0 %v5222_v34  ;;  %1973 = vmatprep.mubr.f32.mxu1 %v5763_v12 }
 0x559   : > { %1853 = vmatpush1.msra.mxu0 %v5226_v38  ;;  %1890 = vmatprep.mubr.f32.mxu0 %v5763_v12 }
 0x55a   : > { %1854 = vmatprep.subr.mxu0 %v5231_v39  ;;  %2092 = vmatpush1.msra.mxu1 %v5264_v45 }
 0x55b   : > { %1855 = vmatpush1.msra.mxu0 %v5235_v40  ;;  %4343 = vmatmul.mubr.msk.f32.gmra.mxu1 %vm1059_vm8, %v4667_v32 }
 0x55c   : > { %1856 = vmatprep.subr.mxu0 %v5240_v41  ;;  %2127 = vmatprep.mubr.f32.mxu1 %v5763_v12 }
 0x55d   : > { %1857 = vmatpush1.msra.mxu0 %v5245_v42  ;;  %2093 = vmatprep.subr.mxu1 %v5272_v47 }
 0x55e   : > { %4340 = vmatmul.mubr.msk.f32.vlgmr.msra.gmra.mxu0 %vm1059_vm8, %v1787_v37  ;;  %2014 = vmatprep.subr.mxu0 %v5250_v43  ;;  %v2377_v37 = vld [vmem:[%s5792_s15 + $0xc8] sm:$0xff] }
 0x55f   : > { %1896 = vmatprep.mubr.f32.mxu0 %v5763_v12  ;;  %2015 = vmatpush1.msra.mxu0 %v5261_v44 }
 0x560   : > { %2016 = vmatprep.subr.mxu0 %v5269_v46  ;;  %2094 = vmatpush1.msra.mxu1 %v5280_v49 }
 0x561   : > { %2017 = vmatpush1.msra.mxu0 %v5277_v48  ;;  %4458 = vmatprep.subr.mxu1 %v2415_v51  ;;  %v2361_v51 = vld [vmem:[%s5792_s15 + $0x48] sm:$0xff] }
 0x562   : > { %4341 = vmatmul.mubr.msk.f32.gmra.mxu0 %vm1059_vm8, %v4667_v32  ;;  %4420 = vmatprep.subr.mxu0 %v2383_v50  ;;  %v2394_v32 = vld [vmem:[%s5792_s15 + $0x150] sm:$0xff]  ;;  %v2409_v50 = vld [vmem:[%s5792_s15 + $0x1c8] sm:$0xff] }
 0x563   : > { %2050 = vmatprep.mubr.f32.mxu0 %v5763_v12 }
 0x616   : > { %v4662_v52 = vpop.f32.mrf.mxu0 }
 0x617   : > { %v1716_v3 = vadd.f32 %v4662_v52, %v5287_v53  ;;  %v2393_v52 = vld [vmem:[%s5792_s15 + $0x148] sm:$0xff] }
 0x618   : > { %v1710_v54 = vpop.f32.mrf.mxu0 }
 0x619   : > { %v1711_v55 = vadd.f32 %v5287_v53, %v1710_v54  ;;  %v2376_v54 = vld [vmem:[%s5792_s15 + $0xc0] sm:$0xff] }
 0x61b   : > { %4344 = vmatmul.mubr.msk.f32.vlgmr.msra.gmra.mxu0 %vm1133_vm6, %v1711_v55  ;;  %4346 = vmatmul.mubr.msk.f32.vlgmr.msra.gmra.mxu1 %vm1133_vm6, %v1711_v55  ;;  %v2408_v55 = vld [vmem:[%s5792_s15 + $0x1c0] sm:$0xff] }
 0x61c   : > { %4421 = vmatpush3.msra.mxu0 %v2367_v56  ;;  %4459 = vmatpush3.msra.mxu1 %v2399_v57  ;;  %v2360_v56 = vld [vmem:[%s5792_s15 + $0x40] sm:$0xff] }
 0x61d   : > { %4422 = vmatprep.subr.mxu0 %v2382_v58  ;;  %4460 = vmatprep.subr.mxu1 %v2414_v59  ;;  %v2392_v57 = vld [vmem:[%s5792_s15 + $0x140] sm:$0xff]  ;;  %v2375_v58 = vld [vmem:[%s5792_s15 + $0xb8] sm:$0xff] }
 0x61e   : > { %4423 = vmatpush3.msra.mxu0 %v2366_v60  ;;  %4461 = vmatpush3.msra.mxu1 %v2398_v63  ;;  %v2407_v59 = vld [vmem:[%s5792_s15 + $0x1b8] sm:$0xff] }
 0x61f   : > { %2056 = vmatprep.mubr.f32.mxu0 %v5763_v12  ;;  %2133 = vmatprep.mubr.f32.mxu1 %v5763_v12  ;;  %v2359_v60 = vld [vmem:[%s5792_s15 + $0x38] sm:$0xff] }
 0x620   : > { %4424 = vmatprep.subr.mxu0 %v2381_v0  ;;  %4462 = vmatprep.subr.mxu1 %v2413_v1  ;;  %v2391_v63 = vld [vmem:[%s5792_s15 + $0x138] sm:$0xff]  ;;  %v2374_v0 = vld [vmem:[%s5792_s15 + $0xb0] sm:$0xff] }
 0x621   : > { %4345 = vmatmul.mubr.msk.f32.gmra.mxu0 %vm1133_vm6, %v1716_v3  ;;  %4347 = vmatmul.mubr.msk.f32.gmra.mxu1 %vm1133_vm6, %v1716_v3  ;;  %v2406_v1 = vld [vmem:[%s5792_s15 + $0x1b0] sm:$0xff] }
 0x622   : > { %4425 = vmatpush3.msra.mxu0 %v2365_v4  ;;  %4463 = vmatpush3.msra.mxu1 %v2397_v5  ;;  %v2358_v3 = vld [vmem:[%s5792_s15 + $0x30] sm:$0xff]  ;;  %v2373_v5 = vld [vmem:[%s5792_s15 + $0xa8] sm:$0xff] }
 0x623   : > { %4426 = vmatprep.subr.mxu0 %v2380_v6  ;;  %4464 = vmatprep.subr.mxu1 %v2412_v7  ;;  %v2390_v4 = vld [vmem:[%s5792_s15 + $0x130] sm:$0xff]  ;;  %v2405_v6 = vld [vmem:[%s5792_s15 + $0x1a8] sm:$0xff] }
 0x624   : > { %4427 = vmatpush3.msra.mxu0 %v2364_v8  ;;  %4465 = vmatpush3.msra.mxu1 %v2396_v10  ;;  %v2357_v7 = vld [vmem:[%s5792_s15 + $0x28] sm:$0xff]  ;;  %v2372_v10 = vld [vmem:[%s5792_s15 + $0xa0] sm:$0xff] }
 0x625   : > { %4428 = vmatprep.subr.mxu0 %v2379_v18  ;;  %4466 = vmatprep.subr.mxu1 %v2411_v25  ;;  %v2389_v8 = vld [vmem:[%s5792_s15 + $0x128] sm:$0xff]  ;;  %v2404_v18 = vld [vmem:[%s5792_s15 + $0x1a0] sm:$0xff] }
 0x626   : > { %4429 = vmatpush3.msra.mxu0 %v2363_v26  ;;  %4467 = vmatpush3.msra.mxu1 %v2395_v28  ;;  %v2356_v25 = vld [vmem:[%s5792_s15 + $0x20] sm:$0xff]  ;;  %v2371_v28 = vld [vmem:[%s5792_s15 + $0x98] sm:$0xff] }
 0x627   : > { %4430 = vmatprep.subr.mxu0 %v2378_v29  ;;  %4468 = vmatprep.subr.mxu1 %v2410_v30  ;;  %v2388_v26 = vld [vmem:[%s5792_s15 + $0x120] sm:$0xff]  ;;  %v2403_v29 = vld [vmem:[%s5792_s15 + $0x198] sm:$0xff] }
 0x628   : > { %4431 = vmatpush3.msra.mxu0 %v2362_v31  ;;  %4469 = vmatpush3.msra.mxu1 %v2394_v32  ;;  %v2355_v30 = vld [vmem:[%s5792_s15 + $0x18] sm:$0xff]  ;;  %v2370_v32 = vld [vmem:[%s5792_s15 + $0x90] sm:$0xff] }
 0x629   : > { %4432 = vmatprep.subr.mxu0 %v2377_v37  ;;  %4470 = vmatprep.subr.mxu1 %v2409_v50  ;;  %v2387_v31 = vld [vmem:[%s5792_s15 + $0x118] sm:$0xff]  ;;  %v2402_v37 = vld [vmem:[%s5792_s15 + $0x190] sm:$0xff] }
 0x62a   : > { %4433 = vmatpush3.msra.mxu0 %v2361_v51  ;;  %4471 = vmatpush3.msra.mxu1 %v2393_v52  ;;  %v2354_v50 = vld [vmem:[%s5792_s15 + $0x10] sm:$0xff]  ;;  %v2369_v52 = vld [vmem:[%s5792_s15 + $0x88] sm:$0xff] }
 0x62b   : > { %4434 = vmatprep.subr.mxu0 %v2376_v54  ;;  %4472 = vmatprep.subr.mxu1 %v2408_v55  ;;  %v2386_v51 = vld [vmem:[%s5792_s15 + $0x110] sm:$0xff]  ;;  %v2401_v54 = vld [vmem:[%s5792_s15 + $0x188] sm:$0xff] }
 0x62c   : > { %4435 = vmatpush3.msra.mxu0 %v2360_v56  ;;  %4473 = vmatpush3.msra.mxu1 %v2392_v57  ;;  %v2353_v55 = vld [vmem:[%s5792_s15 + $0x8] sm:$0xff]  ;;  %v2368_v57 = vld [vmem:[%s5792_s15 + $0x80] sm:$0xff] }
 0x62d   : > { %4436 = vmatprep.subr.mxu0 %v2375_v58  ;;  %4474 = vmatprep.subr.mxu1 %v2407_v59  ;;  %v2385_v56 = vld [vmem:[%s5792_s15 + $0x108] sm:$0xff]  ;;  %v2400_v58 = vld [vmem:[%s5792_s15 + $0x180] sm:$0xff] }
 0x62e   : > { %4437 = vmatpush3.msra.mxu0 %v2359_v60  ;;  %4475 = vmatpush3.msra.mxu1 %v2391_v63  ;;  %v2352_v59 = vld [vmem:[%s5792_s15] sm:$0xff]  ;;  %v5360_v63 = vrot.slane %v5146_v11, 3 }
 0x62f   : > { %4438 = vmatprep.subr.mxu0 %v2374_v0  ;;  %4476 = vmatprep.subr.mxu1 %v2406_v1  ;;  %v2384_v60 = vld [vmem:[%s5792_s15 + $0x100] sm:$0xff]  ;;  %v1969_v0 = vpop.f32.mrf.mxu1  ;;  %v1892_v1 = vpop.f32.mrf.mxu0 }
 0x630   : > { %4439 = vmatpush3.msra.mxu0 %v2358_v3  ;;  %4477 = vmatpush3.msra.mxu1 %v2390_v4 }
 0x631   : > { %4440 = vmatprep.subr.mxu0 %v2373_v5  ;;  %4478 = vmatprep.subr.mxu1 %v2405_v6  ;;  %v1971_v3 = vpop.f32.mrf.mxu1  ;;  %v1894_v4 = vpop.f32.mrf.mxu0 }
 0x632   : > { %4441 = vmatpush3.msra.mxu0 %v2357_v7  ;;  %4479 = vmatpush3.msra.mxu1 %v2389_v8 }
 0x633   : > { %4442 = vmatprep.subr.mxu0 %v2372_v10  ;;  %4480 = vmatprep.subr.mxu1 %v2404_v18  ;;  %v1975_v5 = vpop.f32.mrf.mxu1  ;;  %v1898_v6 = vpop.f32.mrf.mxu0 }
 0x634   : > { %4443 = vmatpush3.msra.mxu0 %v2356_v25  ;;  %4481 = vmatpush3.msra.mxu1 %v2388_v26  ;;  %v5367_v26 = vsub.s32 0, %v5080_v27 }
 0x635   : > { %4444 = vmatprep.subr.mxu0 %v2371_v28  ;;  %4482 = vmatprep.subr.mxu1 %v2403_v29  ;;  %v1977_v7 = vpop.f32.mrf.mxu1  ;;  %v1900_v8 = vpop.f32.mrf.mxu0  ;;  %v2148_v29 = vld [vmem:[%s5799_s18] sm:$0xf] }
 0x636   : > { %4445 = vmatpush3.msra.mxu0 %v2355_v30  ;;  %4483 = vmatpush3.msra.mxu1 %v2387_v31  ;;  %v5371_v31 = vsub.s32 2, %v5080_v27 }
 0x637   : > { %4446 = vmatprep.subr.mxu0 %v2370_v32  ;;  %4484 = vmatprep.subr.mxu1 %v2402_v37  ;;  %v5374_v32 = vsub.s32 1, %v5080_v27 }
 0x638   : > { %4447 = vmatpush3.msra.mxu0 %v2354_v50  ;;  %4485 = vmatpush3.msra.mxu1 %v2386_v51  ;;  %v5377_v51 = vsub.s32 3, %v5080_v27 }
 0x639   : > { %4448 = vmatprep.subr.mxu0 %v2369_v52  ;;  %4486 = vmatprep.subr.mxu1 %v2401_v54 }
 0x63a   : > { %4449 = vmatpush3.msra.mxu0 %v2353_v55  ;;  %4487 = vmatpush3.msra.mxu1 %v2385_v56  ;;  %v2153_v55 = vrot.slane %v2148_v29, %v5367_v26  ;;  %v2165_v12 = vrot.slane %v2148_v29, %v5377_v51 }
 0x63b   : > { %4450 = vmatprep.subr.mxu0 %v2368_v57  ;;  %4488 = vmatprep.subr.mxu1 %v2400_v58 }
 0x63c   : > { %4451 = vmatpush3.msra.mxu0 %v2352_v59  ;;  %4489 = vmatpush3.msra.mxu1 %v2384_v60  ;;  %v2161_v60 = vrot.slane %v2148_v29, %v5371_v31 }
 0x63d   : > { %4668 = vmatprep.subr.msk.mxu0 %vm1363_vm9, %v5360_v63  ;;  %4673 = vmatprep.subr.msk.mxu1 %vm1363_vm9, %v5360_v63 }
 0x6db   : > { %v2052_v10 = vpop.f32.mrf.mxu0  ;;  %v2129_v11 = vpop.f32.mrf.mxu1 }
 0x6dc   : > { %v2053_v28 = vadd.f32 %v2052_v10, %v1892_v1  ;;  %v2130_v30 = vadd.f32 %v2129_v11, %v1969_v0  ;;  %v2157_v0 = vrot.slane %v2148_v29, %v5374_v32 }
 0x6dd   : > { %v2054_v18 = vpop.f32.mrf.mxu0  ;;  %v2131_v25 = vpop.f32.mrf.mxu1 }
 0x6de   : > { %v2055_v37 = vadd.f32 %v2054_v18, %v1894_v4  ;;  %v2132_v50 = vadd.f32 %v2131_v25, %v1971_v3  ;;  %v2140_v58 = vmul.f32 0.05, %v2053_v28  ;;  %v2142_v59 = vmul.f32 0.05, %v2130_v30 }
 0x6e0   : > { %v2141_v27 = vmul.f32 0.05, %v2055_v37  ;;  %v2143_v25 = vmul.f32 0.05, %v2132_v50  ;;  %v2170_v30 = vadd.f32 %v2153_v55, %v2140_v58 }
 0x6e1   : > { %v2058_v52 = vpop.f32.mrf.mxu0  ;;  %v2135_v54 = vpop.f32.mrf.mxu1 }
 0x6e2   : > { %v2059_v56 = vadd.f32 %v2058_v52, %v1898_v6  ;;  %v2136_v57 = vadd.f32 %v2135_v54, %v1975_v5  ;;  %v2172_v52 = vadd.f32 %v2161_v60, %v2142_v59 }
 0x6e3   : > { %v2060_v1 = vpop.f32.mrf.mxu0  ;;  %v2137_v10 = vpop.f32.mrf.mxu1 }
 0x6e4   : > { %v2144_v11 = vmul.f32 0.05, %v2059_v56  ;;  %v2146_v4 = vmul.f32 0.05, %v2136_v57  ;;  %v2061_v3 = vadd.f32 %v2060_v1, %v1900_v8  ;;  %v2138_v18 = vadd.f32 %v2137_v10, %v1977_v7 }
 0x6e5   : > { %v2171_v57 = vadd.f32 %v2157_v0, %v2141_v27  ;;  %v2173_v8 = vadd.f32 %v2165_v12, %v2143_v25 }
 0x6e6   : > { %v2174_v9 = vadd.f32 %v2153_v55, %v2144_v11  ;;  %v2176_v6 = vadd.f32 %v2161_v60, %v2146_v4  ;;  %v2145_v5 = vmul.f32 0.05, %v2061_v3  ;;  %v2147_v28 = vmul.f32 0.05, %v2138_v18 }
 0x6e8   : > { %v2181_v54 = vsel %vm2180_vm11, %v2174_v9, 0.0  ;;  %v2197_v61 = vsel %vm2180_vm11, %v2176_v6, 0.0  ;;  %v2175_v53 = vadd.f32 %v2157_v0, %v2145_v5  ;;  %v2177_v56 = vadd.f32 %v2165_v12, %v2147_v28 }
 0x6e9   : > { %v2182_v7 = vadd.f32 %v2181_v54, %v2170_v30  ;;  %v2198_v37 = vadd.f32 %v2197_v61, %v2172_v52 }
 0x6ea   : > { %v2189_v50 = vsel %vm2180_vm11, %v2175_v53, 0.0  ;;  %v2205_v29 = vsel %vm2180_vm11, %v2177_v56, 0.0 }
 0x6eb   : > { %v2183_v1 = vrot.slane %v2182_v7, 4  ;;  %v2199_v10 = vrot.slane %v2198_v37, 4  ;;  %v2190_v11 = vadd.f32 %v2189_v50, %v2171_v57  ;;  %v2206_v4 = vadd.f32 %v2205_v29, %v2173_v8 }
 0x6ed   : > { %v2184_v55 = vadd.f32 %v2183_v1, %v2182_v7  ;;  %v2200_v58 = vadd.f32 %v2199_v10, %v2198_v37  ;;  %v2191_v59 = vrot.slane %v2190_v11, 4  ;;  %v2207_v60 = vrot.slane %v2206_v4, 4 }
 0x6ef   : > { %v2185_v3 = vrot.slane %v2184_v55, 2  ;;  %v2201_v18 = vrot.slane %v2200_v58, 2  ;;  %v2192_v5 = vadd.f32 %v2191_v59, %v2190_v11  ;;  %v2208_v28 = vadd.f32 %v2207_v60, %v2206_v4 }
 0x6f1   : > { %v2186_v0 = vadd.f32 %v2185_v3, %v2184_v55  ;;  %v2202_v12 = vadd.f32 %v2201_v18, %v2200_v58  ;;  %v2193_v27 = vrot.slane %v2192_v5, 2  ;;  %v2209_v61 = vrot.slane %v2208_v28, 2 }
 0x6f3   : > { %v2187_v25 = vrot.slane %v2186_v0, 1  ;;  %v2203_v54 = vrot.slane %v2202_v12, 1  ;;  %v2194_v48 = vadd.f32 %v2193_v27, %v2192_v5  ;;  %v2210_v46 = vadd.f32 %v2209_v61, %v2208_v28 }
 0x6f5   : > { %v2188_v44 = vadd.f32 %v2187_v25, %v2186_v0  ;;  %v2204_v43 = vadd.f32 %v2203_v54, %v2202_v12  ;;  %v2195_v50 = vrot.slane %v2194_v48, 1  ;;  %v2211_v29 = vrot.slane %v2210_v46, 1 }
 0x6f7   : > { %v2214_v7 = vmul.f32 0.11111111, %v2188_v44  ;;  %v2216_v37 = vmul.f32 0.11111111, %v2204_v43  ;;  %v2196_v1 = vadd.f32 %v2195_v50, %v2194_v48  ;;  %v2212_v10 = vadd.f32 %v2211_v29, %v2210_v46 }
 0x6f9   : > { %v5387_v49 = vsub.f32 %v2170_v30, %v2214_v7  ;;  %v5389_v11 = vsub.f32 %v2174_v9, %v2214_v7  ;;  %v5391_v4 = vsub.f32 %v2172_v52, %v2216_v37  ;;  %v5393_v55 = vsub.f32 %v2176_v6, %v2216_v37 }
 0x6fa   : > { %v2215_v58 = vmul.f32 0.11111111, %v2196_v1  ;;  %v2217_v59 = vmul.f32 0.11111111, %v2212_v10 }
 0x6fb   : > { %v2226_v60 = vmul.f32 %v5387_v49, %v5387_v49  ;;  %v2230_v3 = vmul.f32 %v5389_v11, %v5389_v11  ;;  %v2228_v43 = vmul.f32 %v5391_v4, %v5391_v4  ;;  %v2232_v44 = vmul.f32 %v5393_v55, %v5393_v55 }
 0x6fc   : > { %v5403_v9 = vsub.f32 %v2171_v57, %v2215_v58  ;;  %v5405_v46 = vsub.f32 %v2175_v53, %v2215_v58  ;;  %v5407_v48 = vsub.f32 %v2173_v8, %v2217_v59  ;;  %v5409_v6 = vsub.f32 %v2177_v56, %v2217_v59 }
 0x6fd   : > { %v2234_v30 = vsel %vm2180_vm11, %v2230_v3, 0.0  ;;  %v2250_v52 = vsel %vm2180_vm11, %v2232_v44, 0.0 }
 0x6fe   : > { %v2235_v18 = vadd.f32 %v2234_v30, %v2226_v60  ;;  %v2251_v5 = vadd.f32 %v2250_v52, %v2228_v43  ;;  %v2227_v28 = vmul.f32 %v5403_v9, %v5403_v9  ;;  %v2231_v0 = vmul.f32 %v5405_v46, %v5405_v46 }
 0x6ff   : > { %v2229_v53 = vmul.f32 %v5407_v48, %v5407_v48  ;;  %v2233_v57 = vmul.f32 %v5409_v6, %v5409_v6 }
 0x700   : > { %v2236_v56 = vrot.slane %v2235_v18, 4  ;;  %v2252_v8 = vrot.slane %v2251_v5, 4  ;;  %v2242_v12 = vsel %vm2180_vm11, %v2231_v0, 0.0 }
 0x701   : > { %v2243_v27 = vadd.f32 %v2242_v12, %v2227_v28  ;;  %v2258_v61 = vsel %vm2180_vm11, %v2233_v57, 0.0 }
 0x702   : > { %v2237_v25 = vadd.f32 %v2236_v56, %v2235_v18  ;;  %v2253_v54 = vadd.f32 %v2252_v8, %v2251_v5  ;;  %v2259_v50 = vadd.f32 %v2258_v61, %v2229_v53 }
 0x703   : > { %v2244_v29 = vrot.slane %v2243_v27, 4 }
 0x704   : > { %v2238_v7 = vrot.slane %v2237_v25, 2  ;;  %v2254_v37 = vrot.slane %v2253_v54, 2  ;;  %v2260_v1 = vrot.slane %v2259_v50, 4 }
 0x705   : > { %v2245_v10 = vadd.f32 %v2244_v29, %v2243_v27 }
 0x706   : > { %v2239_v58 = vadd.f32 %v2238_v7, %v2237_v25  ;;  %v2255_v59 = vadd.f32 %v2254_v37, %v2253_v54  ;;  %v2261_v60 = vadd.f32 %v2260_v1, %v2259_v50  ;;  %v2178_v7 = vld [vmem:[%s5800_s22] sm:$0xf] }
 0x707   : > { %v2246_v3 = vrot.slane %v2245_v10, 2  ;;  %v2179_v37 = vld [vmem:[%s5801_s23] sm:$0xf]  ;;  %v2290_v1 = vrot.slane %v2178_v7, %v5367_v26 }
 0x708   : > { %v2240_v43 = vrot.slane %v2239_v58, 1  ;;  %v2256_v44 = vrot.slane %v2255_v59, 1  ;;  %v2262_v30 = vrot.slane %v2261_v60, 2 }
 0x709   : > { %v2247_v52 = vadd.f32 %v2246_v3, %v2245_v10 }
 0x70a   : > { %v2241_v0 = vadd.f32 %v2240_v43, %v2239_v58  ;;  %v2257_v28 = vadd.f32 %v2256_v44, %v2255_v59  ;;  %v2263_v12 = vadd.f32 %v2262_v30, %v2261_v60  ;;  %v2298_v58 = vrot.slane %v2178_v7, %v5371_v31 }
 0x70b   : > { %v2248_v57 = vrot.slane %v2247_v52, 1  ;;  %v2294_v43 = vrot.slane %v2178_v7, %v5374_v32  ;;  %v2302_v44 = vrot.slane %v2178_v7, %v5377_v51  ;;  %v2319_v30 = vrot.slane %v2179_v37, %v5367_v26 }
 0x70c   : > { %v2266_v18 = vmul.f32 0.11111111, %v2241_v0  ;;  %v2268_v5 = vmul.f32 0.11111111, %v2257_v28  ;;  %v2264_v53 = vrot.slane %v2263_v12, 1  ;;  %v2323_v28 = vrot.slane %v2179_v37, %v5374_v32 }
 0x70d   : > { %v2249_v56 = vadd.f32 %v2248_v57, %v2247_v52  ;;  %v2327_v57 = vrot.slane %v2179_v37, %v5371_v31 }
 0x70e   : > { %v2270_v8 = vadd.f32 1e-05, %v2266_v18  ;;  %v2272_v27 = vadd.f32 1e-05, %v2268_v5  ;;  %v2265_v61 = vadd.f32 %v2264_v53, %v2263_v12 }
 0x70f   : > { %v2267_v25 = vmul.f32 0.11111111, %v2249_v56 }
 0x710   : > { %4800 = vrsqrt.f32 %v2270_v8  ;;  %v2269_v54 = vmul.f32 0.11111111, %v2265_v61 }
 0x711   : > { %4802 = vrsqrt.f32 %v2272_v27  ;;  %v2271_v50 = vadd.f32 1e-05, %v2267_v25  ;;  %v2331_v27 = vrot.slane %v2179_v37, %v5377_v51 }
 0x712   : > { %v2273_v29 = vadd.f32 1e-05, %v2269_v54 }
 0x713   : > { %4804 = vrsqrt.f32 %v2271_v50 }
 0x714   : > { %4806 = vrsqrt.f32 %v2273_v29 }
 0x71d   : > { %v4801_v10 = vpop.eup %4800 }
 0x71e   : > { %v4803_v59 = vpop.eup %4802  ;;  %v2278_v60 = vmul.f32 %v4801_v10, %v5387_v49  ;;  %v2282_v0 = vmul.f32 %v4801_v10, %v5389_v11 }
 0x71f   : > { %v2280_v3 = vmul.f32 %v4803_v59, %v5391_v4  ;;  %v2284_v5 = vmul.f32 %v4803_v59, %v5393_v55 }
 0x720   : > { %v4805_v52 = vpop.eup %4804  ;;  %v2307_v12 = vmul.f32 %v2290_v1, %v2278_v60  ;;  %v2311_v29 = vmul.f32 %v2290_v1, %v2282_v0 }
 0x721   : > { %v4807_v18 = vpop.eup %4806  ;;  %v2283_v49 = vmul.f32 %v4805_v52, %v5405_v46  ;;  %v2279_v4 = vmul.f32 %v4805_v52, %v5403_v9  ;;  %v2309_v53 = vmul.f32 %v2298_v58, %v2280_v3  ;;  %v2313_v55 = vmul.f32 %v2298_v58, %v2284_v5 }
 0x722   : > { %v2285_v56 = vmul.f32 %v4807_v18, %v5409_v6  ;;  %v2281_v8 = vmul.f32 %v4807_v18, %v5407_v48  ;;  %v2336_v54 = vadd.f32 %v2319_v30, %v2307_v12  ;;  %v2340_v6 = vadd.f32 %v2319_v30, %v2311_v29 }
 0x723   : > { %v2308_v11 = vmul.f32 %v2294_v43, %v2279_v4  ;;  %v2312_v61 = vmul.f32 %v2294_v43, %v2283_v49  ;;  %v2338_v10 = vadd.f32 %v2327_v57, %v2309_v53  ;;  %v2342_v18 = vadd.f32 %v2327_v57, %v2313_v55 }
 0x724   : > { %v2310_v25 = vmul.f32 %v2302_v44, %v2281_v8  ;;  %v2314_v50 = vmul.f32 %v2302_v44, %v2285_v56  ;;  %v2344_v52 = vmax.f32 %v2336_v54, 0.0  ;;  %v2348_v58 = vmax.f32 %v2340_v6, 0.0 }
 0x725   : > { %v2337_v7 = vadd.f32 %v2323_v28, %v2308_v11  ;;  %v2341_v46 = vadd.f32 %v2323_v28, %v2312_v61  ;;  %v2346_v48 = vmax.f32 %v2338_v10, 0.0  ;;  %v2350_v43 = vmax.f32 %v2342_v18, 0.0 }
 0x726   : > { %v2339_v59 = vadd.f32 %v2331_v27, %v2310_v25  ;;  %v2343_v9 = vadd.f32 %v2331_v27, %v2314_v50 }
 0x727   : > { %v2345_v60 = vmax.f32 %v2337_v7, 0.0  ;;  %v2349_v37 = vmax.f32 %v2341_v46, 0.0 }
 0x728   : > { %v2347_v3 = vmax.f32 %v2339_v59, 0.0  ;;  %v2351_v1 = vmax.f32 %v2343_v9, 0.0 }
 0x729   : > { %2487 = vmatprep.mubr.f32.mxu0 %v2345_v60 }
 0x72a   : > { %2562 = vmatprep.mubr.f32.mxu1 %v2347_v3  ;;  %2488 = vmatmul.mubr.f32.vlgmr.msra.gmra.mxu0 %v2344_v52 }
 0x72b   : > { %2563 = vmatmul.mubr.f32.vlgmr.msra.gmra.mxu1 %v2346_v48  ;;  %4669 = vmatpush3.msk.msra.mxu0 %vm1363_vm9, %v5360_v63 }
 0x72c   : > { %4674 = vmatpush3.msk.msra.mxu1 %vm1363_vm9, %v5360_v63  ;;  %2492 = vmatprep.mubr.f32.mxu0 %v2349_v37 }
 0x72d   : > { %2567 = vmatprep.mubr.f32.mxu1 %v2351_v1  ;;  %4683 = vmatprep.subr.msk.mxu1 %vm1363_vm9, %v5126_v62 }
 0x72e   : > { %2493 = vmatmul.mubr.f32.gmra.mxu0 %v2348_v58  ;;  %v5510_v58 = vld [vmem:[%s5025_s30] ss:$0 sm:$0xff] }
 0x72f   : > { %2568 = vmatmul.mubr.f32.gmra.mxu1 %v2350_v43  ;;  %4670 = vmatprep.mubr.msk.f32.mxu0 %vm1356_vm13, %v5134_v2 }
 0x730   : > { %4675 = vmatprep.mubr.msk.f32.mxu1 %vm1356_vm13, %v5101_v35  ;;  %v5803_v35 = vmov 0.0  }
 0x732   : > { %4671 = vmatmul.mubr.msk.f32.vlgmr.msra.gmra.mxu0 %vm1356_vm13, %v5155_v13 }
 0x733   : > { %4676 = vmatmul.mubr.msk.f32.vlgmr.msra.gmra.mxu1 %vm1356_vm13, %v5106_v36  ;;  %v2807_v36 = vld [vmem:[%s4980_s6] sm:$0x3] }
 0x734   : > { %4684 = vmatpush3.msk.msra.mxu1 %vm1363_vm9, %v5126_v62  ;;  %4685 = vmatprep.mubr.msk.f32.mxu1 %vm1356_vm13, %v5134_v2  ;;  %vm2575_vm9 = vcmask 523264  }
 0x735   : > { %3110 = vmatprep.subr.mxu1 %v5166_v14  ;;  %4678 = vmatprep.subr.msk.mxu0 %vm1640_vm5, %v2807_v36 }
 0x736   : > { %4679 = vmatpush3.msk.msra.mxu0 %vm1640_vm5, %v2807_v36 }
 0x737   : > { %4686 = vmatmul.mubr.msk.f32.vlgmr.msra.gmra.mxu1 %vm1356_vm13, %v5155_v13  ;;  %3033 = vmatprep.subr.mxu0 %v5202_v21  ;;  %v5476_v13 = vld [vmem:[%s5802_s26] ss:$0 sm:$0xff]  ;;  %vm2623_vm13 = vcmask 518144   ;;  %s5819_s26 = sld [smem:[#allocation14_spill]] }
 0x738   : > { %3111 = vmatpush1.msra.mxu1 %v5179_v15  ;;  %3150 = vmatprep.mubr.f32.mxu1 %v5803_v35 }
 0x739   : > { %3112 = vmatprep.subr.mxu1 %v5183_v16 }
 0x73a   : > { %3113 = vmatpush1.msra.mxu1 %v5187_v17 }
 0x73b   : > { %3114 = vmatprep.subr.mxu1 %v5192_v19 }
 0x73c   : > { %3115 = vmatpush1.msra.mxu1 %v5197_v20 }
 0x73d   : > { %3116 = vmatprep.subr.mxu1 %v5205_v22 }
 0x73e   : > { %3117 = vmatpush1.msra.mxu1 %v5210_v23 }
 0x73f   : > { %3274 = vmatprep.subr.mxu1 %v5214_v24 }
 0x7ea   : > { %v4452_v62 = vpop.f32.mrf.mxu0 }
 0x7eb   : > { %v4490_v2 = vpop.f32.mrf.mxu1 }
 0x7ec   : > { %v4453_v14 = vpop.f32.mrf.mxu0 }
 0x7ed   : > { %v4454_v15 = vadd.f32 %v4453_v14, %v4452_v62  ;;  %v4491_v16 = vpop.f32.mrf.mxu1  ;;  %v5513_v62 = vld [vmem:[%s5030_s24] ss:$0 sm:$0xff] }
 0x7ee   : > { %v4455_v17 = vpop.f32.mrf.mxu0  ;;  %v4492_v23 = vadd.f32 %v4491_v16, %v4490_v2 }
 0x7ef   : > { %v2490_v19 = vadd.f32 %v4454_v15, %v5476_v13  ;;  %v4493_v20 = vpop.f32.mrf.mxu1 }
 0x7f0   : > { %v4456_v22 = vpop.f32.mrf.mxu0 }
 0x7f1   : > { %v4457_v24 = vadd.f32 %v4456_v22, %v4455_v17  ;;  %v4494_v63 = vpop.f32.mrf.mxu1  ;;  %v2565_v30 = vadd.f32 %v4492_v23, %v2490_v19 }
 0x7f2   : > { %v4672_v44 = vpop.f32.mrf.mxu0  ;;  %v4495_v21 = vadd.f32 %v4494_v63, %v4493_v20 }
 0x7f3   : > { %v2495_v0 = vadd.f32 %v4457_v24, %v5476_v13  ;;  %v4677_v28 = vpop.f32.mrf.mxu1  ;;  %v2576_v4 = vsel %vm2575_vm9, %v2565_v30, 0.0 }
 0x7f4   : > { %v2721_v12 = vpop.f32.mrf.mxu0  ;;  %v2806_v56 = vsub.f32 %v4672_v44, %v4677_v28 }
 0x7f5   : > { %v2570_v57 = vadd.f32 %v4495_v21, %v2495_v0  ;;  %v2796_v5 = vpop.f32.mrf.mxu1 }
 0x7f6   : > { %v2805_v49 = vsub.f32 %v2721_v12, %v2796_v5 }
 0x7f7   : > { %v2578_v53 = vsel %vm2577_vm12, %v2570_v57, 0.0  ;;  %v4687_v8 = vpop.f32.mrf.mxu1 }
 0x7f8   : > { %v2579_v27 = vadd.f32 %v2578_v53, %v2576_v4  ;;  %4680 = vmatprep.mubr.msk.f32.mxu0 %vm1633_vm10, %v2805_v49 }
 0x7f9   : > { %4681 = vmatmul.mubr.msk.f32.vlgmr.msra.gmra.mxu0 %vm1633_vm10, %v2806_v56  ;;  %v2970_v11 = vpop.f32.mrf.mxu1 }
 0x7fa   : > { %v2580_v61 = vrot.slane %v2579_v27, 4  ;;  %3034 = vmatpush1.msra.mxu0 %v5218_v33  ;;  %4366 = vmatmul.mubr.msk.f32.vlgmr.msra.gmra.mxu1 %vm1059_vm8, %v2970_v11 }
 0x7fb   : > { %3035 = vmatprep.subr.mxu0 %v5222_v34  ;;  %3156 = vmatprep.mubr.f32.mxu1 %v5803_v35  ;;  %v5804_v34 = vld [vmem:[#allocation28_spill] sm:$0xff] }
 0x7fc   : > { %v2581_v25 = vadd.f32 %v2580_v61, %v2579_v27  ;;  %3036 = vmatpush1.msra.mxu0 %v5226_v38  ;;  %3073 = vmatprep.mubr.f32.mxu0 %v5803_v35  ;;  %v5805_v38 = vld [vmem:[#allocation24_spill] sm:$0xff] }
 0x7fd   : > { %3037 = vmatprep.subr.mxu0 %v5231_v39  ;;  %3275 = vmatpush1.msra.mxu1 %v5264_v45  ;;  %v5806_v45 = vld [vmem:[#allocation25_spill] sm:$0xff] }
 0x7fe   : > { %v2582_v54 = vrot.slane %v2581_v25, 2  ;;  %3038 = vmatpush1.msra.mxu0 %v5235_v40  ;;  %4367 = vmatmul.mubr.msk.f32.gmra.mxu1 %vm1059_vm8, %v4687_v8  ;;  %v5807_v40 = vld [vmem:[#allocation26_spill] sm:$0xff] }
 0x7ff   : > { %3039 = vmatprep.subr.mxu0 %v5240_v41  ;;  %3276 = vmatprep.subr.mxu1 %v5272_v47  ;;  %v5808_v47 = vld [vmem:[#allocation27_spill] sm:$0xff] }
 0x800   : > { %v2583_v33 = vadd.f32 %v2582_v54, %v2581_v25  ;;  %3040 = vmatpush1.msra.mxu0 %v5245_v42  ;;  %3277 = vmatpush1.msra.mxu1 %v5804_v34 }
 0x801   : > { %4364 = vmatmul.mubr.msk.f32.vlgmr.msra.gmra.mxu0 %vm1059_vm8, %v2970_v11  ;;  %3197 = vmatprep.subr.mxu0 %v5805_v38 }
 0x802   : > { %v2584_v39 = vrot.slane %v2583_v33, 1  ;;  %3079 = vmatprep.mubr.f32.mxu0 %v5803_v35  ;;  %3198 = vmatpush1.msra.mxu0 %v5806_v45  ;;  %v5809_v45 = vld [vmem:[#allocation29_spill] sm:$0xff] }
 0x803   : > { %3199 = vmatprep.subr.mxu0 %v5807_v40  ;;  %3310 = vmatprep.mubr.f32.mxu1 %v5803_v35 }
 0x804   : > { %v2585_v41 = vadd.f32 %v2584_v39, %v2583_v33  ;;  %3200 = vmatpush1.msra.mxu0 %v5808_v47  ;;  %v3564_v47 = vld [vmem:[%s5792_s15 + $0xf8] sm:$0xff] }
 0x805   : > { %4365 = vmatmul.mubr.msk.f32.gmra.mxu0 %vm1059_vm8, %v4687_v8  ;;  %4508 = vmatprep.subr.mxu0 %v3564_v47  ;;  %v3550_v47 = vld [vmem:[%s5792_s15 + $0x88] sm:$0xff] }
 0x806   : > { %v2586_v42 = vmul.f32 0.11111111, %v2585_v41  ;;  %3233 = vmatprep.mubr.f32.mxu0 %v5803_v35 }
 0x808   : > { %v2587_v50 = vsub.f32 %v2565_v30, %v2586_v42  ;;  %v2588_v29 = vsub.f32 %v2570_v57, %v2586_v42  ;;  %v3596_v42 = vld [vmem:[%s5792_s15 + $0x1f8] sm:$0xff] }
 0x809   : > { %4546 = vmatprep.subr.mxu1 %v3596_v42  ;;  %v3582_v42 = vld [vmem:[%s5792_s15 + $0x188] sm:$0xff] }
 0x80a   : > { %v2589_v7 = vmul.f32 %v2587_v50, %v2587_v50  ;;  %v2590_v10 = vmul.f32 %v2588_v29, %v2588_v29 }
 0x80c   : > { %v2591_v55 = vsel %vm2575_vm9, %v2589_v7, 0.0  ;;  %v2592_v59 = vsel %vm2577_vm12, %v2590_v10, 0.0  ;;  %v3563_v7 = vld [vmem:[%s5792_s15 + $0xf0] sm:$0xff] }
 0x80d   : > { %v2593_v46 = vadd.f32 %v2592_v59, %v2591_v55  ;;  %v3595_v10 = vld [vmem:[%s5792_s15 + $0x1f0] sm:$0xff] }
 0x80e   : > { %v3547_v55 = vld [vmem:[%s5792_s15 + $0x70] sm:$0xff] }
 0x80f   : > { %v2594_v60 = vrot.slane %v2593_v46, 4  ;;  %v3579_v59 = vld [vmem:[%s5792_s15 + $0x170] sm:$0xff] }
 0x811   : > { %v2595_v9 = vadd.f32 %v2594_v60, %v2593_v46  ;;  %v3562_v46 = vld [vmem:[%s5792_s15 + $0xe8] sm:$0xff] }
 0x812   : > { %v3594_v60 = vld [vmem:[%s5792_s15 + $0x1e8] sm:$0xff] }
 0x813   : > { %v2596_v3 = vrot.slane %v2595_v9, 2 }
 0x815   : > { %v2597_v52 = vadd.f32 %v2596_v3, %v2595_v9  ;;  %v3546_v9 = vld [vmem:[%s5792_s15 + $0x68] sm:$0xff] }
 0x816   : > { %v3578_v3 = vld [vmem:[%s5792_s15 + $0x168] sm:$0xff] }
 0x817   : > { %v2598_v6 = vrot.slane %v2597_v52, 1 }
 0x819   : > { %v2599_v48 = vadd.f32 %v2598_v6, %v2597_v52  ;;  %v3561_v52 = vld [vmem:[%s5792_s15 + $0xe0] sm:$0xff] }
 0x81a   : > { %v3593_v6 = vld [vmem:[%s5792_s15 + $0x1e0] sm:$0xff] }
 0x81b   : > { %v2600_v18 = vmul.f32 0.11111111, %v2599_v48  ;;  %v3545_v48 = vld [vmem:[%s5792_s15 + $0x60] sm:$0xff] }
 0x81d   : > { %v2601_v37 = vadd.f32 1e-05, %v2600_v18  ;;  %v3577_v18 = vld [vmem:[%s5792_s15 + $0x160] sm:$0xff] }
 0x81f   : > { %4808 = vrsqrt.f32 %v2601_v37  ;;  %v3560_v37 = vld [vmem:[%s5792_s15 + $0xd8] sm:$0xff] }
 0x82c   : > { %v4809_v1 = vpop.eup %4808 }
 0x82d   : > { %v2603_v43 = vmul.f32 %v4809_v1, %v2587_v50  ;;  %v2604_v36 = vmul.f32 %v4809_v1, %v2588_v29  ;;  %v3548_v50 = vld [vmem:[%s5792_s15 + $0x78] sm:$0xff] }
 0x82e   : > { %v3580_v29 = vld [vmem:[%s5792_s15 + $0x178] sm:$0xff] }
 0x82f   : > { %v2611_v2 = vmul.f32 %v5510_v58, %v2603_v43  ;;  %v2612_v14 = vmul.f32 %v5510_v58, %v2604_v36  ;;  %v3592_v1 = vld [vmem:[%s5792_s15 + $0x1d8] sm:$0xff] }
 0x830   : > { %v3544_v43 = vld [vmem:[%s5792_s15 + $0x58] sm:$0xff] }
 0x831   : > { %v2619_v15 = vadd.f32 %v5513_v62, %v2611_v2  ;;  %v2620_v16 = vadd.f32 %v5513_v62, %v2612_v14  ;;  %v3576_v36 = vld [vmem:[%s5792_s15 + $0x158] sm:$0xff]  ;;  %v3559_v2 = vld [vmem:[%s5792_s15 + $0xd0] sm:$0xff] }
 0x832   : > { %v3591_v14 = vld [vmem:[%s5792_s15 + $0x1d0] sm:$0xff] }
 0x833   : > { %v2621_v17 = vmax.f32 %v2619_v15, 0.0  ;;  %v2622_v19 = vmax.f32 %v2620_v16, 0.0  ;;  %v3543_v15 = vld [vmem:[%s5792_s15 + $0x50] sm:$0xff] }
 0x834   : > { %v3575_v16 = vld [vmem:[%s5792_s15 + $0x150] sm:$0xff] }
 0x835   : > { %v2624_v20 = vsel %vm2623_vm13, %v2621_v17, -inf  ;;  %v2632_v22 = vsel %vm2631_vm14, %v2621_v17, -inf  ;;  %v2640_v23 = vsel %vm2639_vm15, %v2621_v17, -inf  ;;  %v2641_v24 = vsel %vm2577_vm12, %v2622_v19, -inf  ;;  %v3558_v17 = vld [vmem:[%s5792_s15 + $0xc8] sm:$0xff] }
 0x836   : > { %v2625_v63 = vrot.slane %v2624_v20, 4  ;;  %v2633_v44 = vrot.slane %v2632_v22, 4  ;;  %v2642_v30 = vmax.f32 %v2640_v23, %v2641_v24  ;;  %v3590_v19 = vld [vmem:[%s5792_s15 + $0x1c8] sm:$0xff]  ;;  %v3557_v23 = vld [vmem:[%s5792_s15 + $0xc0] sm:$0xff] }
 0x837   : > { %v3589_v24 = vld [vmem:[%s5792_s15 + $0x1c0] sm:$0xff] }
 0x838   : > { %v2626_v0 = vmax.f32 %v2624_v20, %v2625_v63  ;;  %v2634_v21 = vmax.f32 %v2632_v22, %v2633_v44  ;;  %v2643_v28 = vrot.slane %v2642_v30, 4  ;;  %v3542_v20 = vld [vmem:[%s5792_s15 + $0x48] sm:$0xff]  ;;  %v3541_v63 = vld [vmem:[%s5792_s15 + $0x40] sm:$0xff] }
 0x839   : > { %v3574_v22 = vld [vmem:[%s5792_s15 + $0x148] sm:$0xff]  ;;  %v3573_v44 = vld [vmem:[%s5792_s15 + $0x140] sm:$0xff] }
 0x83a   : > { %v2627_v12 = vrot.slane %v2626_v0, 2  ;;  %v2635_v57 = vrot.slane %v2634_v21, 2  ;;  %v2644_v5 = vmax.f32 %v2642_v30, %v2643_v28  ;;  %v3556_v30 = vld [vmem:[%s5792_s15 + $0xb8] sm:$0xff] }
 0x83b   : > { %v3572_v28 = vld [vmem:[%s5792_s15 + $0x138] sm:$0xff] }
 0x83c   : > { %v2628_v49 = vmax.f32 %v2626_v0, %v2627_v12  ;;  %v2636_v4 = vmax.f32 %v2634_v21, %v2635_v57  ;;  %v2645_v53 = vrot.slane %v2644_v5, 2  ;;  %v3588_v0 = vld [vmem:[%s5792_s15 + $0x1b8] sm:$0xff]  ;;  %v3555_v12 = vld [vmem:[%s5792_s15 + $0xb0] sm:$0xff] }
 0x83d   : > { %v3540_v21 = vld [vmem:[%s5792_s15 + $0x38] sm:$0xff]  ;;  %v3587_v57 = vld [vmem:[%s5792_s15 + $0x1b0] sm:$0xff] }
 0x83e   : > { %v2629_v56 = vrot.slane %v2628_v49, 1  ;;  %v2637_v8 = vrot.slane %v2636_v4, 1  ;;  %v2646_v27 = vmax.f32 %v2644_v5, %v2645_v53  ;;  %v3539_v5 = vld [vmem:[%s5792_s15 + $0x30] sm:$0xff]  ;;  %v3586_v53 = vld [vmem:[%s5792_s15 + $0x1a8] sm:$0xff] }
 0x840   : > { %v2630_v11 = vmax.f32 %v2628_v49, %v2629_v56  ;;  %v2638_v61 = vmax.f32 %v2636_v4, %v2637_v8  ;;  %v2647_v25 = vrot.slane %v2646_v27, 1  ;;  %v3571_v49 = vld [vmem:[%s5792_s15 + $0x130] sm:$0xff]  ;;  %v3554_v4 = vld [vmem:[%s5792_s15 + $0xa8] sm:$0xff] }
 0x841   : > { %v3538_v56 = vld [vmem:[%s5792_s15 + $0x28] sm:$0xff] }
 0x842   : > { %v2648_v54 = vmax.f32 %v2646_v27, %v2647_v25  ;;  %v2649_v33 = vsel %vm2180_vm11, %v2630_v11, %v2638_v61  ;;  %v3570_v8 = vld [vmem:[%s5792_s15 + $0x128] sm:$0xff]  ;;  %v3553_v27 = vld [vmem:[%s5792_s15 + $0xa0] sm:$0xff] }
 0x843   : > { %v3585_v11 = vld [vmem:[%s5792_s15 + $0x1a0] sm:$0xff] }
 0x844   : > { %v2650_v34 = vsel %vm1640_vm5, %v2649_v33, %v2648_v54  ;;  %v3537_v61 = vld [vmem:[%s5792_s15 + $0x20] sm:$0xff]  ;;  %v3552_v54 = vld [vmem:[%s5792_s15 + $0x98] sm:$0xff] }
 0x845   : > { %2651 = vst.msk [vmem:[#allocation6] sm:$0x7] %vm2623_vm13, %v2650_v34  ;;  %v3569_v25 = vld [vmem:[%s5792_s15 + $0x120] sm:$0xff]  ;;  %v3584_v33 = vld [vmem:[%s5792_s15 + $0x198] sm:$0xff] }
 0x846   : > { %v3536_v34 = vld [vmem:[%s5792_s15 + $0x18] sm:$0xff] }
 0x8b9   : > { %v4682_v38 = vpop.f32.mrf.mxu0 }
 0x8ba   : > { %v2896_v41 = vadd.f32 %v4682_v38, %v5809_v45  ;;  %v3568_v38 = vld [vmem:[%s5792_s15 + $0x118] sm:$0xff] }
 0x8bb   : > { %v2890_v39 = vpop.f32.mrf.mxu0 }
 0x8bc   : > { %v2891_v40 = vadd.f32 %v5809_v45, %v2890_v39  ;;  %v3551_v39 = vld [vmem:[%s5792_s15 + $0x90] sm:$0xff] }
 0x8bd   : > { %v3583_v45 = vld [vmem:[%s5792_s15 + $0x190] sm:$0xff] }
 0x8be   : > { %4368 = vmatmul.mubr.msk.f32.vlgmr.msra.gmra.mxu0 %vm1133_vm6, %v2891_v40  ;;  %4370 = vmatmul.mubr.msk.f32.vlgmr.msra.gmra.mxu1 %vm1133_vm6, %v2891_v40  ;;  %v3535_v40 = vld [vmem:[%s5792_s15 + $0x10] sm:$0xff] }
 0x8bf   : > { %3239 = vmatprep.mubr.f32.mxu0 %v5803_v35  ;;  %3316 = vmatprep.mubr.f32.mxu1 %v5803_v35 }
 0x8c0   : > { %4509 = vmatpush3.msra.mxu0 %v3548_v50  ;;  %4547 = vmatpush3.msra.mxu1 %v3580_v29  ;;  %v3534_v50 = vld [vmem:[%s5792_s15 + $0x8] sm:$0xff] }
 0x8c1   : > { %4510 = vmatprep.subr.mxu0 %v3563_v7  ;;  %4548 = vmatprep.subr.mxu1 %v3595_v10  ;;  %v3566_v29 = vld [vmem:[%s5792_s15 + $0x108] sm:$0xff]  ;;  %v3549_v7 = vld [vmem:[%s5792_s15 + $0x80] sm:$0xff] }
 0x8c2   : > { %4369 = vmatmul.mubr.msk.f32.gmra.mxu0 %vm1133_vm6, %v2896_v41  ;;  %4371 = vmatmul.mubr.msk.f32.gmra.mxu1 %vm1133_vm6, %v2896_v41  ;;  %v3567_v41 = vld [vmem:[%s5792_s15 + $0x110] sm:$0xff]  ;;  %v3581_v10 = vld [vmem:[%s5792_s15 + $0x180] sm:$0xff]  ;;  %vm3994_vm6 = vcmask 521216  }
 0x8c3   : > { %4511 = vmatpush3.msra.mxu0 %v3547_v55  ;;  %4549 = vmatpush3.msra.mxu1 %v3579_v59  ;;  %v3533_v55 = vld [vmem:[%s5792_s15] sm:$0xff] }
 0x8c4   : > { %4512 = vmatprep.subr.mxu0 %v3562_v46  ;;  %4550 = vmatprep.subr.mxu1 %v3594_v60  ;;  %v3565_v59 = vld [vmem:[%s5792_s15 + $0x100] sm:$0xff]  ;;  %v3152_v46 = vpop.f32.mrf.mxu1  ;;  %v3075_v60 = vpop.f32.mrf.mxu0 }
 0x8c5   : > { %4513 = vmatpush3.msra.mxu0 %v3546_v9  ;;  %4551 = vmatpush3.msra.mxu1 %v3578_v3 }
 0x8c6   : > { %4514 = vmatprep.subr.mxu0 %v3561_v52  ;;  %4552 = vmatprep.subr.mxu1 %v3593_v6  ;;  %v3154_v9 = vpop.f32.mrf.mxu1  ;;  %v3077_v3 = vpop.f32.mrf.mxu0 }
 0x8c7   : > { %4515 = vmatpush3.msra.mxu0 %v3545_v48  ;;  %4553 = vmatpush3.msra.mxu1 %v3577_v18 }
 0x8c8   : > { %4516 = vmatprep.subr.mxu0 %v3560_v37  ;;  %4554 = vmatprep.subr.mxu1 %v3592_v1  ;;  %v3158_v52 = vpop.f32.mrf.mxu1  ;;  %v3081_v6 = vpop.f32.mrf.mxu0 }
 0x8c9   : > { %4517 = vmatpush3.msra.mxu0 %v3544_v43  ;;  %4555 = vmatpush3.msra.mxu1 %v3576_v36  ;;  %v3331_v36 = vld [vmem:[%s5799_s18] sm:$0xf] }
 0x8ca   : > { %4518 = vmatprep.subr.mxu0 %v3559_v2  ;;  %4556 = vmatprep.subr.mxu1 %v3591_v14  ;;  %v3160_v48 = vpop.f32.mrf.mxu1  ;;  %v3083_v18 = vpop.f32.mrf.mxu0 }
 0x8cb   : > { %4519 = vmatpush3.msra.mxu0 %v3543_v15  ;;  %4557 = vmatpush3.msra.mxu1 %v3575_v16 }
 0x8cc   : > { %4520 = vmatprep.subr.mxu0 %v3558_v17  ;;  %4558 = vmatprep.subr.mxu1 %v3590_v19 }
 0x8cd   : > { %4521 = vmatpush3.msra.mxu0 %v3542_v20  ;;  %4559 = vmatpush3.msra.mxu1 %v3574_v22  ;;  %v3336_v22 = vrot.slane %v3331_v36, %v5367_v26 }
 0x8ce   : > { %4522 = vmatprep.subr.mxu0 %v3557_v23  ;;  %4560 = vmatprep.subr.mxu1 %v3589_v24  ;;  %v3344_v23 = vrot.slane %v3331_v36, %v5371_v31 }
 0x8cf   : > { %4523 = vmatpush3.msra.mxu0 %v3541_v63  ;;  %4561 = vmatpush3.msra.mxu1 %v3573_v44  ;;  %v3340_v63 = vrot.slane %v3331_v36, %v5374_v32 }
 0x8d0   : > { %4524 = vmatprep.subr.mxu0 %v3556_v30  ;;  %4562 = vmatprep.subr.mxu1 %v3588_v0 }
 0x8d1   : > { %4525 = vmatpush3.msra.mxu0 %v3540_v21  ;;  %4563 = vmatpush3.msra.mxu1 %v3572_v28 }
 0x8d2   : > { %4526 = vmatprep.subr.mxu0 %v3555_v12  ;;  %4564 = vmatprep.subr.mxu1 %v3587_v57 }
 0x8d3   : > { %4527 = vmatpush3.msra.mxu0 %v3539_v5  ;;  %4565 = vmatpush3.msra.mxu1 %v3571_v49 }
 0x8d4   : > { %4528 = vmatprep.subr.mxu0 %v3554_v4  ;;  %4566 = vmatprep.subr.mxu1 %v3586_v53  ;;  %v3348_v4 = vrot.slane %v3331_v36, %v5377_v51 }
 0x8d5   : > { %4529 = vmatpush3.msra.mxu0 %v3538_v56  ;;  %4567 = vmatpush3.msra.mxu1 %v3570_v8 }
 0x8d6   : > { %4530 = vmatprep.subr.mxu0 %v3553_v27  ;;  %4568 = vmatprep.subr.mxu1 %v3585_v11 }
 0x8d7   : > { %4531 = vmatpush3.msra.mxu0 %v3537_v61  ;;  %4569 = vmatpush3.msra.mxu1 %v3569_v25 }
 0x8d8   : > { %4532 = vmatprep.subr.mxu0 %v3552_v54  ;;  %4570 = vmatprep.subr.mxu1 %v3584_v33 }
 0x8d9   : > { %4533 = vmatpush3.msra.mxu0 %v3536_v34  ;;  %4571 = vmatpush3.msra.mxu1 %v3568_v38 }
 0x8da   : > { %4534 = vmatprep.subr.mxu0 %v3551_v39  ;;  %4572 = vmatprep.subr.mxu1 %v3583_v45 }
 0x8db   : > { %4535 = vmatpush3.msra.mxu0 %v3535_v40  ;;  %4573 = vmatpush3.msra.mxu1 %v3567_v41 }
 0x8dc   : > { %4536 = vmatprep.subr.mxu0 %v3550_v47  ;;  %4574 = vmatprep.subr.mxu1 %v3582_v42 }
 0x8dd   : > { %4537 = vmatpush3.msra.mxu0 %v3534_v50  ;;  %4575 = vmatpush3.msra.mxu1 %v3566_v29 }
 0x8de   : > { %4538 = vmatprep.subr.mxu0 %v3549_v7  ;;  %4576 = vmatprep.subr.mxu1 %v3581_v10 }
 0x8df   : > { %4539 = vmatpush3.msra.mxu0 %v3533_v55  ;;  %4577 = vmatpush3.msra.mxu1 %v3565_v59 }
 0x8e0   : > { %4707 = vmatprep.subr.mxu1 %v5803_v35  ;;  %4688 = vmatprep.subr.mxu0 %v5803_v35 }
 0x97e   : > { %v3235_v37 = vpop.f32.mrf.mxu0  ;;  %v3312_v1 = vpop.f32.mrf.mxu1 }
 0x97f   : > { %v3236_v43 = vadd.f32 %v3235_v37, %v3075_v60  ;;  %v3313_v15 = vadd.f32 %v3312_v1, %v3152_v46 }
 0x980   : > { %v3237_v2 = vpop.f32.mrf.mxu0  ;;  %v3314_v14 = vpop.f32.mrf.mxu1 }
 0x981   : > { %v3238_v16 = vadd.f32 %v3237_v2, %v3077_v3  ;;  %v3315_v17 = vadd.f32 %v3314_v14, %v3154_v9  ;;  %v3323_v24 = vmul.f32 0.05, %v3236_v43  ;;  %v3325_v28 = vmul.f32 0.05, %v3313_v15 }
 0x982   : > { %v3241_v19 = vpop.f32.mrf.mxu0  ;;  %v3318_v20 = vpop.f32.mrf.mxu1 }
 0x983   : > { %v3242_v44 = vadd.f32 %v3241_v19, %v3081_v6  ;;  %v3319_v30 = vadd.f32 %v3318_v20, %v3158_v52  ;;  %v3324_v12 = vmul.f32 0.05, %v3238_v16  ;;  %v3326_v49 = vmul.f32 0.05, %v3315_v17 }
 0x984   : > { %v3243_v0 = vpop.f32.mrf.mxu0  ;;  %v3320_v21 = vpop.f32.mrf.mxu1  ;;  %v3353_v25 = vadd.f32 %v3336_v22, %v3323_v24  ;;  %v3355_v54 = vadd.f32 %v3344_v23, %v3325_v28 }
 0x985   : > { %v3244_v57 = vadd.f32 %v3243_v0, %v3083_v18  ;;  %v3321_v5 = vadd.f32 %v3320_v21, %v3160_v48  ;;  %v3327_v53 = vmul.f32 0.05, %v3242_v44  ;;  %v3329_v56 = vmul.f32 0.05, %v3319_v30 }
 0x986   : > { %v3354_v38 = vadd.f32 %v3340_v63, %v3324_v12  ;;  %v3356_v39 = vadd.f32 %v3348_v4, %v3326_v49 }
 0x987   : > { %v3328_v8 = vmul.f32 0.05, %v3244_v57  ;;  %v3330_v27 = vmul.f32 0.05, %v3321_v5  ;;  %v3357_v11 = vadd.f32 %v3336_v22, %v3327_v53  ;;  %v3359_v61 = vadd.f32 %v3344_v23, %v3329_v56 }
 0x989   : > { %v3358_v33 = vadd.f32 %v3340_v63, %v3328_v8  ;;  %v3360_v34 = vadd.f32 %v3348_v4, %v3330_v27  ;;  %v3363_v45 = vsel %vm2180_vm11, %v3357_v11, 0.0  ;;  %v3379_v40 = vsel %vm2180_vm11, %v3359_v61, 0.0 }
 0x98a   : > { %v3364_v41 = vadd.f32 %v3363_v45, %v3353_v25  ;;  %v3380_v47 = vadd.f32 %v3379_v40, %v3355_v54 }
 0x98b   : > { %v3371_v42 = vsel %vm2180_vm11, %v3358_v33, 0.0  ;;  %v3387_v50 = vsel %vm2180_vm11, %v3360_v34, 0.0 }
 0x98c   : > { %v3372_v29 = vadd.f32 %v3371_v42, %v3354_v38  ;;  %v3388_v7 = vadd.f32 %v3387_v50, %v3356_v39  ;;  %v3365_v10 = vrot.slane %v3364_v41, 4  ;;  %v3381_v55 = vrot.slane %v3380_v47, 4 }
 0x98e   : > { %v3373_v59 = vrot.slane %v3372_v29, 4  ;;  %v3389_v46 = vrot.slane %v3388_v7, 4  ;;  %v3366_v60 = vadd.f32 %v3365_v10, %v3364_v41  ;;  %v3382_v9 = vadd.f32 %v3381_v55, %v3380_v47 }
 0x990   : > { %v3374_v3 = vadd.f32 %v3373_v59, %v3372_v29  ;;  %v3390_v52 = vadd.f32 %v3389_v46, %v3388_v7  ;;  %v3367_v6 = vrot.slane %v3366_v60, 2  ;;  %v3383_v48 = vrot.slane %v3382_v9, 2 }
 0x992   : > { %v3375_v18 = vrot.slane %v3374_v3, 2  ;;  %v3391_v37 = vrot.slane %v3390_v52, 2  ;;  %v3368_v1 = vadd.f32 %v3367_v6, %v3366_v60  ;;  %v3384_v43 = vadd.f32 %v3383_v48, %v3382_v9 }
 0x994   : > { %v3376_v36 = vadd.f32 %v3375_v18, %v3374_v3  ;;  %v3392_v2 = vadd.f32 %v3391_v37, %v3390_v52  ;;  %v3369_v14 = vrot.slane %v3368_v1, 1  ;;  %v3385_v15 = vrot.slane %v3384_v43, 1 }
 0x996   : > { %v3377_v16 = vrot.slane %v3376_v36, 1  ;;  %v3393_v17 = vrot.slane %v3392_v2, 1  ;;  %v3370_v19 = vadd.f32 %v3369_v14, %v3368_v1  ;;  %v3386_v20 = vadd.f32 %v3385_v15, %v3384_v43 }
 0x998   : > { %v3378_v22 = vadd.f32 %v3377_v16, %v3376_v36  ;;  %v3394_v23 = vadd.f32 %v3393_v17, %v3392_v2  ;;  %v3395_v24 = vmul.f32 0.11111111, %v3370_v19  ;;  %v3397_v63 = vmul.f32 0.11111111, %v3386_v20 }
 0x99a   : > { %v3396_v44 = vmul.f32 0.11111111, %v3378_v22  ;;  %v3398_v30 = vmul.f32 0.11111111, %v3394_v23  ;;  %v5609_v0 = vsub.f32 %v3353_v25, %v3395_v24  ;;  %v5611_v21 = vsub.f32 %v3357_v11, %v3395_v24 }
 0x99b   : > { %v5613_v28 = vsub.f32 %v3355_v54, %v3397_v63  ;;  %v5615_v12 = vsub.f32 %v3359_v61, %v3397_v63 }
 0x99c   : > { %v5617_v57 = vsub.f32 %v3354_v38, %v3396_v44  ;;  %v5619_v5 = vsub.f32 %v3358_v33, %v3396_v44  ;;  %v5621_v49 = vsub.f32 %v3356_v39, %v3398_v30  ;;  %v5623_v4 = vsub.f32 %v3360_v34, %v3398_v30 }
 0x99d   : > { %v3407_v53 = vmul.f32 %v5609_v0, %v5609_v0  ;;  %v3411_v56 = vmul.f32 %v5611_v21, %v5611_v21  ;;  %v3409_v8 = vmul.f32 %v5613_v28, %v5613_v28  ;;  %v3413_v27 = vmul.f32 %v5615_v12, %v5615_v12 }
 0x99e   : > { %v3408_v11 = vmul.f32 %v5617_v57, %v5617_v57  ;;  %v3412_v61 = vmul.f32 %v5619_v5, %v5619_v5  ;;  %v3410_v25 = vmul.f32 %v5621_v49, %v5621_v49  ;;  %v3414_v54 = vmul.f32 %v5623_v4, %v5623_v4 }
 0x99f   : > { %v3415_v33 = vsel %vm2180_vm11, %v3411_v56, 0.0  ;;  %v3431_v34 = vsel %vm2180_vm11, %v3413_v27, 0.0  ;;  %v3362_v56 = vld [vmem:[%s5801_s23] sm:$0xf] }
 0x9a0   : > { %v3416_v38 = vadd.f32 %v3415_v33, %v3407_v53  ;;  %v3432_v39 = vadd.f32 %v3431_v34, %v3409_v8  ;;  %v3423_v45 = vsel %vm2180_vm11, %v3412_v61, 0.0  ;;  %v3439_v40 = vsel %vm2180_vm11, %v3414_v54, 0.0  ;;  %v3361_v53 = vld [vmem:[%s5800_s22] sm:$0xf] }
 0x9a1   : > { %v3424_v41 = vadd.f32 %v3423_v45, %v3408_v11  ;;  %v3440_v47 = vadd.f32 %v3439_v40, %v3410_v25  ;;  %v3471_v8 = vrot.slane %v3361_v53, %v5367_v26  ;;  %v3479_v11 = vrot.slane %v3361_v53, %v5371_v31 }
 0x9a2   : > { %v3417_v42 = vrot.slane %v3416_v38, 4  ;;  %v3433_v50 = vrot.slane %v3432_v39, 4  ;;  %v3475_v54 = vrot.slane %v3361_v53, %v5374_v32  ;;  %v3483_v33 = vrot.slane %v3361_v53, %v5377_v51 }
 0x9a3   : > { %v3425_v29 = vrot.slane %v3424_v41, 4  ;;  %v3441_v7 = vrot.slane %v3440_v47, 4  ;;  %v3500_v34 = vrot.slane %v3362_v56, %v5367_v26  ;;  %v3504_v40 = vrot.slane %v3362_v56, %v5374_v32 }
 0x9a4   : > { %v3418_v10 = vadd.f32 %v3417_v42, %v3416_v38  ;;  %v3434_v55 = vadd.f32 %v3433_v50, %v3432_v39 }
 0x9a5   : > { %v3426_v59 = vadd.f32 %v3425_v29, %v3424_v41  ;;  %v3442_v46 = vadd.f32 %v3441_v7, %v3440_v47  ;;  %v3508_v41 = vrot.slane %v3362_v56, %v5371_v31 }
 0x9a6   : > { %v3419_v60 = vrot.slane %v3418_v10, 2  ;;  %v3435_v9 = vrot.slane %v3434_v55, 2 }
 0x9a7   : > { %v3427_v3 = vrot.slane %v3426_v59, 2  ;;  %v3443_v52 = vrot.slane %v3442_v46, 2 }
 0x9a8   : > { %v3420_v6 = vadd.f32 %v3419_v60, %v3418_v10  ;;  %v3436_v48 = vadd.f32 %v3435_v9, %v3434_v55 }
 0x9a9   : > { %v3428_v18 = vadd.f32 %v3427_v3, %v3426_v59  ;;  %v3444_v37 = vadd.f32 %v3443_v52, %v3442_v46 }
 0x9aa   : > { %v3421_v1 = vrot.slane %v3420_v6, 1  ;;  %v3437_v43 = vrot.slane %v3436_v48, 1 }
 0x9ab   : > { %v3429_v36 = vrot.slane %v3428_v18, 1  ;;  %v3445_v2 = vrot.slane %v3444_v37, 1 }
 0x9ac   : > { %v3422_v14 = vadd.f32 %v3421_v1, %v3420_v6  ;;  %v3438_v15 = vadd.f32 %v3437_v43, %v3436_v48  ;;  %v3831_v43 = vld [vmem:[%s5810_s1 + $0x10] sm:$0xff] }
 0x9ad   : > { %v3430_v16 = vadd.f32 %v3429_v36, %v3428_v18  ;;  %v3446_v17 = vadd.f32 %v3445_v2, %v3444_v37  ;;  %v3832_v18 = vld [vmem:[%s5810_s1 + $0x18] sm:$0xff] }
 0x9ae   : > { %v3447_v19 = vmul.f32 0.11111111, %v3422_v14  ;;  %v3449_v20 = vmul.f32 0.11111111, %v3438_v15  ;;  %v3830_v14 = vld [vmem:[%s5810_s1 + $0x8] sm:$0xff]  ;;  %v3829_v15 = vld [vmem:[%s5810_s1] sm:$0xff] }
 0x9af   : > { %v3448_v22 = vmul.f32 0.11111111, %v3430_v16  ;;  %v3450_v23 = vmul.f32 0.11111111, %v3446_v17  ;;  %v5812_v16 = vld [vmem:[#allocation22_spill] sm:$0xff]  ;;  %v3840_v17 = vld [vmem:[%s5811_s0 + $0x38] sm:$0xff] }
 0x9b0   : > { %v3451_v24 = vadd.f32 1e-05, %v3447_v19  ;;  %v3453_v63 = vadd.f32 1e-05, %v3449_v20  ;;  %v3839_v19 = vld [vmem:[%s5811_s0 + $0x30] sm:$0xff]  ;;  %v3838_v20 = vld [vmem:[%s5811_s0 + $0x28] sm:$0xff] }
 0x9b1   : > { %v3452_v44 = vadd.f32 1e-05, %v3448_v22  ;;  %v3454_v30 = vadd.f32 1e-05, %v3450_v23  ;;  %v3837_v22 = vld [vmem:[%s5811_s0 + $0x20] sm:$0xff]  ;;  %v3836_v23 = vld [vmem:[%s5811_s0 + $0x18] sm:$0xff] }
 0x9b2   : > { %4810 = vrsqrt.f32 %v3451_v24  ;;  %v3835_v24 = vld [vmem:[%s5811_s0 + $0x10] sm:$0xff] }
 0x9b3   : > { %4812 = vrsqrt.f32 %v3453_v63  ;;  %v3834_v63 = vld [vmem:[%s5811_s0 + $0x8] sm:$0xff] }
 0x9b4   : > { %4814 = vrsqrt.f32 %v3452_v44  ;;  %v3833_v44 = vld [vmem:[%s5811_s0] sm:$0xff] }
 0x9b5   : > { %4816 = vrsqrt.f32 %v3454_v30 }
 0x9bf   : > { %v4811_v27 = vpop.eup %4810 }
 0x9c0   : > { %v4813_v61 = vpop.eup %4812  ;;  %v3459_v25 = vmul.f32 %v4811_v27, %v5609_v0  ;;  %v3463_v39 = vmul.f32 %v4811_v27, %v5611_v21  ;;  %v3512_v21 = vrot.slane %v3362_v56, %v5377_v51 }
 0x9c1   : > { %v4815_v38 = vpop.eup %4814  ;;  %v3461_v45 = vmul.f32 %v4813_v61, %v5613_v28  ;;  %v3465_v42 = vmul.f32 %v4813_v61, %v5615_v12 }
 0x9c2   : > { %v4817_v47 = vpop.eup %4816  ;;  %v3464_v0 = vmul.f32 %v4815_v38, %v5619_v5  ;;  %v3460_v50 = vmul.f32 %v4815_v38, %v5617_v57  ;;  %v3488_v29 = vmul.f32 %v3471_v8, %v3459_v25  ;;  %v3492_v46 = vmul.f32 %v3471_v8, %v3463_v39 }
 0x9c3   : > { %v3466_v7 = vmul.f32 %v4817_v47, %v5623_v4  ;;  %v3462_v26 = vmul.f32 %v4817_v47, %v5621_v49  ;;  %v3490_v10 = vmul.f32 %v3479_v11, %v3461_v45  ;;  %v3494_v9 = vmul.f32 %v3479_v11, %v3465_v42 }
 0x9c4   : > { %v3489_v28 = vmul.f32 %v3475_v54, %v3460_v50  ;;  %v3493_v55 = vmul.f32 %v3475_v54, %v3464_v0  ;;  %v3517_v59 = vadd.f32 %v3500_v34, %v3488_v29  ;;  %v3521_v6 = vadd.f32 %v3500_v34, %v3492_v46 }
 0x9c5   : > { %v3491_v32 = vmul.f32 %v3483_v33, %v3462_v26  ;;  %v3495_v31 = vmul.f32 %v3483_v33, %v3466_v7  ;;  %v3519_v60 = vadd.f32 %v3508_v41, %v3490_v10  ;;  %v3523_v37 = vadd.f32 %v3508_v41, %v3494_v9 }
 0x9c6   : > { %v3518_v12 = vadd.f32 %v3504_v40, %v3489_v28  ;;  %v3522_v5 = vadd.f32 %v3504_v40, %v3493_v55  ;;  %v3525_v49 = vmax.f32 %v3517_v59, 0.0  ;;  %v3529_v36 = vmax.f32 %v3521_v6, 0.0 }
 0x9c7   : > { %v3520_v57 = vadd.f32 %v3512_v21, %v3491_v32  ;;  %v3524_v3 = vadd.f32 %v3512_v21, %v3495_v31  ;;  %v3527_v51 = vmax.f32 %v3519_v60, 0.0  ;;  %v3531_v2 = vmax.f32 %v3523_v37, 0.0 }
 0x9c8   : > { %v3526_v4 = vmax.f32 %v3518_v12, 0.0  ;;  %v3530_v48 = vmax.f32 %v3522_v5, 0.0 }
 0x9c9   : > { %v3528_v52 = vmax.f32 %v3520_v57, 0.0  ;;  %v3532_v1 = vmax.f32 %v3524_v3, 0.0 }
 0x9ca   : > { %3668 = vmatprep.mubr.f32.mxu0 %v3526_v4 }
 0x9cb   : > { %3743 = vmatprep.mubr.f32.mxu1 %v3528_v52  ;;  %3669 = vmatmul.mubr.f32.vlgmr.msra.gmra.mxu0 %v3525_v49 }
 0x9cc   : > { %3744 = vmatmul.mubr.f32.vlgmr.msra.gmra.mxu1 %v3527_v51  ;;  %3673 = vmatprep.mubr.f32.mxu0 %v3530_v48 }
 0x9cd   : > { %3748 = vmatprep.mubr.f32.mxu1 %v3532_v1  ;;  %4708 = vmatpush3.msra.mxu1 %v3832_v18 }
 0x9ce   : > { %4709 = vmatprep.subr.mxu1 %v5803_v35  ;;  %4689 = vmatpush3.msra.mxu0 %v3840_v17 }
 0x9cf   : > { %4710 = vmatpush3.msra.mxu1 %v3831_v43  ;;  %3674 = vmatmul.mubr.f32.gmra.mxu0 %v3529_v36 }
 0x9d0   : > { %3749 = vmatmul.mubr.f32.gmra.mxu1 %v3531_v2  ;;  %4711 = vmatprep.subr.mxu1 %v5803_v35 }
 0x9d1   : > { %4712 = vmatpush3.msra.mxu1 %v3830_v14  ;;  %4715 = vmatprep.mubr.msk.f32.mxu1 %vm4867_vm7, %v5803_v35 }
 0x9d2   : > { %4713 = vmatprep.subr.mxu1 %v5803_v35  ;;  %4704 = vmatprep.mubr.msk.f32.mxu0 %vm4867_vm7, %v5803_v35 }
 0x9d3   : > { %4714 = vmatpush3.msra.mxu1 %v3829_v15  ;;  %4690 = vmatprep.subr.mxu0 %v5803_v35 }
 0x9d4   : > { %4716 = vmatmul.mubr.msk.f32.vlgmr.msra.gmra.mxu1 %vm1059_vm8, %v5812_v16  ;;  %4718 = vmatprep.subr.mxu1 %v5803_v35 }
 0x9d5   : > { %4734 = vmatprep.mubr.msk.f32.mxu1 %vm4867_vm7, %v5803_v35  ;;  %4691 = vmatpush3.msra.mxu0 %v3839_v19 }
 0x9d6   : > { %4692 = vmatprep.subr.mxu0 %v5803_v35 }
 0x9d7   : > { %4693 = vmatpush3.msra.mxu0 %v3838_v20 }
 0x9d8   : > { %4694 = vmatprep.subr.mxu0 %v5803_v35 }
 0x9d9   : > { %4695 = vmatpush3.msra.mxu0 %v3837_v22 }
 0x9da   : > { %4696 = vmatprep.subr.mxu0 %v5803_v35 }
 0x9db   : > { %4697 = vmatpush3.msra.mxu0 %v3836_v23 }
 0x9dc   : > { %4698 = vmatprep.subr.mxu0 %v5803_v35 }
 0x9dd   : > { %4699 = vmatpush3.msra.mxu0 %v3835_v24 }
 0x9de   : > { %4700 = vmatprep.subr.mxu0 %v5803_v35 }
 0x9df   : > { %4701 = vmatpush3.msra.mxu0 %v3834_v63 }
 0x9e0   : > { %4702 = vmatprep.subr.mxu0 %v5803_v35 }
 0x9e1   : > { %4703 = vmatpush3.msra.mxu0 %v3833_v44 }
 0x9e2   : > { %4737 = vmatprep.subr.mxu0 %v5803_v35 }
 0xa8b   : > { %v4540_v30 = vpop.f32.mrf.mxu0 }
 0xa8c   : > { %v4578_v53 = vpop.f32.mrf.mxu1 }
 0xa8d   : > { %v4541_v56 = vpop.f32.mrf.mxu0 }
 0xa8e   : > { %v4542_v8 = vadd.f32 %v4541_v56, %v4540_v30  ;;  %v4579_v27 = vpop.f32.mrf.mxu1 }
 0xa8f   : > { %v4543_v11 = vpop.f32.mrf.mxu0  ;;  %v4580_v33 = vadd.f32 %v4579_v27, %v4578_v53 }
 0xa90   : > { %v3671_v61 = vadd.f32 %v4542_v8, %v5476_v13  ;;  %v4581_v25 = vpop.f32.mrf.mxu1 }
 0xa91   : > { %v4544_v54 = vpop.f32.mrf.mxu0 }
 0xa92   : > { %v4545_v34 = vadd.f32 %v4544_v54, %v4543_v11  ;;  %v4582_v38 = vpop.f32.mrf.mxu1  ;;  %v3746_v39 = vadd.f32 %v4580_v33, %v3671_v61 }
 0xa93   : > { %v4583_v40 = vadd.f32 %v4582_v38, %v4581_v25 }
 0xa94   : > { %v3676_v45 = vadd.f32 %v4545_v34, %v5476_v13  ;;  %v5697_v41 = vpop.f32.mrf.mxu1  ;;  %v3756_v0 = vsel %vm2575_vm9, %v3746_v39, 0.0 }
 0xa96   : > { %v3751_v47 = vadd.f32 %v4583_v40, %v3676_v45  ;;  %v4717_v42 = vpop.f32.mrf.mxu1  ;;  %v4161_v40 = vld [vmem:[%s4915_s3] sm:$0x3] }
 0xa97   : > { %v5814_v42 = vld [vmem:[#allocation23_spill] sm:$0xff] }
 0xa98   : > { %v3757_v50 = vsel %vm2577_vm12, %v3751_v47, 0.0 }
 0xa99   : > { %v3758_v29 = vadd.f32 %v3757_v50, %v3756_v0  ;;  %v4039_v0 = vld [vmem:[%s5813_s2 + $0x38] sm:$0xff]  ;;  %v4038_v50 = vld [vmem:[%s5813_s2 + $0x30] sm:$0xff] }
 0xa9a   : > { %4719 = vmatpush3.msra.mxu1 %v4039_v0 }
 0xa9b   : > { %v3759_v7 = vrot.slane %v3758_v29, 4  ;;  %4720 = vmatprep.subr.mxu1 %v5803_v35 }
 0xa9c   : > { %4721 = vmatpush3.msra.mxu1 %v4038_v50 }
 0xa9d   : > { %v3760_v26 = vadd.f32 %v3759_v7, %v3758_v29  ;;  %4722 = vmatprep.subr.mxu1 %v5803_v35  ;;  %v4037_v29 = vld [vmem:[%s5813_s2 + $0x28] sm:$0xff]  ;;  %v4036_v7 = vld [vmem:[%s5813_s2 + $0x20] sm:$0xff] }
 0xa9e   : > { %4723 = vmatpush3.msra.mxu1 %v4037_v29 }
 0xa9f   : > { %v3761_v21 = vrot.slane %v3760_v26, 2  ;;  %4724 = vmatprep.subr.mxu1 %v5803_v35 }
 0xaa0   : > { %4725 = vmatpush3.msra.mxu1 %v4036_v7  ;;  %v4382_v7 = vld [vmem:[%s5819_s26] ss:$0 sm:$0xff] }
 0xaa1   : > { %v3762_v10 = vadd.f32 %v3761_v21, %v3760_v26  ;;  %4726 = vmatprep.subr.mxu1 %v5803_v35  ;;  %v4035_v26 = vld [vmem:[%s5813_s2 + $0x18] sm:$0xff]  ;;  %v4034_v21 = vld [vmem:[%s5813_s2 + $0x10] sm:$0xff] }
 0xaa2   : > { %4727 = vmatpush3.msra.mxu1 %v4035_v26 }
 0xaa3   : > { %v3763_v28 = vrot.slane %v3762_v10, 1  ;;  %4728 = vmatprep.subr.mxu1 %v5803_v35 }
 0xaa4   : > { %4729 = vmatpush3.msra.mxu1 %v4034_v21 }
 0xaa5   : > { %v3764_v55 = vadd.f32 %v3763_v28, %v3762_v10  ;;  %4730 = vmatprep.subr.mxu1 %v5803_v35  ;;  %v4033_v10 = vld [vmem:[%s5813_s2 + $0x8] sm:$0xff]  ;;  %v4032_v28 = vld [vmem:[%s5813_s2] sm:$0xff] }
 0xaa6   : > { %4731 = vmatpush3.msra.mxu1 %v4033_v10 }
 0xaa7   : > { %v3765_v32 = vmul.f32 0.11111111, %v3764_v55  ;;  %4732 = vmatprep.subr.mxu1 %v5803_v35 }
 0xaa8   : > { %4733 = vmatpush3.msra.mxu1 %v4032_v28 }
 0xaa9   : > { %v3766_v59 = vsub.f32 %v3746_v39, %v3765_v32  ;;  %v3767_v31 = vsub.f32 %v3751_v47, %v3765_v32  ;;  %v4377_v32 = vld [vmem:[%s5815_s7] ss:$0 sm:$0xff]  ;;  %s5820_s7 = sld [smem:[#allocation15_spill]] }
 0xaab   : > { %v3768_v13 = vmul.f32 %v3766_v59, %v3766_v59  ;;  %v3769_v46 = vmul.f32 %v3767_v31, %v3767_v31 }
 0xaad   : > { %v3770_v12 = vsel %vm2575_vm9, %v3768_v13, 0.0  ;;  %v3771_v60 = vsel %vm2577_vm12, %v3769_v46, 0.0  ;;  %v4384_v13 = vld [vmem:[%s4920_s8] ss:$0 sm:$0xff] }
 0xaae   : > { %v3772_v5 = vadd.f32 %v3771_v60, %v3770_v12 }
 0xaaf   : > { %v4383_v21 = vld [vmem:[%s5820_s7] ss:$0 sm:$0xff] }
 0xab0   : > { %v3773_v9 = vrot.slane %v3772_v5, 4 }
 0xab2   : > { %v3774_v57 = vadd.f32 %v3773_v9, %v3772_v5 }
 0xab4   : > { %v3775_v3 = vrot.slane %v3774_v57, 2 }
 0xab6   : > { %v3776_v4 = vadd.f32 %v3775_v3, %v3774_v57 }
 0xab8   : > { %v3777_v52 = vrot.slane %v3776_v4, 1 }
 0xaba   : > { %v3778_v49 = vadd.f32 %v3777_v52, %v3776_v4 }
 0xabc   : > { %v3779_v6 = vmul.f32 0.11111111, %v3778_v49 }
 0xabe   : > { %v3780_v51 = vadd.f32 1e-05, %v3779_v6 }
 0xac0   : > { %4818 = vrsqrt.f32 %v3780_v51 }
 0xacd   : > { %v4819_v48 = vpop.eup %4818 }
 0xace   : > { %v3782_v18 = vmul.f32 %v4819_v48, %v3766_v59  ;;  %v3783_v37 = vmul.f32 %v4819_v48, %v3767_v31 }
 0xad0   : > { %v3790_v1 = vmul.f32 %v5510_v58, %v3782_v18  ;;  %v3791_v43 = vmul.f32 %v5510_v58, %v3783_v37 }
 0xad2   : > { %v3798_v36 = vadd.f32 %v5513_v62, %v3790_v1  ;;  %v3799_v2 = vadd.f32 %v5513_v62, %v3791_v43 }
 0xad4   : > { %v3800_v14 = vmax.f32 %v3798_v36, 0.0  ;;  %v3801_v15 = vmax.f32 %v3799_v2, 0.0 }
 0xad6   : > { %v3802_v16 = vsel %vm2623_vm13, %v3800_v14, -inf  ;;  %v3809_v17 = vsel %vm2631_vm14, %v3800_v14, -inf  ;;  %v3816_v19 = vsel %vm2639_vm15, %v3800_v14, -inf  ;;  %v3817_v20 = vsel %vm2577_vm12, %v3801_v15, -inf }
 0xad7   : > { %v3803_v22 = vrot.slane %v3802_v16, 4  ;;  %v3810_v23 = vrot.slane %v3809_v17, 4  ;;  %v3818_v24 = vmax.f32 %v3816_v19, %v3817_v20  ;;  %v4379_v20 = vld [vmem:[%s5817_s11] ss:$0 sm:$0xff] }
 0xad9   : > { %v3804_v63 = vmax.f32 %v3802_v16, %v3803_v22  ;;  %v3811_v44 = vmax.f32 %v3809_v17, %v3810_v23  ;;  %v3819_v58 = vrot.slane %v3818_v24, 4  ;;  %v4378_v17 = vld [vmem:[%s5816_s10] ss:$0 sm:$0xff] }
 0xadb   : > { %v3805_v30 = vrot.slane %v3804_v63, 2  ;;  %v3812_v53 = vrot.slane %v3811_v44, 2  ;;  %v3820_v62 = vmax.f32 %v3818_v24, %v3819_v58 }
 0xadd   : > { %v3806_v56 = vmax.f32 %v3804_v63, %v3805_v30  ;;  %v3813_v8 = vmax.f32 %v3811_v44, %v3812_v53  ;;  %v3821_v27 = vrot.slane %v3820_v62, 2  ;;  %v4380_v63 = vld [vmem:[%s5818_s16] ss:$0 sm:$0xff] }
 0xadf   : > { %v3807_v11 = vrot.slane %v3806_v56, 1  ;;  %v3814_v61 = vrot.slane %v3813_v8, 1  ;;  %v3822_v25 = vmax.f32 %v3820_v62, %v3821_v27 }
 0xae1   : > { %v3808_v54 = vmax.f32 %v3806_v56, %v3807_v11  ;;  %v3815_v33 = vmax.f32 %v3813_v8, %v3814_v61  ;;  %v3823_v34 = vrot.slane %v3822_v25, 1 }
 0xae3   : > { %v3824_v38 = vmax.f32 %v3822_v25, %v3823_v34  ;;  %v3825_v39 = vsel %vm2180_vm11, %v3808_v54, %v3815_v33 }
 0xae5   : > { %v3826_v45 = vsel %vm1640_vm5, %v3825_v39, %v3824_v38 }
 0xae6   : > { %3827 = vst.msk [vmem:[#allocation6 + $0x3] sm:$0x7] %vm2623_vm13, %v3826_v45 }
 0xaed   : > { %v3828_v47 = vld [vmem:[#allocation6] sm:$0x3f] }
 0xaee   : > { %4705 = vmatmul.mubr.msk.f32.vlgmr.msra.gmra.mxu0 %vm2575_vm9, %v3828_v47 }
 0xaef   : > { %4738 = vmatpush3.msk.msra.mxu0 %vm1640_vm5, %v4161_v40  ;;  %4739 = vmatprep.mubr.msk.f32.mxu0 %vm4867_vm7, %v5803_v35  ;;  %vm4245_vm7 = vcmask 128000  }
 0xaf2   : > { %4740 = vmatmul.mubr.msk.f32.vlgmr.msra.gmra.mxu0 %vm1633_vm10, %v5814_v42 }
 0xbae   : > { %v3910_v55 = vpop.f32.mrf.mxu0 }
 0xbaf   : > { %v3981_v59 = vadd.f32 %v5697_v41, %v3910_v55 }
 0xbb0   : > { %v4706_v31 = vpop.f32.mrf.mxu0 }
 0xbb1   : > { %v3991_v46 = vadd.f32 %v4377_v32, %v3981_v59 }
 0xbb2   : > { %v4241_v12 = vpop.f32.mrf.mxu0 }
 0xbb3   : > { %v3995_v60 = vsel %vm3994_vm6, %v3991_v46, 0.0  ;;  %v4242_v5 = vadd.f32 %v4384_v13, %v4241_v12 }
 0xbb4   : > { %v3996_v9 = vrot.slane %v3995_v60, 4  ;;  %v4741_v57 = vpop.f32.mrf.mxu0 }
 0xbb5   : > { %4246 = vst.msk [vmem:[#allocation4] sm:$0x3f] %vm4245_vm7, %v4242_v5 }
 0xbb6   : > { %v3997_v3 = vadd.f32 %v3996_v9, %v3995_v60 }
 0xbb8   : > { %v3998_v4 = vrot.slane %v3997_v3, 2 }
 0xbba   : > { %v3999_v35 = vadd.f32 %v3998_v4, %v3997_v3 }
 0xbbc   : > { %v4000_v52 = vrot.slane %v3999_v35, 1 }
 0xbbe   : > { %v4001_v49 = vadd.f32 %v4000_v52, %v3999_v35 }
 0xbc0   : > { %v4003_v6 = vmul.f32 0.16666667, %v4001_v49 }
 0xbc2   : > { %v4004_v41 = vsub.f32 %v3991_v46, %v4003_v6 }
 0xbc4   : > { %v4005_v51 = vmul.f32 %v4004_v41, %v4004_v41 }
 0xbc6   : > { %v4006_v48 = vsel %vm3994_vm6, %v4005_v51, 0.0 }
 0xbc7   : > { %v4007_v18 = vrot.slane %v4006_v48, 4 }
 0xbc9   : > { %v4008_v37 = vadd.f32 %v4007_v18, %v4006_v48 }
 0xbcb   : > { %v4009_v1 = vrot.slane %v4008_v37, 2 }
 0xbcd   : > { %v4010_v43 = vadd.f32 %v4009_v1, %v4008_v37 }
 0xbcf   : > { %v4011_v36 = vrot.slane %v4010_v43, 1 }
 0xbd1   : > { %v4012_v2 = vadd.f32 %v4011_v36, %v4010_v43 }
 0xbd3   : > { %v4013_v14 = vmul.f32 0.16666667, %v4012_v2 }
 0xbd5   : > { %v4014_v15 = vadd.f32 1e-05, %v4013_v14 }
 0xbd7   : > { %4820 = vrsqrt.f32 %v4014_v15 }
 0xbe4   : > { %v4821_v16 = vpop.eup %4820 }
 0xbe5   : > { %v4016_v19 = vmul.f32 %v4821_v16, %v4004_v41 }
 0xbe7   : > { %v4023_v22 = vmul.f32 %v4378_v17, %v4016_v19 }
 0xbe9   : > { %v4030_v23 = vadd.f32 %v4379_v20, %v4023_v22 }
 0xbeb   : > { %v4031_v24 = vmax.f32 %v4030_v23, 0.0 }
 0xbed   : > { %4735 = vmatmul.mubr.msk.f32.vlgmr.msra.gmra.mxu1 %vm2575_vm9, %v4031_v24 }
 0xcad   : > { %v4116_v44 = vpop.f32.mrf.mxu1 }
 0xcae   : > { %v4117_v58 = vadd.f32 %v4380_v63, %v4116_v44 }
 0xcaf   : > { %v4736_v30 = vpop.f32.mrf.mxu1 }
 0xcb0   : > { %v4122_v53 = vsel %vm1248_vm1, %v4117_v58, 0.0 }
 0xcb1   : > { %v4123_v62 = vrot.slane %v4122_v53, 4 }
 0xcb3   : > { %v4124_v56 = vadd.f32 %v4123_v62, %v4122_v53 }
 0xcb5   : > { %v4125_v8 = vrot.slane %v4124_v56, 2 }
 0xcb7   : > { %v4126_v27 = vadd.f32 %v4125_v8, %v4124_v56 }
 0xcb9   : > { %v4127_v11 = vrot.slane %v4126_v27, 1 }
 0xcbb   : > { %v4128_v61 = vadd.f32 %v4127_v11, %v4126_v27 }
 0xcbd   : > { %v4129_v25 = vmul.f32 0.16666667, %v4128_v61 }
 0xcbf   : > { %v4130_v54 = vsub.f32 %v4117_v58, %v4129_v25 }
 0xcc1   : > { %v4131_v33 = vmul.f32 %v4130_v54, %v4130_v54 }
 0xcc3   : > { %v4132_v34 = vsel %vm1248_vm1, %v4131_v33, 0.0 }
 0xcc4   : > { %v4133_v38 = vrot.slane %v4132_v34, 4 }
 0xcc6   : > { %v4134_v39 = vadd.f32 %v4133_v38, %v4132_v34 }
 0xcc8   : > { %v4135_v45 = vrot.slane %v4134_v39, 2 }
 0xcca   : > { %v4136_v40 = vadd.f32 %v4135_v45, %v4134_v39 }
 0xccc   : > { %v4137_v47 = vrot.slane %v4136_v40, 1 }
 0xcce   : > { %v4138_v42 = vadd.f32 %v4137_v47, %v4136_v40 }
 0xcd0   : > { %v4139_v0 = vmul.f32 0.16666667, %v4138_v42 }
 0xcd2   : > { %v4140_v50 = vadd.f32 1e-05, %v4139_v0 }
 0xcd4   : > { %4822 = vrsqrt.f32 %v4140_v50 }
 0xce1   : > { %v4823_v29 = vpop.eup %4822 }
 0xce2   : > { %v4142_v26 = vmul.f32 %v4823_v29, %v4130_v54 }
 0xce4   : > { %v4149_v10 = vmul.f32 %v4382_v7, %v4142_v26 }
 0xce6   : > { %v4156_v28 = vadd.f32 %v4383_v21, %v4149_v10 }
 0xce8   : > { %v4157_v55 = vmax.f32 %v4156_v28, 0.0 }
 0xcea   : > { %4158 = vst.msk [vmem:[#allocation2] sm:$0x3f] %vm1248_vm1, %v4157_v55  ;;  %4250 = vst.msk [vmem:[%s5040_s27] sm:$0x3f] %vm1248_vm1, %v4157_v55 }
 0xceb PF: > { %s76_s28 = sadd.s32 1, %s4830_s28  }
 0xcec   : > { %p73_p4 = scmp.ge.s32.totalorder %s76_s28, 6  }
 0xcee   :  { %75 = sbr.rel (!%p73_p4) target bundleno = 51 (0x33), region = 212 }

</bundles_post_ra>
